<compile_context>
chip_gen: v7x
topology: tpu7x:2x2x1
jax: 0.10.0
libtpu: 0.0.40
codegen_flags: <defaults>
</compile_context>

<pallas_src>
import jax
import jax.numpy as jnp
from jax import lax
from jax.experimental import pallas as pl
from jax.experimental.pallas import tpu as pltpu


def _round_up(x, m):
    return ((x + m - 1) // m) * m


def _pad_to(a, shape):
    return jnp.pad(a, [(0, s - d) for d, s in zip(a.shape, shape)])


# --------------------------------------------------------------------------- kernel
def _agent_prediction_kernel(
    feat_ref,          # (nb, D)      bf16   agent features (tile)
    w_init_ref,        # (D, 2*Hp)    bf16   state_init_fc weight (per-gate padded)
    b_init_ref,        # (1, 2*Hp)    f32
    lstm_in_ref,       # (1, 4*Hp)    f32    ctrl@W_lstm_in + b (+1 forget bias, 0.5 gate scale folded)
    w_lrec_ref,        # (Hp, 4*Hp)   bf16   LSTM recurrent weight (0.5 folded into gate cols)
    bb_row_ref,        # (1, Bp)      f32    0.666*(ctrl@W_bb_x + b_bb)
    w_bbh_ref,         # (Hp, Bp)     bf16   0.666*W_bb_h
    w_ff_ref,          # (Bp, 3*Hp)   bf16   1.7159*[ff1 | ff2 | 0.5*(time_a+time_b)]
    b_ff_ref,          # (1, 3*Hp)    f32    [b_ff1 | b_ff2 | 0.5*(b_ta+b_tb)]
    w_fc_ref,          # (Hp, 128)    bf16   proj_size=2 readout, lane-padded
    b_fc_ref,          # (1, 128)     f32
    out_ref,           # (T, nb, 128) f32
    h_scratch_ref,     # (T, nb, Hp)  bf16   per-step hidden states for batched readout
):
    bf16 = jnp.bfloat16
    nb = feat_ref.shape[0]
    hp = w_lrec_ref.shape[0]
    op = w_fc_ref.shape[1]
    num_steps = h_scratch_ref.shape[0]

    # state_init_fc -> (h0, c0); pad lanes are exactly zero and stay zero through the
    # recurrence (zero-padded weight columns / row biases preserve the invariant).
    hc = jnp.dot(feat_ref[...], w_init_ref[...],
                 preferred_element_type=jnp.float32) + b_init_ref[...]
    h0 = hc[:, :hp]
    c0 = hc[:, hp:]

    # Constant (per-step) control-input contributions, folded in the wrapper.
    lstm_in = lstm_in_ref[...]     # (1, 4Hp), broadcasts over agents for free
    bb_in = bb_row_ref[...]        # (1, Bp)

    def step(t, carry):
        h, c = carry
        # --- ncps LSTMCell (mixed memory); sigmoid(x) == 0.5*tanh(0.5x)+0.5, the 0.5
        #     pre-scale (and the +1.0 forget bias) are already folded into the weights.
        z = lstm_in + jnp.dot(h.astype(bf16), w_lrec_ref[...],
                              preferred_element_type=jnp.float32)
        i_act  = jnp.tanh(z[:, 0 * hp:1 * hp])
        i_gate = 0.5 * jnp.tanh(z[:, 1 * hp:2 * hp]) + 0.5
        f_gate = 0.5 * jnp.tanh(z[:, 2 * hp:3 * hp]) + 0.5
        o_gate = 0.5 * jnp.tanh(z[:, 3 * hp:4 * hp]) + 0.5
        c_new = c * f_gate + i_act * i_gate
        h_lstm = jnp.tanh(c_new) * o_gate

        # --- CfCCell, mode="default", 1 backbone layer, ts == 1.0.
        #     lecun_tanh scales folded into w_bbh/bb_in (0.666) and w_ff rows (1.7159).
        xb = jnp.tanh(bb_in + jnp.dot(h_lstm.astype(bf16), w_bbh_ref[...],
                                      preferred_element_type=jnp.float32))
        g = jnp.dot(xb.astype(bf16), w_ff_ref[...],
                    preferred_element_type=jnp.float32) + b_ff_ref[...]
        ff1 = jnp.tanh(g[:, 0 * hp:1 * hp])
        ff2 = jnp.tanh(g[:, 1 * hp:2 * hp])
        t_interp = 0.5 * jnp.tanh(g[:, 2 * hp:3 * hp]) + 0.5   # sigmoid(t_a*1 + t_b)
        h_new = ff1 + t_interp * (ff2 - ff1)

        h_scratch_ref[t] = h_new.astype(bf16)
        return h_new, c_new

    unroll = True if num_steps <= 16 else 8
    lax.fori_loop(0, num_steps, step, (h0, c0), unroll=unroll)

    # --- readout projection (proj_size=2, lane-padded to 128), all T*nb rows at once.
    hs = h_scratch_ref[...].reshape(num_steps * nb, hp)
    res = jnp.dot(hs, w_fc_ref[...], preferred_element_type=jnp.float32) + b_fc_ref[...]
    out_ref[...] = res.reshape(num_steps, nb, op)


# ---------------------------------------------------------------- one-time weight prep
def prepare_params(params):
    """Fold constants / fuse heads / pad / cast once. Call this outside the hot path."""
    f32, bf16 = jnp.float32, jnp.bfloat16
    hidden = params["w_lstm_rec"].shape[0]
    backbone = params["w_ff1"].shape[0]
    hp = _round_up(hidden, 128)     # each gate/head lands on a 128-lane boundary
    bp = _round_up(backbone, 128)

    # Constant control input -> per-step row biases.
    ctrl = params["control_input"].astype(f32)                        # (1, D)
    lstm_in_row = ctrl @ params["w_lstm_in"] + params["b_lstm_in"]    # (1, 4H)
    bb_row = 0.666 * (ctrl @ params["w_bb_x"] + params["b_bb"])       # (1, B), lecun fold

    # LSTM: fold +1.0 forget bias and the 0.5 tanh-sigmoid pre-scale (i_gate/f_gate/o_gate).
    li = list(jnp.split(lstm_in_row, 4, axis=-1))                     # [i, ig, fg, og]
    wr = list(jnp.split(params["w_lstm_rec"].astype(f32), 4, axis=-1))
    li = [li[0], 0.5 * li[1], 0.5 * (li[2] + 1.0), 0.5 * li[3]]
    wr = [wr[0], 0.5 * wr[1], 0.5 * wr[2], 0.5 * wr[3]]
    lstm_in_row = jnp.concatenate([_pad_to(x, (1, hp)) for x in li], axis=-1)
    w_lrec = jnp.concatenate([_pad_to(x, (hp, hp)) for x in wr], axis=-1).astype(bf16)

    # state_init_fc, per-gate padded.
    wi = jnp.split(params["w_init"], 2, axis=-1)
    bi = jnp.split(params["b_init"], 2, axis=-1)
    w_init = jnp.concatenate([_pad_to(x, (x.shape[0], hp)) for x in wi], axis=-1).astype(bf16)
    b_init = jnp.concatenate([_pad_to(x, (1, hp)) for x in bi], axis=-1)

    # Backbone (0.666 lecun pre-scale folded).
    bb_row = _pad_to(bb_row, (1, bp))
    w_bbh = _pad_to(0.666 * params["w_bb_h"], (hp, bp)).astype(bf16)

    # Fused ff heads: 1.7159 lecun post-scale folded into the rows; time head gets the
    # extra 0.5 tanh-sigmoid pre-scale. ts == 1.0 so time_a/time_b only appear summed.
    w_ff = jnp.concatenate(
        [_pad_to(1.7159 * params["w_ff1"], (bp, hp)),
         _pad_to(1.7159 * params["w_ff2"], (bp, hp)),
         _pad_to(0.5 * 1.7159 * (params["w_ta"] + params["w_tb"]), (bp, hp))],
        axis=-1).astype(bf16)
    b_ff = jnp.concatenate(
        [_pad_to(params["b_ff1"], (1, hp)),
         _pad_to(params["b_ff2"], (1, hp)),
         _pad_to(0.5 * (params["b_ta"] + params["b_tb"]), (1, hp))], axis=-1)

    # Lane-dense readout (2 real columns, padded to 128 -> unmasked stores).
    w_fc = _pad_to(params["w_fc"], (hp, 128)).astype(bf16)
    b_fc = _pad_to(params["b_fc"], (1, 128))

    return {
        "w_init": w_init, "b_init": b_init, "lstm_in_row": lstm_in_row,
        "w_lrec": w_lrec, "bb_row": bb_row, "w_bbh": w_bbh,
        "w_ff": w_ff, "b_ff": b_ff, "w_fc": w_fc, "b_fc": b_fc,
    }


# ----------------------------------------------------------------------- per-call path
def agent_prediction_head(agent_features, prep, num_future_steps):
    n, d = agent_features.shape
    if n == 0:  # matches the PyTorch empty-input early return (wrapper glue)
        return jnp.zeros((0, num_future_steps, 2), jnp.float32)

    hp = prep["w_lrec"].shape[0]
    bp = prep["w_bbh"].shape[1]
    op = prep["w_fc"].shape[1]
    t = num_future_steps

    # Agent tiling: one TensorCore-parallel grid axis over agent tiles.
    nb = min(128, _round_up(n, 8))
    npad = _round_up(n, nb)
    ntiles = npad // nb

    feat = _pad_to(agent_features, (npad, d)).astype(jnp.bfloat16)

    weight_args = (prep["w_init"], prep["b_init"], prep["lstm_in_row"], prep["w_lrec"],
                   prep["bb_row"], prep["w_bbh"], prep["w_ff"], prep["b_ff"],
                   prep["w_fc"], prep["b_fc"])

    def resident(a):  # full-array block, constant index -> DMA'd once, stays in VMEM
        return pl.BlockSpec(a.shape, lambda i, _nd=a.ndim: (0,) * _nd)

    grid_spec = pltpu.PrefetchScalarGridSpec(
        num_scalar_prefetch=0,
        grid=(ntiles,),
        in_specs=[pl.BlockSpec((nb, d), lambda i: (i, 0))] + [resident(a) for a in weight_args],
        out_specs=pl.BlockSpec((t, nb, op), lambda i: (0, i, 0)),
        scratch_shapes=[pltpu.VMEM((t, nb, hp), jnp.bfloat16)],
    )

    flops = int(2 * npad * d * 2 * hp
                + t * 2 * npad * (hp * 4 * hp + hp * bp + bp * 3 * hp)
                + 2 * t * npad * hp * op)
    transcendentals = int(t * npad * (8 * hp + bp))
    bytes_accessed = int(feat.size * 2
                         + sum(a.size * a.dtype.itemsize for a in weight_args)
                         + t * npad * op * 4)

    out = pl.pallas_call(
        _agent_prediction_kernel,
        out_shape=jax.ShapeDtypeStruct((t, npad, op), jnp.float32),
        grid_spec=grid_spec,
        compiler_params=pltpu.CompilerParams(dimension_semantics=("parallel",)),
        cost_estimate=pl.CostEstimate(flops=flops,
                                      transcendentals=transcendentals,
                                      bytes_accessed=bytes_accessed),
    )(feat, *weight_args)

    # (T, Npad, 128) -> (N, T, 2), batch_first like PyTorch (slice fused with transpose).
    return jnp.transpose(out[:, :n, :2], (1, 0, 2))


# ----------------------------------------------------------------------- params / ref
def init_params(key, d_model, hidden, backbone_units):
    ks = jax.random.split(key, 19)

    def w(k, shape, scale=0.1):
        return (scale * jax.random.normal(k, shape)).astype(jnp.float32)

    return {
        "control_input": w(ks[0], (1, d_model), 1.0),          # nn.Parameter randn(1,1,d) (squeezed)
        "w_init": w(ks[1], (d_model, 2 * hidden)),              # state_init_fc
        "b_init": w(ks[2], (1, 2 * hidden)),
        "w_lstm_in": w(ks[3], (d_model, 4 * hidden)),           # LSTMCell input_map (bias=True)
        "b_lstm_in": w(ks[4], (1, 4 * hidden)),
        "w_lstm_rec": w(ks[5], (hidden, 4 * hidden)),           # LSTMCell recurrent_map (bias=False)
        "w_bb_x": w(ks[6], (d_model, backbone_units)),          # CfC backbone Linear split: x part
        "w_bb_h": w(ks[7], (hidden, backbone_units)),           # CfC backbone Linear split: h part
        "b_bb": w(ks[8], (1, backbone_units)),
        "w_ff1": w(ks[9], (backbone_units, hidden)),
        "b_ff1": w(ks[10], (1, hidden)),
        "w_ff2": w(ks[11], (backbone_units, hidden)),
        "b_ff2": w(ks[12], (1, hidden)),
        "w_ta": w(ks[13], (backbone_units, hidden)),
        "b_ta": w(ks[14], (1, hidden)),
        "w_tb": w(ks[15], (backbone_units, hidden)),
        "b_tb": w(ks[16], (1, hidden)),
        "w_fc": w(ks[17], (hidden, 2)),                         # proj_size = 2
        "b_fc": w(ks[18], (1, 2)),
    }


def reference(agent_features, params, num_future_steps):
    """Pure-JAX f32 mirror of the ncps CfC(mixed_memory=True) forward, for verification."""
    n, d = agent_features.shape
    hidden = params["w_lstm_rec"].shape[0]
    hc = agent_features @ params["w_init"] + params["b_init"]
    h, c = hc[:, :hidden], hc[:, hidden:]
    x = jnp.broadcast_to(params["control_input"], (n, d))
    outs = []
    for _ in range(num_future_steps):
        z = x @ params["w_lstm_in"] + params["b_lstm_in"] + h @ params["w_lstm_rec"]
        i_a = jnp.tanh(z[:, :hidden])
        i_g = jax.nn.sigmoid(z[:, hidden:2 * hidden])
        f_g = jax.nn.sigmoid(z[:, 2 * hidden:3 * hidden] + 1.0)
        o_g = jax.nn.sigmoid(z[:, 3 * hidden:])
        c = c * f_g + i_a * i_g
        h = jnp.tanh(c) * o_g
        xb = 1.7159 * jnp.tanh(0.666 * (x @ params["w_bb_x"] + h @ params["w_bb_h"] + params["b_bb"]))
        ff1 = jnp.tanh(xb @ params["w_ff1"] + params["b_ff1"])
        ff2 = jnp.tanh(xb @ params["w_ff2"] + params["b_ff2"])
        t_interp = jax.nn.sigmoid((xb @ params["w_ta"] + params["b_ta"]) +
                                  (xb @ params["w_tb"] + params["b_tb"]))
        h = ff1 * (1.0 - t_interp) + t_interp * ff2
        outs.append(h @ params["w_fc"] + params["b_fc"])
    return jnp.stack(outs, axis=1)


if __name__ == "__main__":
    # Small shapes consistent with the module's forward:
    # agent_features: (num_agents, d_model); output: (num_agents, num_future_steps, 2)
    num_agents = 8
    d_model = 32
    hidden = 32            # prediction_hidden_size (module default 128; kept small here)
    backbone_units = 64    # CfC backbone default 128; kept small here
    num_future_steps = 10  # module default

    key = jax.random.PRNGKey(0)
    k_feat, k_params = jax.random.split(key)
    agent_features = jax.random.normal(k_feat, (num_agents, d_model), dtype=jnp.float32)
    params = init_params(k_params, d_model, hidden, backbone_units)

    prep = prepare_params(params)                    # one-time weight preparation
    run = jax.jit(agent_prediction_head, static_argnums=(2,))

    traj = jax.block_until_ready(run(agent_features, prep, num_future_steps))
    assert traj.shape == (num_agents, num_future_steps, 2), traj.shape

    ref = jax.block_until_ready(reference(agent_features, params, num_future_steps))
    # NOTE: bf16 MXU inputs in the recurrence compound slight rounding over timesteps;
    # validated at T=10 within 1e-2 (re-validate if the deployed horizon is much longer).
    if not jnp.allclose(traj, ref, atol=1e-2, rtol=1e-2):
        err = float(jnp.max(jnp.abs(traj - ref)))
        raise AssertionError(f"Pallas kernel output does not match JAX reference (max abs err {err})")

    print("KERNEL_OK")
</pallas_src>

<mosaic_0001>
module attributes {stable_mosaic.version = 11 : i64} {
  func.func @_agent_prediction_kernel(%arg0: i32, %arg1: memref<8x32xbf16, #tpu.memory_space<vmem>>, %arg2: memref<32x256xbf16, #tpu.memory_space<vmem>>, %arg3: memref<1x256xf32, #tpu.memory_space<vmem>>, %arg4: memref<1x512xf32, #tpu.memory_space<vmem>>, %arg5: memref<128x512xbf16, #tpu.memory_space<vmem>>, %arg6: memref<1x128xf32, #tpu.memory_space<vmem>>, %arg7: memref<128x128xbf16, #tpu.memory_space<vmem>>, %arg8: memref<128x384xbf16, #tpu.memory_space<vmem>>, %arg9: memref<1x384xf32, #tpu.memory_space<vmem>>, %arg10: memref<128x128xbf16, #tpu.memory_space<vmem>>, %arg11: memref<1x128xf32, #tpu.memory_space<vmem>>, %arg12: memref<10x8x128xf32, #tpu.memory_space<vmem>>, %arg13: memref<10x8x128xbf16, #tpu.memory_space<vmem>>) attributes {dimension_semantics = [#tpu.dimension_semantics<parallel>], iteration_bounds = array<i64: 1>, scalar_prefetch = 0 : i64, scratch_operands = 1 : i64, tpu.core_type = #tpu.core_type<tc>, window_params = [{transform_indices = @transform_0, window_bounds = array<i64: 8, 32>}, {pipeline_mode = #tpu.pipeline_mode<synchronous>, transform_indices = @transform_1, window_bounds = array<i64: 32, 256>}, {pipeline_mode = #tpu.pipeline_mode<synchronous>, transform_indices = @transform_2, window_bounds = array<i64: 1, 256>}, {pipeline_mode = #tpu.pipeline_mode<synchronous>, transform_indices = @transform_3, window_bounds = array<i64: 1, 512>}, {pipeline_mode = #tpu.pipeline_mode<synchronous>, transform_indices = @transform_4, window_bounds = array<i64: 128, 512>}, {pipeline_mode = #tpu.pipeline_mode<synchronous>, transform_indices = @transform_5, window_bounds = array<i64: 1, 128>}, {pipeline_mode = #tpu.pipeline_mode<synchronous>, transform_indices = @transform_6, window_bounds = array<i64: 128, 128>}, {pipeline_mode = #tpu.pipeline_mode<synchronous>, transform_indices = @transform_7, window_bounds = array<i64: 128, 384>}, {pipeline_mode = #tpu.pipeline_mode<synchronous>, transform_indices = @transform_8, window_bounds = array<i64: 1, 384>}, {pipeline_mode = #tpu.pipeline_mode<synchronous>, transform_indices = @transform_9, window_bounds = array<i64: 128, 128>}, {pipeline_mode = #tpu.pipeline_mode<synchronous>, transform_indices = @transform_10, window_bounds = array<i64: 1, 128>}, {transform_indices = @transform_11, window_bounds = array<i64: 10, 8, 128>}]} {
    %c0 = arith.constant 0 : index
    %c0_0 = arith.constant 0 : index
    %0 = vector.load %arg1[%c0, %c0_0] : memref<8x32xbf16, #tpu.memory_space<vmem>>, vector<8x32xbf16>
    %c0_1 = arith.constant 0 : index
    %c0_2 = arith.constant 0 : index
    %1 = vector.load %arg2[%c0_1, %c0_2] : memref<32x256xbf16, #tpu.memory_space<vmem>>, vector<32x256xbf16>
    %cst = arith.constant dense<0.000000e+00> : vector<8x256xf32>
    %2 = tpu.matmul %0, %1, %cst {dimension_numbers = #tpu.dot_dimension_numbers<[1], [0], [0], [1], [0, 0, 1, 1], [], []>} : vector<8x32xbf16>, vector<32x256xbf16>, vector<8x256xf32> -> vector<8x256xf32>
    %c0_3 = arith.constant 0 : index
    %c0_4 = arith.constant 0 : index
    %3 = vector.load %arg3[%c0_3, %c0_4] : memref<1x256xf32, #tpu.memory_space<vmem>>, vector<1x256xf32>
    %4 = vector.broadcast %3 : vector<1x256xf32> to vector<8x256xf32>
    %5 = arith.addf %2, %4 : vector<8x256xf32>
    %6 = vector.extract_strided_slice %5 {offsets = [0, 0], sizes = [8, 128], strides = [1, 1]} : vector<8x256xf32> to vector<8x128xf32>
    %7 = vector.extract_strided_slice %5 {offsets = [0, 128], sizes = [8, 128], strides = [1, 1]} : vector<8x256xf32> to vector<8x128xf32>
    %c0_5 = arith.constant 0 : index
    %c0_6 = arith.constant 0 : index
    %8 = vector.load %arg4[%c0_5, %c0_6] : memref<1x512xf32, #tpu.memory_space<vmem>>, vector<1x512xf32>
    %c0_7 = arith.constant 0 : index
    %c0_8 = arith.constant 0 : index
    %9 = vector.load %arg6[%c0_7, %c0_8] : memref<1x128xf32, #tpu.memory_space<vmem>>, vector<1x128xf32>
    %c0_i32 = arith.constant 0 : i32
    %10 = arith.truncf %6 : vector<8x128xf32> to vector<8x128xbf16>
    %c0_9 = arith.constant 0 : index
    %c0_10 = arith.constant 0 : index
    %11 = vector.load %arg5[%c0_9, %c0_10] : memref<128x512xbf16, #tpu.memory_space<vmem>>, vector<128x512xbf16>
    %cst_11 = arith.constant dense<0.000000e+00> : vector<8x512xf32>
    %12 = tpu.matmul %10, %11, %cst_11 {dimension_numbers = #tpu.dot_dimension_numbers<[1], [0], [0], [1], [0, 0, 1, 1], [], []>} : vector<8x128xbf16>, vector<128x512xbf16>, vector<8x512xf32> -> vector<8x512xf32>
    %13 = vector.broadcast %8 : vector<1x512xf32> to vector<8x512xf32>
    %14 = arith.addf %13, %12 : vector<8x512xf32>
    %15 = vector.extract_strided_slice %14 {offsets = [0, 0], sizes = [8, 128], strides = [1, 1]} : vector<8x512xf32> to vector<8x128xf32>
    %16 = math.tanh %15 : vector<8x128xf32>
    %17 = vector.extract_strided_slice %14 {offsets = [0, 128], sizes = [8, 128], strides = [1, 1]} : vector<8x512xf32> to vector<8x128xf32>
    %18 = math.tanh %17 : vector<8x128xf32>
    %cst_12 = arith.constant 5.000000e-01 : f32
    %19 = vector.broadcast %cst_12 : f32 to vector<8x128xf32>
    %20 = arith.mulf %19, %18 : vector<8x128xf32>
    %cst_13 = arith.constant 5.000000e-01 : f32
    %21 = vector.broadcast %cst_13 : f32 to vector<8x128xf32>
    %22 = arith.addf %20, %21 : vector<8x128xf32>
    %23 = vector.extract_strided_slice %14 {offsets = [0, 256], sizes = [8, 128], strides = [1, 1]} : vector<8x512xf32> to vector<8x128xf32>
    %24 = math.tanh %23 : vector<8x128xf32>
    %cst_14 = arith.constant 5.000000e-01 : f32
    %25 = vector.broadcast %cst_14 : f32 to vector<8x128xf32>
    %26 = arith.mulf %25, %24 : vector<8x128xf32>
    %cst_15 = arith.constant 5.000000e-01 : f32
    %27 = vector.broadcast %cst_15 : f32 to vector<8x128xf32>
    %28 = arith.addf %26, %27 : vector<8x128xf32>
    %29 = vector.extract_strided_slice %14 {offsets = [0, 384], sizes = [8, 128], strides = [1, 1]} : vector<8x512xf32> to vector<8x128xf32>
    %30 = math.tanh %29 : vector<8x128xf32>
    %cst_16 = arith.constant 5.000000e-01 : f32
    %31 = vector.broadcast %cst_16 : f32 to vector<8x128xf32>
    %32 = arith.mulf %31, %30 : vector<8x128xf32>
    %cst_17 = arith.constant 5.000000e-01 : f32
    %33 = vector.broadcast %cst_17 : f32 to vector<8x128xf32>
    %34 = arith.addf %32, %33 : vector<8x128xf32>
    %35 = arith.mulf %7, %28 : vector<8x128xf32>
    %36 = arith.mulf %16, %22 : vector<8x128xf32>
    %37 = arith.addf %35, %36 : vector<8x128xf32>
    %38 = math.tanh %37 : vector<8x128xf32>
    %39 = arith.mulf %38, %34 : vector<8x128xf32>
    %40 = arith.truncf %39 : vector<8x128xf32> to vector<8x128xbf16>
    %c0_18 = arith.constant 0 : index
    %c0_19 = arith.constant 0 : index
    %41 = vector.load %arg7[%c0_18, %c0_19] : memref<128x128xbf16, #tpu.memory_space<vmem>>, vector<128x128xbf16>
    %cst_20 = arith.constant dense<0.000000e+00> : vector<8x128xf32>
    %42 = tpu.matmul %40, %41, %cst_20 {dimension_numbers = #tpu.dot_dimension_numbers<[1], [0], [0], [1], [0, 0, 1, 1], [], []>} : vector<8x128xbf16>, vector<128x128xbf16>, vector<8x128xf32> -> vector<8x128xf32>
    %43 = vector.broadcast %9 : vector<1x128xf32> to vector<8x128xf32>
    %44 = arith.addf %43, %42 : vector<8x128xf32>
    %45 = math.tanh %44 : vector<8x128xf32>
    %46 = arith.truncf %45 : vector<8x128xf32> to vector<8x128xbf16>
    %c0_21 = arith.constant 0 : index
    %c0_22 = arith.constant 0 : index
    %47 = vector.load %arg8[%c0_21, %c0_22] : memref<128x384xbf16, #tpu.memory_space<vmem>>, vector<128x384xbf16>
    %cst_23 = arith.constant dense<0.000000e+00> : vector<8x384xf32>
    %48 = tpu.matmul %46, %47, %cst_23 {dimension_numbers = #tpu.dot_dimension_numbers<[1], [0], [0], [1], [0, 0, 1, 1], [], []>} : vector<8x128xbf16>, vector<128x384xbf16>, vector<8x384xf32> -> vector<8x384xf32>
    %c0_24 = arith.constant 0 : index
    %c0_25 = arith.constant 0 : index
    %49 = vector.load %arg9[%c0_24, %c0_25] : memref<1x384xf32, #tpu.memory_space<vmem>>, vector<1x384xf32>
    %50 = vector.broadcast %49 : vector<1x384xf32> to vector<8x384xf32>
    %51 = arith.addf %48, %50 : vector<8x384xf32>
    %52 = vector.extract_strided_slice %51 {offsets = [0, 0], sizes = [8, 128], strides = [1, 1]} : vector<8x384xf32> to vector<8x128xf32>
    %53 = math.tanh %52 : vector<8x128xf32>
    %54 = vector.extract_strided_slice %51 {offsets = [0, 128], sizes = [8, 128], strides = [1, 1]} : vector<8x384xf32> to vector<8x128xf32>
    %55 = math.tanh %54 : vector<8x128xf32>
    %56 = vector.extract_strided_slice %51 {offsets = [0, 256], sizes = [8, 128], strides = [1, 1]} : vector<8x384xf32> to vector<8x128xf32>
    %57 = math.tanh %56 : vector<8x128xf32>
    %cst_26 = arith.constant 5.000000e-01 : f32
    %58 = vector.broadcast %cst_26 : f32 to vector<8x128xf32>
    %59 = arith.mulf %58, %57 : vector<8x128xf32>
    %cst_27 = arith.constant 5.000000e-01 : f32
    %60 = vector.broadcast %cst_27 : f32 to vector<8x128xf32>
    %61 = arith.addf %59, %60 : vector<8x128xf32>
    %62 = arith.subf %55, %53 : vector<8x128xf32>
    %63 = arith.mulf %61, %62 : vector<8x128xf32>
    %64 = arith.addf %53, %63 : vector<8x128xf32>
    %65 = arith.truncf %64 : vector<8x128xf32> to vector<8x128xbf16>
    %66 = arith.index_cast %c0_i32 : i32 to index
    %c0_28 = arith.constant 0 : index
    %c0_29 = arith.constant 0 : index
    %67 = vector.load %arg13[%66, %c0_28, %c0_29] : memref<10x8x128xbf16, #tpu.memory_space<vmem>>, vector<1x8x128xbf16>
    %68 = vector.shape_cast %67 : vector<1x8x128xbf16> to vector<8x128xbf16>
    %69 = vector.shape_cast %65 : vector<8x128xbf16> to vector<1x8x128xbf16>
    tpu.vector_store %arg13[%66, %c0_28, %c0_29], %69 {strides = array<i32>} : memref<10x8x128xbf16, #tpu.memory_space<vmem>>, vector<1x8x128xbf16>,
    %c1_i32 = arith.constant 1 : i32
    %70 = arith.truncf %64 : vector<8x128xf32> to vector<8x128xbf16>
    %c0_30 = arith.constant 0 : index
    %c0_31 = arith.constant 0 : index
    %71 = vector.load %arg5[%c0_30, %c0_31] : memref<128x512xbf16, #tpu.memory_space<vmem>>, vector<128x512xbf16>
    %cst_32 = arith.constant dense<0.000000e+00> : vector<8x512xf32>
    %72 = tpu.matmul %70, %71, %cst_32 {dimension_numbers = #tpu.dot_dimension_numbers<[1], [0], [0], [1], [0, 0, 1, 1], [], []>} : vector<8x128xbf16>, vector<128x512xbf16>, vector<8x512xf32> -> vector<8x512xf32>
    %73 = vector.broadcast %8 : vector<1x512xf32> to vector<8x512xf32>
    %74 = arith.addf %73, %72 : vector<8x512xf32>
    %75 = vector.extract_strided_slice %74 {offsets = [0, 0], sizes = [8, 128], strides = [1, 1]} : vector<8x512xf32> to vector<8x128xf32>
    %76 = math.tanh %75 : vector<8x128xf32>
    %77 = vector.extract_strided_slice %74 {offsets = [0, 128], sizes = [8, 128], strides = [1, 1]} : vector<8x512xf32> to vector<8x128xf32>
    %78 = math.tanh %77 : vector<8x128xf32>
    %cst_33 = arith.constant 5.000000e-01 : f32
    %79 = vector.broadcast %cst_33 : f32 to vector<8x128xf32>
    %80 = arith.mulf %79, %78 : vector<8x128xf32>
    %cst_34 = arith.constant 5.000000e-01 : f32
    %81 = vector.broadcast %cst_34 : f32 to vector<8x128xf32>
    %82 = arith.addf %80, %81 : vector<8x128xf32>
    %83 = vector.extract_strided_slice %74 {offsets = [0, 256], sizes = [8, 128], strides = [1, 1]} : vector<8x512xf32> to vector<8x128xf32>
    %84 = math.tanh %83 : vector<8x128xf32>
    %cst_35 = arith.constant 5.000000e-01 : f32
    %85 = vector.broadcast %cst_35 : f32 to vector<8x128xf32>
    %86 = arith.mulf %85, %84 : vector<8x128xf32>
    %cst_36 = arith.constant 5.000000e-01 : f32
    %87 = vector.broadcast %cst_36 : f32 to vector<8x128xf32>
    %88 = arith.addf %86, %87 : vector<8x128xf32>
    %89 = vector.extract_strided_slice %74 {offsets = [0, 384], sizes = [8, 128], strides = [1, 1]} : vector<8x512xf32> to vector<8x128xf32>
    %90 = math.tanh %89 : vector<8x128xf32>
    %cst_37 = arith.constant 5.000000e-01 : f32
    %91 = vector.broadcast %cst_37 : f32 to vector<8x128xf32>
    %92 = arith.mulf %91, %90 : vector<8x128xf32>
    %cst_38 = arith.constant 5.000000e-01 : f32
    %93 = vector.broadcast %cst_38 : f32 to vector<8x128xf32>
    %94 = arith.addf %92, %93 : vector<8x128xf32>
    %95 = arith.mulf %37, %88 : vector<8x128xf32>
    %96 = arith.mulf %76, %82 : vector<8x128xf32>
    %97 = arith.addf %95, %96 : vector<8x128xf32>
    %98 = math.tanh %97 : vector<8x128xf32>
    %99 = arith.mulf %98, %94 : vector<8x128xf32>
    %100 = arith.truncf %99 : vector<8x128xf32> to vector<8x128xbf16>
    %c0_39 = arith.constant 0 : index
    %c0_40 = arith.constant 0 : index
    %101 = vector.load %arg7[%c0_39, %c0_40] : memref<128x128xbf16, #tpu.memory_space<vmem>>, vector<128x128xbf16>
    %cst_41 = arith.constant dense<0.000000e+00> : vector<8x128xf32>
    %102 = tpu.matmul %100, %101, %cst_41 {dimension_numbers = #tpu.dot_dimension_numbers<[1], [0], [0], [1], [0, 0, 1, 1], [], []>} : vector<8x128xbf16>, vector<128x128xbf16>, vector<8x128xf32> -> vector<8x128xf32>
    %103 = vector.broadcast %9 : vector<1x128xf32> to vector<8x128xf32>
    %104 = arith.addf %103, %102 : vector<8x128xf32>
    %105 = math.tanh %104 : vector<8x128xf32>
    %106 = arith.truncf %105 : vector<8x128xf32> to vector<8x128xbf16>
    %c0_42 = arith.constant 0 : index
    %c0_43 = arith.constant 0 : index
    %107 = vector.load %arg8[%c0_42, %c0_43] : memref<128x384xbf16, #tpu.memory_space<vmem>>, vector<128x384xbf16>
    %cst_44 = arith.constant dense<0.000000e+00> : vector<8x384xf32>
    %108 = tpu.matmul %106, %107, %cst_44 {dimension_numbers = #tpu.dot_dimension_numbers<[1], [0], [0], [1], [0, 0, 1, 1], [], []>} : vector<8x128xbf16>, vector<128x384xbf16>, vector<8x384xf32> -> vector<8x384xf32>
    %c0_45 = arith.constant 0 : index
    %c0_46 = arith.constant 0 : index
    %109 = vector.load %arg9[%c0_45, %c0_46] : memref<1x384xf32, #tpu.memory_space<vmem>>, vector<1x384xf32>
    %110 = vector.broadcast %109 : vector<1x384xf32> to vector<8x384xf32>
    %111 = arith.addf %108, %110 : vector<8x384xf32>
    %112 = vector.extract_strided_slice %111 {offsets = [0, 0], sizes = [8, 128], strides = [1, 1]} : vector<8x384xf32> to vector<8x128xf32>
    %113 = math.tanh %112 : vector<8x128xf32>
    %114 = vector.extract_strided_slice %111 {offsets = [0, 128], sizes = [8, 128], strides = [1, 1]} : vector<8x384xf32> to vector<8x128xf32>
    %115 = math.tanh %114 : vector<8x128xf32>
    %116 = vector.extract_strided_slice %111 {offsets = [0, 256], sizes = [8, 128], strides = [1, 1]} : vector<8x384xf32> to vector<8x128xf32>
    %117 = math.tanh %116 : vector<8x128xf32>
    %cst_47 = arith.constant 5.000000e-01 : f32
    %118 = vector.broadcast %cst_47 : f32 to vector<8x128xf32>
    %119 = arith.mulf %118, %117 : vector<8x128xf32>
    %cst_48 = arith.constant 5.000000e-01 : f32
    %120 = vector.broadcast %cst_48 : f32 to vector<8x128xf32>
    %121 = arith.addf %119, %120 : vector<8x128xf32>
    %122 = arith.subf %115, %113 : vector<8x128xf32>
    %123 = arith.mulf %121, %122 : vector<8x128xf32>
    %124 = arith.addf %113, %123 : vector<8x128xf32>
    %125 = arith.truncf %124 : vector<8x128xf32> to vector<8x128xbf16>
    %126 = arith.index_cast %c1_i32 : i32 to index
    %c0_49 = arith.constant 0 : index
    %c0_50 = arith.constant 0 : index
    %127 = vector.load %arg13[%126, %c0_49, %c0_50] : memref<10x8x128xbf16, #tpu.memory_space<vmem>>, vector<1x8x128xbf16>
    %128 = vector.shape_cast %127 : vector<1x8x128xbf16> to vector<8x128xbf16>
    %129 = vector.shape_cast %125 : vector<8x128xbf16> to vector<1x8x128xbf16>
    tpu.vector_store %arg13[%126, %c0_49, %c0_50], %129 {strides = array<i32>} : memref<10x8x128xbf16, #tpu.memory_space<vmem>>, vector<1x8x128xbf16>,
    %c2_i32 = arith.constant 2 : i32
    %130 = arith.truncf %124 : vector<8x128xf32> to vector<8x128xbf16>
    %c0_51 = arith.constant 0 : index
    %c0_52 = arith.constant 0 : index
    %131 = vector.load %arg5[%c0_51, %c0_52] : memref<128x512xbf16, #tpu.memory_space<vmem>>, vector<128x512xbf16>
    %cst_53 = arith.constant dense<0.000000e+00> : vector<8x512xf32>
    %132 = tpu.matmul %130, %131, %cst_53 {dimension_numbers = #tpu.dot_dimension_numbers<[1], [0], [0], [1], [0, 0, 1, 1], [], []>} : vector<8x128xbf16>, vector<128x512xbf16>, vector<8x512xf32> -> vector<8x512xf32>
    %133 = vector.broadcast %8 : vector<1x512xf32> to vector<8x512xf32>
    %134 = arith.addf %133, %132 : vector<8x512xf32>
    %135 = vector.extract_strided_slice %134 {offsets = [0, 0], sizes = [8, 128], strides = [1, 1]} : vector<8x512xf32> to vector<8x128xf32>
    %136 = math.tanh %135 : vector<8x128xf32>
    %137 = vector.extract_strided_slice %134 {offsets = [0, 128], sizes = [8, 128], strides = [1, 1]} : vector<8x512xf32> to vector<8x128xf32>
    %138 = math.tanh %137 : vector<8x128xf32>
    %cst_54 = arith.constant 5.000000e-01 : f32
    %139 = vector.broadcast %cst_54 : f32 to vector<8x128xf32>
    %140 = arith.mulf %139, %138 : vector<8x128xf32>
    %cst_55 = arith.constant 5.000000e-01 : f32
    %141 = vector.broadcast %cst_55 : f32 to vector<8x128xf32>
    %142 = arith.addf %140, %141 : vector<8x128xf32>
    %143 = vector.extract_strided_slice %134 {offsets = [0, 256], sizes = [8, 128], strides = [1, 1]} : vector<8x512xf32> to vector<8x128xf32>
    %144 = math.tanh %143 : vector<8x128xf32>
    %cst_56 = arith.constant 5.000000e-01 : f32
    %145 = vector.broadcast %cst_56 : f32 to vector<8x128xf32>
    %146 = arith.mulf %145, %144 : vector<8x128xf32>
    %cst_57 = arith.constant 5.000000e-01 : f32
    %147 = vector.broadcast %cst_57 : f32 to vector<8x128xf32>
    %148 = arith.addf %146, %147 : vector<8x128xf32>
    %149 = vector.extract_strided_slice %134 {offsets = [0, 384], sizes = [8, 128], strides = [1, 1]} : vector<8x512xf32> to vector<8x128xf32>
    %150 = math.tanh %149 : vector<8x128xf32>
    %cst_58 = arith.constant 5.000000e-01 : f32
    %151 = vector.broadcast %cst_58 : f32 to vector<8x128xf32>
    %152 = arith.mulf %151, %150 : vector<8x128xf32>
    %cst_59 = arith.constant 5.000000e-01 : f32
    %153 = vector.broadcast %cst_59 : f32 to vector<8x128xf32>
    %154 = arith.addf %152, %153 : vector<8x128xf32>
    %155 = arith.mulf %97, %148 : vector<8x128xf32>
    %156 = arith.mulf %136, %142 : vector<8x128xf32>
    %157 = arith.addf %155, %156 : vector<8x128xf32>
    %158 = math.tanh %157 : vector<8x128xf32>
    %159 = arith.mulf %158, %154 : vector<8x128xf32>
    %160 = arith.truncf %159 : vector<8x128xf32> to vector<8x128xbf16>
    %c0_60 = arith.constant 0 : index
    %c0_61 = arith.constant 0 : index
    %161 = vector.load %arg7[%c0_60, %c0_61] : memref<128x128xbf16, #tpu.memory_space<vmem>>, vector<128x128xbf16>
    %cst_62 = arith.constant dense<0.000000e+00> : vector<8x128xf32>
    %162 = tpu.matmul %160, %161, %cst_62 {dimension_numbers = #tpu.dot_dimension_numbers<[1], [0], [0], [1], [0, 0, 1, 1], [], []>} : vector<8x128xbf16>, vector<128x128xbf16>, vector<8x128xf32> -> vector<8x128xf32>
    %163 = vector.broadcast %9 : vector<1x128xf32> to vector<8x128xf32>
    %164 = arith.addf %163, %162 : vector<8x128xf32>
    %165 = math.tanh %164 : vector<8x128xf32>
    %166 = arith.truncf %165 : vector<8x128xf32> to vector<8x128xbf16>
    %c0_63 = arith.constant 0 : index
    %c0_64 = arith.constant 0 : index
    %167 = vector.load %arg8[%c0_63, %c0_64] : memref<128x384xbf16, #tpu.memory_space<vmem>>, vector<128x384xbf16>
    %cst_65 = arith.constant dense<0.000000e+00> : vector<8x384xf32>
    %168 = tpu.matmul %166, %167, %cst_65 {dimension_numbers = #tpu.dot_dimension_numbers<[1], [0], [0], [1], [0, 0, 1, 1], [], []>} : vector<8x128xbf16>, vector<128x384xbf16>, vector<8x384xf32> -> vector<8x384xf32>
    %c0_66 = arith.constant 0 : index
    %c0_67 = arith.constant 0 : index
    %169 = vector.load %arg9[%c0_66, %c0_67] : memref<1x384xf32, #tpu.memory_space<vmem>>, vector<1x384xf32>
    %170 = vector.broadcast %169 : vector<1x384xf32> to vector<8x384xf32>
    %171 = arith.addf %168, %170 : vector<8x384xf32>
    %172 = vector.extract_strided_slice %171 {offsets = [0, 0], sizes = [8, 128], strides = [1, 1]} : vector<8x384xf32> to vector<8x128xf32>
    %173 = math.tanh %172 : vector<8x128xf32>
    %174 = vector.extract_strided_slice %171 {offsets = [0, 128], sizes = [8, 128], strides = [1, 1]} : vector<8x384xf32> to vector<8x128xf32>
    %175 = math.tanh %174 : vector<8x128xf32>
    %176 = vector.extract_strided_slice %171 {offsets = [0, 256], sizes = [8, 128], strides = [1, 1]} : vector<8x384xf32> to vector<8x128xf32>
    %177 = math.tanh %176 : vector<8x128xf32>
    %cst_68 = arith.constant 5.000000e-01 : f32
    %178 = vector.broadcast %cst_68 : f32 to vector<8x128xf32>
    %179 = arith.mulf %178, %177 : vector<8x128xf32>
    %cst_69 = arith.constant 5.000000e-01 : f32
    %180 = vector.broadcast %cst_69 : f32 to vector<8x128xf32>
    %181 = arith.addf %179, %180 : vector<8x128xf32>
    %182 = arith.subf %175, %173 : vector<8x128xf32>
    %183 = arith.mulf %181, %182 : vector<8x128xf32>
    %184 = arith.addf %173, %183 : vector<8x128xf32>
    %185 = arith.truncf %184 : vector<8x128xf32> to vector<8x128xbf16>
    %186 = arith.index_cast %c2_i32 : i32 to index
    %c0_70 = arith.constant 0 : index
    %c0_71 = arith.constant 0 : index
    %187 = vector.load %arg13[%186, %c0_70, %c0_71] : memref<10x8x128xbf16, #tpu.memory_space<vmem>>, vector<1x8x128xbf16>
    %188 = vector.shape_cast %187 : vector<1x8x128xbf16> to vector<8x128xbf16>
    %189 = vector.shape_cast %185 : vector<8x128xbf16> to vector<1x8x128xbf16>
    tpu.vector_store %arg13[%186, %c0_70, %c0_71], %189 {strides = array<i32>} : memref<10x8x128xbf16, #tpu.memory_space<vmem>>, vector<1x8x128xbf16>,
    %c3_i32 = arith.constant 3 : i32
    %190 = arith.truncf %184 : vector<8x128xf32> to vector<8x128xbf16>
    %c0_72 = arith.constant 0 : index
    %c0_73 = arith.constant 0 : index
    %191 = vector.load %arg5[%c0_72, %c0_73] : memref<128x512xbf16, #tpu.memory_space<vmem>>, vector<128x512xbf16>
    %cst_74 = arith.constant dense<0.000000e+00> : vector<8x512xf32>
    %192 = tpu.matmul %190, %191, %cst_74 {dimension_numbers = #tpu.dot_dimension_numbers<[1], [0], [0], [1], [0, 0, 1, 1], [], []>} : vector<8x128xbf16>, vector<128x512xbf16>, vector<8x512xf32> -> vector<8x512xf32>
    %193 = vector.broadcast %8 : vector<1x512xf32> to vector<8x512xf32>
    %194 = arith.addf %193, %192 : vector<8x512xf32>
    %195 = vector.extract_strided_slice %194 {offsets = [0, 0], sizes = [8, 128], strides = [1, 1]} : vector<8x512xf32> to vector<8x128xf32>
    %196 = math.tanh %195 : vector<8x128xf32>
    %197 = vector.extract_strided_slice %194 {offsets = [0, 128], sizes = [8, 128], strides = [1, 1]} : vector<8x512xf32> to vector<8x128xf32>
    %198 = math.tanh %197 : vector<8x128xf32>
    %cst_75 = arith.constant 5.000000e-01 : f32
    %199 = vector.broadcast %cst_75 : f32 to vector<8x128xf32>
    %200 = arith.mulf %199, %198 : vector<8x128xf32>
    %cst_76 = arith.constant 5.000000e-01 : f32
    %201 = vector.broadcast %cst_76 : f32 to vector<8x128xf32>
    %202 = arith.addf %200, %201 : vector<8x128xf32>
    %203 = vector.extract_strided_slice %194 {offsets = [0, 256], sizes = [8, 128], strides = [1, 1]} : vector<8x512xf32> to vector<8x128xf32>
    %204 = math.tanh %203 : vector<8x128xf32>
    %cst_77 = arith.constant 5.000000e-01 : f32
    %205 = vector.broadcast %cst_77 : f32 to vector<8x128xf32>
    %206 = arith.mulf %205, %204 : vector<8x128xf32>
    %cst_78 = arith.constant 5.000000e-01 : f32
    %207 = vector.broadcast %cst_78 : f32 to vector<8x128xf32>
    %208 = arith.addf %206, %207 : vector<8x128xf32>
    %209 = vector.extract_strided_slice %194 {offsets = [0, 384], sizes = [8, 128], strides = [1, 1]} : vector<8x512xf32> to vector<8x128xf32>
    %210 = math.tanh %209 : vector<8x128xf32>
    %cst_79 = arith.constant 5.000000e-01 : f32
    %211 = vector.broadcast %cst_79 : f32 to vector<8x128xf32>
    %212 = arith.mulf %211, %210 : vector<8x128xf32>
    %cst_80 = arith.constant 5.000000e-01 : f32
    %213 = vector.broadcast %cst_80 : f32 to vector<8x128xf32>
    %214 = arith.addf %212, %213 : vector<8x128xf32>
    %215 = arith.mulf %157, %208 : vector<8x128xf32>
    %216 = arith.mulf %196, %202 : vector<8x128xf32>
    %217 = arith.addf %215, %216 : vector<8x128xf32>
    %218 = math.tanh %217 : vector<8x128xf32>
    %219 = arith.mulf %218, %214 : vector<8x128xf32>
    %220 = arith.truncf %219 : vector<8x128xf32> to vector<8x128xbf16>
    %c0_81 = arith.constant 0 : index
    %c0_82 = arith.constant 0 : index
    %221 = vector.load %arg7[%c0_81, %c0_82] : memref<128x128xbf16, #tpu.memory_space<vmem>>, vector<128x128xbf16>
    %cst_83 = arith.constant dense<0.000000e+00> : vector<8x128xf32>
    %222 = tpu.matmul %220, %221, %cst_83 {dimension_numbers = #tpu.dot_dimension_numbers<[1], [0], [0], [1], [0, 0, 1, 1], [], []>} : vector<8x128xbf16>, vector<128x128xbf16>, vector<8x128xf32> -> vector<8x128xf32>
    %223 = vector.broadcast %9 : vector<1x128xf32> to vector<8x128xf32>
    %224 = arith.addf %223, %222 : vector<8x128xf32>
    %225 = math.tanh %224 : vector<8x128xf32>
    %226 = arith.truncf %225 : vector<8x128xf32> to vector<8x128xbf16>
    %c0_84 = arith.constant 0 : index
    %c0_85 = arith.constant 0 : index
    %227 = vector.load %arg8[%c0_84, %c0_85] : memref<128x384xbf16, #tpu.memory_space<vmem>>, vector<128x384xbf16>
    %cst_86 = arith.constant dense<0.000000e+00> : vector<8x384xf32>
    %228 = tpu.matmul %226, %227, %cst_86 {dimension_numbers = #tpu.dot_dimension_numbers<[1], [0], [0], [1], [0, 0, 1, 1], [], []>} : vector<8x128xbf16>, vector<128x384xbf16>, vector<8x384xf32> -> vector<8x384xf32>
    %c0_87 = arith.constant 0 : index
    %c0_88 = arith.constant 0 : index
    %229 = vector.load %arg9[%c0_87, %c0_88] : memref<1x384xf32, #tpu.memory_space<vmem>>, vector<1x384xf32>
    %230 = vector.broadcast %229 : vector<1x384xf32> to vector<8x384xf32>
    %231 = arith.addf %228, %230 : vector<8x384xf32>
    %232 = vector.extract_strided_slice %231 {offsets = [0, 0], sizes = [8, 128], strides = [1, 1]} : vector<8x384xf32> to vector<8x128xf32>
    %233 = math.tanh %232 : vector<8x128xf32>
    %234 = vector.extract_strided_slice %231 {offsets = [0, 128], sizes = [8, 128], strides = [1, 1]} : vector<8x384xf32> to vector<8x128xf32>
    %235 = math.tanh %234 : vector<8x128xf32>
    %236 = vector.extract_strided_slice %231 {offsets = [0, 256], sizes = [8, 128], strides = [1, 1]} : vector<8x384xf32> to vector<8x128xf32>
    %237 = math.tanh %236 : vector<8x128xf32>
    %cst_89 = arith.constant 5.000000e-01 : f32
    %238 = vector.broadcast %cst_89 : f32 to vector<8x128xf32>
    %239 = arith.mulf %238, %237 : vector<8x128xf32>
    %cst_90 = arith.constant 5.000000e-01 : f32
    %240 = vector.broadcast %cst_90 : f32 to vector<8x128xf32>
    %241 = arith.addf %239, %240 : vector<8x128xf32>
    %242 = arith.subf %235, %233 : vector<8x128xf32>
    %243 = arith.mulf %241, %242 : vector<8x128xf32>
    %244 = arith.addf %233, %243 : vector<8x128xf32>
    %245 = arith.truncf %244 : vector<8x128xf32> to vector<8x128xbf16>
    %246 = arith.index_cast %c3_i32 : i32 to index
    %c0_91 = arith.constant 0 : index
    %c0_92 = arith.constant 0 : index
    %247 = vector.load %arg13[%246, %c0_91, %c0_92] : memref<10x8x128xbf16, #tpu.memory_space<vmem>>, vector<1x8x128xbf16>
    %248 = vector.shape_cast %247 : vector<1x8x128xbf16> to vector<8x128xbf16>
    %249 = vector.shape_cast %245 : vector<8x128xbf16> to vector<1x8x128xbf16>
    tpu.vector_store %arg13[%246, %c0_91, %c0_92], %249 {strides = array<i32>} : memref<10x8x128xbf16, #tpu.memory_space<vmem>>, vector<1x8x128xbf16>,
    %c4_i32 = arith.constant 4 : i32
    %250 = arith.truncf %244 : vector<8x128xf32> to vector<8x128xbf16>
    %c0_93 = arith.constant 0 : index
    %c0_94 = arith.constant 0 : index
    %251 = vector.load %arg5[%c0_93, %c0_94] : memref<128x512xbf16, #tpu.memory_space<vmem>>, vector<128x512xbf16>
    %cst_95 = arith.constant dense<0.000000e+00> : vector<8x512xf32>
    %252 = tpu.matmul %250, %251, %cst_95 {dimension_numbers = #tpu.dot_dimension_numbers<[1], [0], [0], [1], [0, 0, 1, 1], [], []>} : vector<8x128xbf16>, vector<128x512xbf16>, vector<8x512xf32> -> vector<8x512xf32>
    %253 = vector.broadcast %8 : vector<1x512xf32> to vector<8x512xf32>
    %254 = arith.addf %253, %252 : vector<8x512xf32>
    %255 = vector.extract_strided_slice %254 {offsets = [0, 0], sizes = [8, 128], strides = [1, 1]} : vector<8x512xf32> to vector<8x128xf32>
    %256 = math.tanh %255 : vector<8x128xf32>
    %257 = vector.extract_strided_slice %254 {offsets = [0, 128], sizes = [8, 128], strides = [1, 1]} : vector<8x512xf32> to vector<8x128xf32>
    %258 = math.tanh %257 : vector<8x128xf32>
    %cst_96 = arith.constant 5.000000e-01 : f32
    %259 = vector.broadcast %cst_96 : f32 to vector<8x128xf32>
    %260 = arith.mulf %259, %258 : vector<8x128xf32>
    %cst_97 = arith.constant 5.000000e-01 : f32
    %261 = vector.broadcast %cst_97 : f32 to vector<8x128xf32>
    %262 = arith.addf %260, %261 : vector<8x128xf32>
    %263 = vector.extract_strided_slice %254 {offsets = [0, 256], sizes = [8, 128], strides = [1, 1]} : vector<8x512xf32> to vector<8x128xf32>
    %264 = math.tanh %263 : vector<8x128xf32>
    %cst_98 = arith.constant 5.000000e-01 : f32
    %265 = vector.broadcast %cst_98 : f32 to vector<8x128xf32>
    %266 = arith.mulf %265, %264 : vector<8x128xf32>
    %cst_99 = arith.constant 5.000000e-01 : f32
    %267 = vector.broadcast %cst_99 : f32 to vector<8x128xf32>
    %268 = arith.addf %266, %267 : vector<8x128xf32>
    %269 = vector.extract_strided_slice %254 {offsets = [0, 384], sizes = [8, 128], strides = [1, 1]} : vector<8x512xf32> to vector<8x128xf32>
    %270 = math.tanh %269 : vector<8x128xf32>
    %cst_100 = arith.constant 5.000000e-01 : f32
    %271 = vector.broadcast %cst_100 : f32 to vector<8x128xf32>
    %272 = arith.mulf %271, %270 : vector<8x128xf32>
    %cst_101 = arith.constant 5.000000e-01 : f32
    %273 = vector.broadcast %cst_101 : f32 to vector<8x128xf32>
    %274 = arith.addf %272, %273 : vector<8x128xf32>
    %275 = arith.mulf %217, %268 : vector<8x128xf32>
    %276 = arith.mulf %256, %262 : vector<8x128xf32>
    %277 = arith.addf %275, %276 : vector<8x128xf32>
    %278 = math.tanh %277 : vector<8x128xf32>
    %279 = arith.mulf %278, %274 : vector<8x128xf32>
    %280 = arith.truncf %279 : vector<8x128xf32> to vector<8x128xbf16>
    %c0_102 = arith.constant 0 : index
    %c0_103 = arith.constant 0 : index
    %281 = vector.load %arg7[%c0_102, %c0_103] : memref<128x128xbf16, #tpu.memory_space<vmem>>, vector<128x128xbf16>
    %cst_104 = arith.constant dense<0.000000e+00> : vector<8x128xf32>
    %282 = tpu.matmul %280, %281, %cst_104 {dimension_numbers = #tpu.dot_dimension_numbers<[1], [0], [0], [1], [0, 0, 1, 1], [], []>} : vector<8x128xbf16>, vector<128x128xbf16>, vector<8x128xf32> -> vector<8x128xf32>
    %283 = vector.broadcast %9 : vector<1x128xf32> to vector<8x128xf32>
    %284 = arith.addf %283, %282 : vector<8x128xf32>
    %285 = math.tanh %284 : vector<8x128xf32>
    %286 = arith.truncf %285 : vector<8x128xf32> to vector<8x128xbf16>
    %c0_105 = arith.constant 0 : index
    %c0_106 = arith.constant 0 : index
    %287 = vector.load %arg8[%c0_105, %c0_106] : memref<128x384xbf16, #tpu.memory_space<vmem>>, vector<128x384xbf16>
    %cst_107 = arith.constant dense<0.000000e+00> : vector<8x384xf32>
    %288 = tpu.matmul %286, %287, %cst_107 {dimension_numbers = #tpu.dot_dimension_numbers<[1], [0], [0], [1], [0, 0, 1, 1], [], []>} : vector<8x128xbf16>, vector<128x384xbf16>, vector<8x384xf32> -> vector<8x384xf32>
    %c0_108 = arith.constant 0 : index
    %c0_109 = arith.constant 0 : index
    %289 = vector.load %arg9[%c0_108, %c0_109] : memref<1x384xf32, #tpu.memory_space<vmem>>, vector<1x384xf32>
    %290 = vector.broadcast %289 : vector<1x384xf32> to vector<8x384xf32>
    %291 = arith.addf %288, %290 : vector<8x384xf32>
    %292 = vector.extract_strided_slice %291 {offsets = [0, 0], sizes = [8, 128], strides = [1, 1]} : vector<8x384xf32> to vector<8x128xf32>
    %293 = math.tanh %292 : vector<8x128xf32>
    %294 = vector.extract_strided_slice %291 {offsets = [0, 128], sizes = [8, 128], strides = [1, 1]} : vector<8x384xf32> to vector<8x128xf32>
    %295 = math.tanh %294 : vector<8x128xf32>
    %296 = vector.extract_strided_slice %291 {offsets = [0, 256], sizes = [8, 128], strides = [1, 1]} : vector<8x384xf32> to vector<8x128xf32>
    %297 = math.tanh %296 : vector<8x128xf32>
    %cst_110 = arith.constant 5.000000e-01 : f32
    %298 = vector.broadcast %cst_110 : f32 to vector<8x128xf32>
    %299 = arith.mulf %298, %297 : vector<8x128xf32>
    %cst_111 = arith.constant 5.000000e-01 : f32
    %300 = vector.broadcast %cst_111 : f32 to vector<8x128xf32>
    %301 = arith.addf %299, %300 : vector<8x128xf32>
    %302 = arith.subf %295, %293 : vector<8x128xf32>
    %303 = arith.mulf %301, %302 : vector<8x128xf32>
    %304 = arith.addf %293, %303 : vector<8x128xf32>
    %305 = arith.truncf %304 : vector<8x128xf32> to vector<8x128xbf16>
    %306 = arith.index_cast %c4_i32 : i32 to index
    %c0_112 = arith.constant 0 : index
    %c0_113 = arith.constant 0 : index
    %307 = vector.load %arg13[%306, %c0_112, %c0_113] : memref<10x8x128xbf16, #tpu.memory_space<vmem>>, vector<1x8x128xbf16>
    %308 = vector.shape_cast %307 : vector<1x8x128xbf16> to vector<8x128xbf16>
    %309 = vector.shape_cast %305 : vector<8x128xbf16> to vector<1x8x128xbf16>
    tpu.vector_store %arg13[%306, %c0_112, %c0_113], %309 {strides = array<i32>} : memref<10x8x128xbf16, #tpu.memory_space<vmem>>, vector<1x8x128xbf16>,
    %c5_i32 = arith.constant 5 : i32
    %310 = arith.truncf %304 : vector<8x128xf32> to vector<8x128xbf16>
    %c0_114 = arith.constant 0 : index
    %c0_115 = arith.constant 0 : index
    %311 = vector.load %arg5[%c0_114, %c0_115] : memref<128x512xbf16, #tpu.memory_space<vmem>>, vector<128x512xbf16>
    %cst_116 = arith.constant dense<0.000000e+00> : vector<8x512xf32>
    %312 = tpu.matmul %310, %311, %cst_116 {dimension_numbers = #tpu.dot_dimension_numbers<[1], [0], [0], [1], [0, 0, 1, 1], [], []>} : vector<8x128xbf16>, vector<128x512xbf16>, vector<8x512xf32> -> vector<8x512xf32>
    %313 = vector.broadcast %8 : vector<1x512xf32> to vector<8x512xf32>
    %314 = arith.addf %313, %312 : vector<8x512xf32>
    %315 = vector.extract_strided_slice %314 {offsets = [0, 0], sizes = [8, 128], strides = [1, 1]} : vector<8x512xf32> to vector<8x128xf32>
    %316 = math.tanh %315 : vector<8x128xf32>
    %317 = vector.extract_strided_slice %314 {offsets = [0, 128], sizes = [8, 128], strides = [1, 1]} : vector<8x512xf32> to vector<8x128xf32>
    %318 = math.tanh %317 : vector<8x128xf32>
    %cst_117 = arith.constant 5.000000e-01 : f32
    %319 = vector.broadcast %cst_117 : f32 to vector<8x128xf32>
    %320 = arith.mulf %319, %318 : vector<8x128xf32>
    %cst_118 = arith.constant 5.000000e-01 : f32
    %321 = vector.broadcast %cst_118 : f32 to vector<8x128xf32>
    %322 = arith.addf %320, %321 : vector<8x128xf32>
    %323 = vector.extract_strided_slice %314 {offsets = [0, 256], sizes = [8, 128], strides = [1, 1]} : vector<8x512xf32> to vector<8x128xf32>
    %324 = math.tanh %323 : vector<8x128xf32>
    %cst_119 = arith.constant 5.000000e-01 : f32
    %325 = vector.broadcast %cst_119 : f32 to vector<8x128xf32>
    %326 = arith.mulf %325, %324 : vector<8x128xf32>
    %cst_120 = arith.constant 5.000000e-01 : f32
    %327 = vector.broadcast %cst_120 : f32 to vector<8x128xf32>
    %328 = arith.addf %326, %327 : vector<8x128xf32>
    %329 = vector.extract_strided_slice %314 {offsets = [0, 384], sizes = [8, 128], strides = [1, 1]} : vector<8x512xf32> to vector<8x128xf32>
    %330 = math.tanh %329 : vector<8x128xf32>
    %cst_121 = arith.constant 5.000000e-01 : f32
    %331 = vector.broadcast %cst_121 : f32 to vector<8x128xf32>
    %332 = arith.mulf %331, %330 : vector<8x128xf32>
    %cst_122 = arith.constant 5.000000e-01 : f32
    %333 = vector.broadcast %cst_122 : f32 to vector<8x128xf32>
    %334 = arith.addf %332, %333 : vector<8x128xf32>
    %335 = arith.mulf %277, %328 : vector<8x128xf32>
    %336 = arith.mulf %316, %322 : vector<8x128xf32>
    %337 = arith.addf %335, %336 : vector<8x128xf32>
    %338 = math.tanh %337 : vector<8x128xf32>
    %339 = arith.mulf %338, %334 : vector<8x128xf32>
    %340 = arith.truncf %339 : vector<8x128xf32> to vector<8x128xbf16>
    %c0_123 = arith.constant 0 : index
    %c0_124 = arith.constant 0 : index
    %341 = vector.load %arg7[%c0_123, %c0_124] : memref<128x128xbf16, #tpu.memory_space<vmem>>, vector<128x128xbf16>
    %cst_125 = arith.constant dense<0.000000e+00> : vector<8x128xf32>
    %342 = tpu.matmul %340, %341, %cst_125 {dimension_numbers = #tpu.dot_dimension_numbers<[1], [0], [0], [1], [0, 0, 1, 1], [], []>} : vector<8x128xbf16>, vector<128x128xbf16>, vector<8x128xf32> -> vector<8x128xf32>
    %343 = vector.broadcast %9 : vector<1x128xf32> to vector<8x128xf32>
    %344 = arith.addf %343, %342 : vector<8x128xf32>
    %345 = math.tanh %344 : vector<8x128xf32>
    %346 = arith.truncf %345 : vector<8x128xf32> to vector<8x128xbf16>
    %c0_126 = arith.constant 0 : index
    %c0_127 = arith.constant 0 : index
    %347 = vector.load %arg8[%c0_126, %c0_127] : memref<128x384xbf16, #tpu.memory_space<vmem>>, vector<128x384xbf16>
    %cst_128 = arith.constant dense<0.000000e+00> : vector<8x384xf32>
    %348 = tpu.matmul %346, %347, %cst_128 {dimension_numbers = #tpu.dot_dimension_numbers<[1], [0], [0], [1], [0, 0, 1, 1], [], []>} : vector<8x128xbf16>, vector<128x384xbf16>, vector<8x384xf32> -> vector<8x384xf32>
    %c0_129 = arith.constant 0 : index
    %c0_130 = arith.constant 0 : index
    %349 = vector.load %arg9[%c0_129, %c0_130] : memref<1x384xf32, #tpu.memory_space<vmem>>, vector<1x384xf32>
    %350 = vector.broadcast %349 : vector<1x384xf32> to vector<8x384xf32>
    %351 = arith.addf %348, %350 : vector<8x384xf32>
    %352 = vector.extract_strided_slice %351 {offsets = [0, 0], sizes = [8, 128], strides = [1, 1]} : vector<8x384xf32> to vector<8x128xf32>
    %353 = math.tanh %352 : vector<8x128xf32>
    %354 = vector.extract_strided_slice %351 {offsets = [0, 128], sizes = [8, 128], strides = [1, 1]} : vector<8x384xf32> to vector<8x128xf32>
    %355 = math.tanh %354 : vector<8x128xf32>
    %356 = vector.extract_strided_slice %351 {offsets = [0, 256], sizes = [8, 128], strides = [1, 1]} : vector<8x384xf32> to vector<8x128xf32>
    %357 = math.tanh %356 : vector<8x128xf32>
    %cst_131 = arith.constant 5.000000e-01 : f32
    %358 = vector.broadcast %cst_131 : f32 to vector<8x128xf32>
    %359 = arith.mulf %358, %357 : vector<8x128xf32>
    %cst_132 = arith.constant 5.000000e-01 : f32
    %360 = vector.broadcast %cst_132 : f32 to vector<8x128xf32>
    %361 = arith.addf %359, %360 : vector<8x128xf32>
    %362 = arith.subf %355, %353 : vector<8x128xf32>
    %363 = arith.mulf %361, %362 : vector<8x128xf32>
    %364 = arith.addf %353, %363 : vector<8x128xf32>
    %365 = arith.truncf %364 : vector<8x128xf32> to vector<8x128xbf16>
    %366 = arith.index_cast %c5_i32 : i32 to index
    %c0_133 = arith.constant 0 : index
    %c0_134 = arith.constant 0 : index
    %367 = vector.load %arg13[%366, %c0_133, %c0_134] : memref<10x8x128xbf16, #tpu.memory_space<vmem>>, vector<1x8x128xbf16>
    %368 = vector.shape_cast %367 : vector<1x8x128xbf16> to vector<8x128xbf16>
    %369 = vector.shape_cast %365 : vector<8x128xbf16> to vector<1x8x128xbf16>
    tpu.vector_store %arg13[%366, %c0_133, %c0_134], %369 {strides = array<i32>} : memref<10x8x128xbf16, #tpu.memory_space<vmem>>, vector<1x8x128xbf16>,
    %c6_i32 = arith.constant 6 : i32
    %370 = arith.truncf %364 : vector<8x128xf32> to vector<8x128xbf16>
    %c0_135 = arith.constant 0 : index
    %c0_136 = arith.constant 0 : index
    %371 = vector.load %arg5[%c0_135, %c0_136] : memref<128x512xbf16, #tpu.memory_space<vmem>>, vector<128x512xbf16>
    %cst_137 = arith.constant dense<0.000000e+00> : vector<8x512xf32>
    %372 = tpu.matmul %370, %371, %cst_137 {dimension_numbers = #tpu.dot_dimension_numbers<[1], [0], [0], [1], [0, 0, 1, 1], [], []>} : vector<8x128xbf16>, vector<128x512xbf16>, vector<8x512xf32> -> vector<8x512xf32>
    %373 = vector.broadcast %8 : vector<1x512xf32> to vector<8x512xf32>
    %374 = arith.addf %373, %372 : vector<8x512xf32>
    %375 = vector.extract_strided_slice %374 {offsets = [0, 0], sizes = [8, 128], strides = [1, 1]} : vector<8x512xf32> to vector<8x128xf32>
    %376 = math.tanh %375 : vector<8x128xf32>
    %377 = vector.extract_strided_slice %374 {offsets = [0, 128], sizes = [8, 128], strides = [1, 1]} : vector<8x512xf32> to vector<8x128xf32>
    %378 = math.tanh %377 : vector<8x128xf32>
    %cst_138 = arith.constant 5.000000e-01 : f32
    %379 = vector.broadcast %cst_138 : f32 to vector<8x128xf32>
    %380 = arith.mulf %379, %378 : vector<8x128xf32>
    %cst_139 = arith.constant 5.000000e-01 : f32
    %381 = vector.broadcast %cst_139 : f32 to vector<8x128xf32>
    %382 = arith.addf %380, %381 : vector<8x128xf32>
    %383 = vector.extract_strided_slice %374 {offsets = [0, 256], sizes = [8, 128], strides = [1, 1]} : vector<8x512xf32> to vector<8x128xf32>
    %384 = math.tanh %383 : vector<8x128xf32>
    %cst_140 = arith.constant 5.000000e-01 : f32
    %385 = vector.broadcast %cst_140 : f32 to vector<8x128xf32>
    %386 = arith.mulf %385, %384 : vector<8x128xf32>
    %cst_141 = arith.constant 5.000000e-01 : f32
    %387 = vector.broadcast %cst_141 : f32 to vector<8x128xf32>
    %388 = arith.addf %386, %387 : vector<8x128xf32>
    %389 = vector.extract_strided_slice %374 {offsets = [0, 384], sizes = [8, 128], strides = [1, 1]} : vector<8x512xf32> to vector<8x128xf32>
    %390 = math.tanh %389 : vector<8x128xf32>
    %cst_142 = arith.constant 5.000000e-01 : f32
    %391 = vector.broadcast %cst_142 : f32 to vector<8x128xf32>
    %392 = arith.mulf %391, %390 : vector<8x128xf32>
    %cst_143 = arith.constant 5.000000e-01 : f32
    %393 = vector.broadcast %cst_143 : f32 to vector<8x128xf32>
    %394 = arith.addf %392, %393 : vector<8x128xf32>
    %395 = arith.mulf %337, %388 : vector<8x128xf32>
    %396 = arith.mulf %376, %382 : vector<8x128xf32>
    %397 = arith.addf %395, %396 : vector<8x128xf32>
    %398 = math.tanh %397 : vector<8x128xf32>
    %399 = arith.mulf %398, %394 : vector<8x128xf32>
    %400 = arith.truncf %399 : vector<8x128xf32> to vector<8x128xbf16>
    %c0_144 = arith.constant 0 : index
    %c0_145 = arith.constant 0 : index
    %401 = vector.load %arg7[%c0_144, %c0_145] : memref<128x128xbf16, #tpu.memory_space<vmem>>, vector<128x128xbf16>
    %cst_146 = arith.constant dense<0.000000e+00> : vector<8x128xf32>
    %402 = tpu.matmul %400, %401, %cst_146 {dimension_numbers = #tpu.dot_dimension_numbers<[1], [0], [0], [1], [0, 0, 1, 1], [], []>} : vector<8x128xbf16>, vector<128x128xbf16>, vector<8x128xf32> -> vector<8x128xf32>
    %403 = vector.broadcast %9 : vector<1x128xf32> to vector<8x128xf32>
    %404 = arith.addf %403, %402 : vector<8x128xf32>
    %405 = math.tanh %404 : vector<8x128xf32>
    %406 = arith.truncf %405 : vector<8x128xf32> to vector<8x128xbf16>
    %c0_147 = arith.constant 0 : index
    %c0_148 = arith.constant 0 : index
    %407 = vector.load %arg8[%c0_147, %c0_148] : memref<128x384xbf16, #tpu.memory_space<vmem>>, vector<128x384xbf16>
    %cst_149 = arith.constant dense<0.000000e+00> : vector<8x384xf32>
    %408 = tpu.matmul %406, %407, %cst_149 {dimension_numbers = #tpu.dot_dimension_numbers<[1], [0], [0], [1], [0, 0, 1, 1], [], []>} : vector<8x128xbf16>, vector<128x384xbf16>, vector<8x384xf32> -> vector<8x384xf32>
    %c0_150 = arith.constant 0 : index
    %c0_151 = arith.constant 0 : index
    %409 = vector.load %arg9[%c0_150, %c0_151] : memref<1x384xf32, #tpu.memory_space<vmem>>, vector<1x384xf32>
    %410 = vector.broadcast %409 : vector<1x384xf32> to vector<8x384xf32>
    %411 = arith.addf %408, %410 : vector<8x384xf32>
    %412 = vector.extract_strided_slice %411 {offsets = [0, 0], sizes = [8, 128], strides = [1, 1]} : vector<8x384xf32> to vector<8x128xf32>
    %413 = math.tanh %412 : vector<8x128xf32>
    %414 = vector.extract_strided_slice %411 {offsets = [0, 128], sizes = [8, 128], strides = [1, 1]} : vector<8x384xf32> to vector<8x128xf32>
    %415 = math.tanh %414 : vector<8x128xf32>
    %416 = vector.extract_strided_slice %411 {offsets = [0, 256], sizes = [8, 128], strides = [1, 1]} : vector<8x384xf32> to vector<8x128xf32>
    %417 = math.tanh %416 : vector<8x128xf32>
    %cst_152 = arith.constant 5.000000e-01 : f32
    %418 = vector.broadcast %cst_152 : f32 to vector<8x128xf32>
    %419 = arith.mulf %418, %417 : vector<8x128xf32>
    %cst_153 = arith.constant 5.000000e-01 : f32
    %420 = vector.broadcast %cst_153 : f32 to vector<8x128xf32>
    %421 = arith.addf %419, %420 : vector<8x128xf32>
    %422 = arith.subf %415, %413 : vector<8x128xf32>
    %423 = arith.mulf %421, %422 : vector<8x128xf32>
    %424 = arith.addf %413, %423 : vector<8x128xf32>
    %425 = arith.truncf %424 : vector<8x128xf32> to vector<8x128xbf16>
    %426 = arith.index_cast %c6_i32 : i32 to index
    %c0_154 = arith.constant 0 : index
    %c0_155 = arith.constant 0 : index
    %427 = vector.load %arg13[%426, %c0_154, %c0_155] : memref<10x8x128xbf16, #tpu.memory_space<vmem>>, vector<1x8x128xbf16>
    %428 = vector.shape_cast %427 : vector<1x8x128xbf16> to vector<8x128xbf16>
    %429 = vector.shape_cast %425 : vector<8x128xbf16> to vector<1x8x128xbf16>
    tpu.vector_store %arg13[%426, %c0_154, %c0_155], %429 {strides = array<i32>} : memref<10x8x128xbf16, #tpu.memory_space<vmem>>, vector<1x8x128xbf16>,
    %c7_i32 = arith.constant 7 : i32
    %430 = arith.truncf %424 : vector<8x128xf32> to vector<8x128xbf16>
    %c0_156 = arith.constant 0 : index
    %c0_157 = arith.constant 0 : index
    %431 = vector.load %arg5[%c0_156, %c0_157] : memref<128x512xbf16, #tpu.memory_space<vmem>>, vector<128x512xbf16>
    %cst_158 = arith.constant dense<0.000000e+00> : vector<8x512xf32>
    %432 = tpu.matmul %430, %431, %cst_158 {dimension_numbers = #tpu.dot_dimension_numbers<[1], [0], [0], [1], [0, 0, 1, 1], [], []>} : vector<8x128xbf16>, vector<128x512xbf16>, vector<8x512xf32> -> vector<8x512xf32>
    %433 = vector.broadcast %8 : vector<1x512xf32> to vector<8x512xf32>
    %434 = arith.addf %433, %432 : vector<8x512xf32>
    %435 = vector.extract_strided_slice %434 {offsets = [0, 0], sizes = [8, 128], strides = [1, 1]} : vector<8x512xf32> to vector<8x128xf32>
    %436 = math.tanh %435 : vector<8x128xf32>
    %437 = vector.extract_strided_slice %434 {offsets = [0, 128], sizes = [8, 128], strides = [1, 1]} : vector<8x512xf32> to vector<8x128xf32>
    %438 = math.tanh %437 : vector<8x128xf32>
    %cst_159 = arith.constant 5.000000e-01 : f32
    %439 = vector.broadcast %cst_159 : f32 to vector<8x128xf32>
    %440 = arith.mulf %439, %438 : vector<8x128xf32>
    %cst_160 = arith.constant 5.000000e-01 : f32
    %441 = vector.broadcast %cst_160 : f32 to vector<8x128xf32>
    %442 = arith.addf %440, %441 : vector<8x128xf32>
    %443 = vector.extract_strided_slice %434 {offsets = [0, 256], sizes = [8, 128], strides = [1, 1]} : vector<8x512xf32> to vector<8x128xf32>
    %444 = math.tanh %443 : vector<8x128xf32>
    %cst_161 = arith.constant 5.000000e-01 : f32
    %445 = vector.broadcast %cst_161 : f32 to vector<8x128xf32>
    %446 = arith.mulf %445, %444 : vector<8x128xf32>
    %cst_162 = arith.constant 5.000000e-01 : f32
    %447 = vector.broadcast %cst_162 : f32 to vector<8x128xf32>
    %448 = arith.addf %446, %447 : vector<8x128xf32>
    %449 = vector.extract_strided_slice %434 {offsets = [0, 384], sizes = [8, 128], strides = [1, 1]} : vector<8x512xf32> to vector<8x128xf32>
    %450 = math.tanh %449 : vector<8x128xf32>
    %cst_163 = arith.constant 5.000000e-01 : f32
    %451 = vector.broadcast %cst_163 : f32 to vector<8x128xf32>
    %452 = arith.mulf %451, %450 : vector<8x128xf32>
    %cst_164 = arith.constant 5.000000e-01 : f32
    %453 = vector.broadcast %cst_164 : f32 to vector<8x128xf32>
    %454 = arith.addf %452, %453 : vector<8x128xf32>
    %455 = arith.mulf %397, %448 : vector<8x128xf32>
    %456 = arith.mulf %436, %442 : vector<8x128xf32>
    %457 = arith.addf %455, %456 : vector<8x128xf32>
    %458 = math.tanh %457 : vector<8x128xf32>
    %459 = arith.mulf %458, %454 : vector<8x128xf32>
    %460 = arith.truncf %459 : vector<8x128xf32> to vector<8x128xbf16>
    %c0_165 = arith.constant 0 : index
    %c0_166 = arith.constant 0 : index
    %461 = vector.load %arg7[%c0_165, %c0_166] : memref<128x128xbf16, #tpu.memory_space<vmem>>, vector<128x128xbf16>
    %cst_167 = arith.constant dense<0.000000e+00> : vector<8x128xf32>
    %462 = tpu.matmul %460, %461, %cst_167 {dimension_numbers = #tpu.dot_dimension_numbers<[1], [0], [0], [1], [0, 0, 1, 1], [], []>} : vector<8x128xbf16>, vector<128x128xbf16>, vector<8x128xf32> -> vector<8x128xf32>
    %463 = vector.broadcast %9 : vector<1x128xf32> to vector<8x128xf32>
    %464 = arith.addf %463, %462 : vector<8x128xf32>
    %465 = math.tanh %464 : vector<8x128xf32>
    %466 = arith.truncf %465 : vector<8x128xf32> to vector<8x128xbf16>
    %c0_168 = arith.constant 0 : index
    %c0_169 = arith.constant 0 : index
    %467 = vector.load %arg8[%c0_168, %c0_169] : memref<128x384xbf16, #tpu.memory_space<vmem>>, vector<128x384xbf16>
    %cst_170 = arith.constant dense<0.000000e+00> : vector<8x384xf32>
    %468 = tpu.matmul %466, %467, %cst_170 {dimension_numbers = #tpu.dot_dimension_numbers<[1], [0], [0], [1], [0, 0, 1, 1], [], []>} : vector<8x128xbf16>, vector<128x384xbf16>, vector<8x384xf32> -> vector<8x384xf32>
    %c0_171 = arith.constant 0 : index
    %c0_172 = arith.constant 0 : index
    %469 = vector.load %arg9[%c0_171, %c0_172] : memref<1x384xf32, #tpu.memory_space<vmem>>, vector<1x384xf32>
    %470 = vector.broadcast %469 : vector<1x384xf32> to vector<8x384xf32>
    %471 = arith.addf %468, %470 : vector<8x384xf32>
    %472 = vector.extract_strided_slice %471 {offsets = [0, 0], sizes = [8, 128], strides = [1, 1]} : vector<8x384xf32> to vector<8x128xf32>
    %473 = math.tanh %472 : vector<8x128xf32>
    %474 = vector.extract_strided_slice %471 {offsets = [0, 128], sizes = [8, 128], strides = [1, 1]} : vector<8x384xf32> to vector<8x128xf32>
    %475 = math.tanh %474 : vector<8x128xf32>
    %476 = vector.extract_strided_slice %471 {offsets = [0, 256], sizes = [8, 128], strides = [1, 1]} : vector<8x384xf32> to vector<8x128xf32>
    %477 = math.tanh %476 : vector<8x128xf32>
    %cst_173 = arith.constant 5.000000e-01 : f32
    %478 = vector.broadcast %cst_173 : f32 to vector<8x128xf32>
    %479 = arith.mulf %478, %477 : vector<8x128xf32>
    %cst_174 = arith.constant 5.000000e-01 : f32
    %480 = vector.broadcast %cst_174 : f32 to vector<8x128xf32>
    %481 = arith.addf %479, %480 : vector<8x128xf32>
    %482 = arith.subf %475, %473 : vector<8x128xf32>
    %483 = arith.mulf %481, %482 : vector<8x128xf32>
    %484 = arith.addf %473, %483 : vector<8x128xf32>
    %485 = arith.truncf %484 : vector<8x128xf32> to vector<8x128xbf16>
    %486 = arith.index_cast %c7_i32 : i32 to index
    %c0_175 = arith.constant 0 : index
    %c0_176 = arith.constant 0 : index
    %487 = vector.load %arg13[%486, %c0_175, %c0_176] : memref<10x8x128xbf16, #tpu.memory_space<vmem>>, vector<1x8x128xbf16>
    %488 = vector.shape_cast %487 : vector<1x8x128xbf16> to vector<8x128xbf16>
    %489 = vector.shape_cast %485 : vector<8x128xbf16> to vector<1x8x128xbf16>
    tpu.vector_store %arg13[%486, %c0_175, %c0_176], %489 {strides = array<i32>} : memref<10x8x128xbf16, #tpu.memory_space<vmem>>, vector<1x8x128xbf16>,
    %c8_i32 = arith.constant 8 : i32
    %490 = arith.truncf %484 : vector<8x128xf32> to vector<8x128xbf16>
    %c0_177 = arith.constant 0 : index
    %c0_178 = arith.constant 0 : index
    %491 = vector.load %arg5[%c0_177, %c0_178] : memref<128x512xbf16, #tpu.memory_space<vmem>>, vector<128x512xbf16>
    %cst_179 = arith.constant dense<0.000000e+00> : vector<8x512xf32>
    %492 = tpu.matmul %490, %491, %cst_179 {dimension_numbers = #tpu.dot_dimension_numbers<[1], [0], [0], [1], [0, 0, 1, 1], [], []>} : vector<8x128xbf16>, vector<128x512xbf16>, vector<8x512xf32> -> vector<8x512xf32>
    %493 = vector.broadcast %8 : vector<1x512xf32> to vector<8x512xf32>
    %494 = arith.addf %493, %492 : vector<8x512xf32>
    %495 = vector.extract_strided_slice %494 {offsets = [0, 0], sizes = [8, 128], strides = [1, 1]} : vector<8x512xf32> to vector<8x128xf32>
    %496 = math.tanh %495 : vector<8x128xf32>
    %497 = vector.extract_strided_slice %494 {offsets = [0, 128], sizes = [8, 128], strides = [1, 1]} : vector<8x512xf32> to vector<8x128xf32>
    %498 = math.tanh %497 : vector<8x128xf32>
    %cst_180 = arith.constant 5.000000e-01 : f32
    %499 = vector.broadcast %cst_180 : f32 to vector<8x128xf32>
    %500 = arith.mulf %499, %498 : vector<8x128xf32>
    %cst_181 = arith.constant 5.000000e-01 : f32
    %501 = vector.broadcast %cst_181 : f32 to vector<8x128xf32>
    %502 = arith.addf %500, %501 : vector<8x128xf32>
    %503 = vector.extract_strided_slice %494 {offsets = [0, 256], sizes = [8, 128], strides = [1, 1]} : vector<8x512xf32> to vector<8x128xf32>
    %504 = math.tanh %503 : vector<8x128xf32>
    %cst_182 = arith.constant 5.000000e-01 : f32
    %505 = vector.broadcast %cst_182 : f32 to vector<8x128xf32>
    %506 = arith.mulf %505, %504 : vector<8x128xf32>
    %cst_183 = arith.constant 5.000000e-01 : f32
    %507 = vector.broadcast %cst_183 : f32 to vector<8x128xf32>
    %508 = arith.addf %506, %507 : vector<8x128xf32>
    %509 = vector.extract_strided_slice %494 {offsets = [0, 384], sizes = [8, 128], strides = [1, 1]} : vector<8x512xf32> to vector<8x128xf32>
    %510 = math.tanh %509 : vector<8x128xf32>
    %cst_184 = arith.constant 5.000000e-01 : f32
    %511 = vector.broadcast %cst_184 : f32 to vector<8x128xf32>
    %512 = arith.mulf %511, %510 : vector<8x128xf32>
    %cst_185 = arith.constant 5.000000e-01 : f32
    %513 = vector.broadcast %cst_185 : f32 to vector<8x128xf32>
    %514 = arith.addf %512, %513 : vector<8x128xf32>
    %515 = arith.mulf %457, %508 : vector<8x128xf32>
    %516 = arith.mulf %496, %502 : vector<8x128xf32>
    %517 = arith.addf %515, %516 : vector<8x128xf32>
    %518 = math.tanh %517 : vector<8x128xf32>
    %519 = arith.mulf %518, %514 : vector<8x128xf32>
    %520 = arith.truncf %519 : vector<8x128xf32> to vector<8x128xbf16>
    %c0_186 = arith.constant 0 : index
    %c0_187 = arith.constant 0 : index
    %521 = vector.load %arg7[%c0_186, %c0_187] : memref<128x128xbf16, #tpu.memory_space<vmem>>, vector<128x128xbf16>
    %cst_188 = arith.constant dense<0.000000e+00> : vector<8x128xf32>
    %522 = tpu.matmul %520, %521, %cst_188 {dimension_numbers = #tpu.dot_dimension_numbers<[1], [0], [0], [1], [0, 0, 1, 1], [], []>} : vector<8x128xbf16>, vector<128x128xbf16>, vector<8x128xf32> -> vector<8x128xf32>
    %523 = vector.broadcast %9 : vector<1x128xf32> to vector<8x128xf32>
    %524 = arith.addf %523, %522 : vector<8x128xf32>
    %525 = math.tanh %524 : vector<8x128xf32>
    %526 = arith.truncf %525 : vector<8x128xf32> to vector<8x128xbf16>
    %c0_189 = arith.constant 0 : index
    %c0_190 = arith.constant 0 : index
    %527 = vector.load %arg8[%c0_189, %c0_190] : memref<128x384xbf16, #tpu.memory_space<vmem>>, vector<128x384xbf16>
    %cst_191 = arith.constant dense<0.000000e+00> : vector<8x384xf32>
    %528 = tpu.matmul %526, %527, %cst_191 {dimension_numbers = #tpu.dot_dimension_numbers<[1], [0], [0], [1], [0, 0, 1, 1], [], []>} : vector<8x128xbf16>, vector<128x384xbf16>, vector<8x384xf32> -> vector<8x384xf32>
    %c0_192 = arith.constant 0 : index
    %c0_193 = arith.constant 0 : index
    %529 = vector.load %arg9[%c0_192, %c0_193] : memref<1x384xf32, #tpu.memory_space<vmem>>, vector<1x384xf32>
    %530 = vector.broadcast %529 : vector<1x384xf32> to vector<8x384xf32>
    %531 = arith.addf %528, %530 : vector<8x384xf32>
    %532 = vector.extract_strided_slice %531 {offsets = [0, 0], sizes = [8, 128], strides = [1, 1]} : vector<8x384xf32> to vector<8x128xf32>
    %533 = math.tanh %532 : vector<8x128xf32>
    %534 = vector.extract_strided_slice %531 {offsets = [0, 128], sizes = [8, 128], strides = [1, 1]} : vector<8x384xf32> to vector<8x128xf32>
    %535 = math.tanh %534 : vector<8x128xf32>
    %536 = vector.extract_strided_slice %531 {offsets = [0, 256], sizes = [8, 128], strides = [1, 1]} : vector<8x384xf32> to vector<8x128xf32>
    %537 = math.tanh %536 : vector<8x128xf32>
    %cst_194 = arith.constant 5.000000e-01 : f32
    %538 = vector.broadcast %cst_194 : f32 to vector<8x128xf32>
    %539 = arith.mulf %538, %537 : vector<8x128xf32>
    %cst_195 = arith.constant 5.000000e-01 : f32
    %540 = vector.broadcast %cst_195 : f32 to vector<8x128xf32>
    %541 = arith.addf %539, %540 : vector<8x128xf32>
    %542 = arith.subf %535, %533 : vector<8x128xf32>
    %543 = arith.mulf %541, %542 : vector<8x128xf32>
    %544 = arith.addf %533, %543 : vector<8x128xf32>
    %545 = arith.truncf %544 : vector<8x128xf32> to vector<8x128xbf16>
    %546 = arith.index_cast %c8_i32 : i32 to index
    %c0_196 = arith.constant 0 : index
    %c0_197 = arith.constant 0 : index
    %547 = vector.load %arg13[%546, %c0_196, %c0_197] : memref<10x8x128xbf16, #tpu.memory_space<vmem>>, vector<1x8x128xbf16>
    %548 = vector.shape_cast %547 : vector<1x8x128xbf16> to vector<8x128xbf16>
    %549 = vector.shape_cast %545 : vector<8x128xbf16> to vector<1x8x128xbf16>
    tpu.vector_store %arg13[%546, %c0_196, %c0_197], %549 {strides = array<i32>} : memref<10x8x128xbf16, #tpu.memory_space<vmem>>, vector<1x8x128xbf16>,
    %c9_i32 = arith.constant 9 : i32
    %550 = arith.truncf %544 : vector<8x128xf32> to vector<8x128xbf16>
    %c0_198 = arith.constant 0 : index
    %c0_199 = arith.constant 0 : index
    %551 = vector.load %arg5[%c0_198, %c0_199] : memref<128x512xbf16, #tpu.memory_space<vmem>>, vector<128x512xbf16>
    %cst_200 = arith.constant dense<0.000000e+00> : vector<8x512xf32>
    %552 = tpu.matmul %550, %551, %cst_200 {dimension_numbers = #tpu.dot_dimension_numbers<[1], [0], [0], [1], [0, 0, 1, 1], [], []>} : vector<8x128xbf16>, vector<128x512xbf16>, vector<8x512xf32> -> vector<8x512xf32>
    %553 = vector.broadcast %8 : vector<1x512xf32> to vector<8x512xf32>
    %554 = arith.addf %553, %552 : vector<8x512xf32>
    %555 = vector.extract_strided_slice %554 {offsets = [0, 0], sizes = [8, 128], strides = [1, 1]} : vector<8x512xf32> to vector<8x128xf32>
    %556 = math.tanh %555 : vector<8x128xf32>
    %557 = vector.extract_strided_slice %554 {offsets = [0, 128], sizes = [8, 128], strides = [1, 1]} : vector<8x512xf32> to vector<8x128xf32>
    %558 = math.tanh %557 : vector<8x128xf32>
    %cst_201 = arith.constant 5.000000e-01 : f32
    %559 = vector.broadcast %cst_201 : f32 to vector<8x128xf32>
    %560 = arith.mulf %559, %558 : vector<8x128xf32>
    %cst_202 = arith.constant 5.000000e-01 : f32
    %561 = vector.broadcast %cst_202 : f32 to vector<8x128xf32>
    %562 = arith.addf %560, %561 : vector<8x128xf32>
    %563 = vector.extract_strided_slice %554 {offsets = [0, 256], sizes = [8, 128], strides = [1, 1]} : vector<8x512xf32> to vector<8x128xf32>
    %564 = math.tanh %563 : vector<8x128xf32>
    %cst_203 = arith.constant 5.000000e-01 : f32
    %565 = vector.broadcast %cst_203 : f32 to vector<8x128xf32>
    %566 = arith.mulf %565, %564 : vector<8x128xf32>
    %cst_204 = arith.constant 5.000000e-01 : f32
    %567 = vector.broadcast %cst_204 : f32 to vector<8x128xf32>
    %568 = arith.addf %566, %567 : vector<8x128xf32>
    %569 = vector.extract_strided_slice %554 {offsets = [0, 384], sizes = [8, 128], strides = [1, 1]} : vector<8x512xf32> to vector<8x128xf32>
    %570 = math.tanh %569 : vector<8x128xf32>
    %cst_205 = arith.constant 5.000000e-01 : f32
    %571 = vector.broadcast %cst_205 : f32 to vector<8x128xf32>
    %572 = arith.mulf %571, %570 : vector<8x128xf32>
    %cst_206 = arith.constant 5.000000e-01 : f32
    %573 = vector.broadcast %cst_206 : f32 to vector<8x128xf32>
    %574 = arith.addf %572, %573 : vector<8x128xf32>
    %575 = arith.mulf %517, %568 : vector<8x128xf32>
    %576 = arith.mulf %556, %562 : vector<8x128xf32>
    %577 = arith.addf %575, %576 : vector<8x128xf32>
    %578 = math.tanh %577 : vector<8x128xf32>
    %579 = arith.mulf %578, %574 : vector<8x128xf32>
    %580 = arith.truncf %579 : vector<8x128xf32> to vector<8x128xbf16>
    %c0_207 = arith.constant 0 : index
    %c0_208 = arith.constant 0 : index
    %581 = vector.load %arg7[%c0_207, %c0_208] : memref<128x128xbf16, #tpu.memory_space<vmem>>, vector<128x128xbf16>
    %cst_209 = arith.constant dense<0.000000e+00> : vector<8x128xf32>
    %582 = tpu.matmul %580, %581, %cst_209 {dimension_numbers = #tpu.dot_dimension_numbers<[1], [0], [0], [1], [0, 0, 1, 1], [], []>} : vector<8x128xbf16>, vector<128x128xbf16>, vector<8x128xf32> -> vector<8x128xf32>
    %583 = vector.broadcast %9 : vector<1x128xf32> to vector<8x128xf32>
    %584 = arith.addf %583, %582 : vector<8x128xf32>
    %585 = math.tanh %584 : vector<8x128xf32>
    %586 = arith.truncf %585 : vector<8x128xf32> to vector<8x128xbf16>
    %c0_210 = arith.constant 0 : index
    %c0_211 = arith.constant 0 : index
    %587 = vector.load %arg8[%c0_210, %c0_211] : memref<128x384xbf16, #tpu.memory_space<vmem>>, vector<128x384xbf16>
    %cst_212 = arith.constant dense<0.000000e+00> : vector<8x384xf32>
    %588 = tpu.matmul %586, %587, %cst_212 {dimension_numbers = #tpu.dot_dimension_numbers<[1], [0], [0], [1], [0, 0, 1, 1], [], []>} : vector<8x128xbf16>, vector<128x384xbf16>, vector<8x384xf32> -> vector<8x384xf32>
    %c0_213 = arith.constant 0 : index
    %c0_214 = arith.constant 0 : index
    %589 = vector.load %arg9[%c0_213, %c0_214] : memref<1x384xf32, #tpu.memory_space<vmem>>, vector<1x384xf32>
    %590 = vector.broadcast %589 : vector<1x384xf32> to vector<8x384xf32>
    %591 = arith.addf %588, %590 : vector<8x384xf32>
    %592 = vector.extract_strided_slice %591 {offsets = [0, 0], sizes = [8, 128], strides = [1, 1]} : vector<8x384xf32> to vector<8x128xf32>
    %593 = math.tanh %592 : vector<8x128xf32>
    %594 = vector.extract_strided_slice %591 {offsets = [0, 128], sizes = [8, 128], strides = [1, 1]} : vector<8x384xf32> to vector<8x128xf32>
    %595 = math.tanh %594 : vector<8x128xf32>
    %596 = vector.extract_strided_slice %591 {offsets = [0, 256], sizes = [8, 128], strides = [1, 1]} : vector<8x384xf32> to vector<8x128xf32>
    %597 = math.tanh %596 : vector<8x128xf32>
    %cst_215 = arith.constant 5.000000e-01 : f32
    %598 = vector.broadcast %cst_215 : f32 to vector<8x128xf32>
    %599 = arith.mulf %598, %597 : vector<8x128xf32>
    %cst_216 = arith.constant 5.000000e-01 : f32
    %600 = vector.broadcast %cst_216 : f32 to vector<8x128xf32>
    %601 = arith.addf %599, %600 : vector<8x128xf32>
    %602 = arith.subf %595, %593 : vector<8x128xf32>
    %603 = arith.mulf %601, %602 : vector<8x128xf32>
    %604 = arith.addf %593, %603 : vector<8x128xf32>
    %605 = arith.truncf %604 : vector<8x128xf32> to vector<8x128xbf16>
    %606 = arith.index_cast %c9_i32 : i32 to index
    %c0_217 = arith.constant 0 : index
    %c0_218 = arith.constant 0 : index
    %607 = vector.load %arg13[%606, %c0_217, %c0_218] : memref<10x8x128xbf16, #tpu.memory_space<vmem>>, vector<1x8x128xbf16>
    %608 = vector.shape_cast %607 : vector<1x8x128xbf16> to vector<8x128xbf16>
    %609 = vector.shape_cast %605 : vector<8x128xbf16> to vector<1x8x128xbf16>
    tpu.vector_store %arg13[%606, %c0_217, %c0_218], %609 {strides = array<i32>} : memref<10x8x128xbf16, #tpu.memory_space<vmem>>, vector<1x8x128xbf16>,
    %c10_i32 = arith.constant 10 : i32
    %c0_219 = arith.constant 0 : index
    %c0_220 = arith.constant 0 : index
    %c0_221 = arith.constant 0 : index
    %610 = vector.load %arg13[%c0_219, %c0_220, %c0_221] : memref<10x8x128xbf16, #tpu.memory_space<vmem>>, vector<10x8x128xbf16>
    %611 = vector.shape_cast %610 : vector<10x8x128xbf16> to vector<80x128xbf16>
    %c0_222 = arith.constant 0 : index
    %c0_223 = arith.constant 0 : index
    %612 = vector.load %arg10[%c0_222, %c0_223] : memref<128x128xbf16, #tpu.memory_space<vmem>>, vector<128x128xbf16>
    %cst_224 = arith.constant dense<0.000000e+00> : vector<80x128xf32>
    %613 = tpu.matmul %611, %612, %cst_224 {dimension_numbers = #tpu.dot_dimension_numbers<[1], [0], [0], [1], [0, 0, 1, 1], [], []>} : vector<80x128xbf16>, vector<128x128xbf16>, vector<80x128xf32> -> vector<80x128xf32>
    %c0_225 = arith.constant 0 : index
    %c0_226 = arith.constant 0 : index
    %614 = vector.load %arg11[%c0_225, %c0_226] : memref<1x128xf32, #tpu.memory_space<vmem>>, vector<1x128xf32>
    %615 = vector.broadcast %614 : vector<1x128xf32> to vector<80x128xf32>
    %616 = arith.addf %613, %615 : vector<80x128xf32>
    %617 = vector.shape_cast %616 : vector<80x128xf32> to vector<10x8x128xf32>
    %c0_227 = arith.constant 0 : index
    %c0_228 = arith.constant 0 : index
    %c0_229 = arith.constant 0 : index
    %618 = vector.load %arg12[%c0_227, %c0_228, %c0_229] : memref<10x8x128xf32, #tpu.memory_space<vmem>>, vector<10x8x128xf32>
    tpu.vector_store %arg12[%c0_227, %c0_228, %c0_229], %617 {strides = array<i32>} : memref<10x8x128xf32, #tpu.memory_space<vmem>>, vector<10x8x128xf32>,
    return
  }
  func.func @transform_0(%arg0: i32) -> (i32, i32) {
    %c0_i32 = arith.constant 0 : i32
    %c0_i32_0 = arith.constant 0 : i32
    return %arg0, %c0_i32 : i32, i32
  }
  func.func @transform_1(%arg0: i32) -> (i32, i32) {
    %c0_i32 = arith.constant 0 : i32
    %c0_i32_0 = arith.constant 0 : i32
    %c0_i32_1 = arith.constant 0 : i32
    return %c0_i32, %c0_i32_0 : i32, i32
  }
  func.func @transform_2(%arg0: i32) -> (i32, i32) {
    %c0_i32 = arith.constant 0 : i32
    %c0_i32_0 = arith.constant 0 : i32
    %c0_i32_1 = arith.constant 0 : i32
    return %c0_i32, %c0_i32_0 : i32, i32
  }
  func.func @transform_3(%arg0: i32) -> (i32, i32) {
    %c0_i32 = arith.constant 0 : i32
    %c0_i32_0 = arith.constant 0 : i32
    %c0_i32_1 = arith.constant 0 : i32
    return %c0_i32, %c0_i32_0 : i32, i32
  }
  func.func @transform_4(%arg0: i32) -> (i32, i32) {
    %c0_i32 = arith.constant 0 : i32
    %c0_i32_0 = arith.constant 0 : i32
    %c0_i32_1 = arith.constant 0 : i32
    return %c0_i32, %c0_i32_0 : i32, i32
  }
  func.func @transform_5(%arg0: i32) -> (i32, i32) {
    %c0_i32 = arith.constant 0 : i32
    %c0_i32_0 = arith.constant 0 : i32
    %c0_i32_1 = arith.constant 0 : i32
    return %c0_i32, %c0_i32_0 : i32, i32
  }
  func.func @transform_6(%arg0: i32) -> (i32, i32) {
    %c0_i32 = arith.constant 0 : i32
    %c0_i32_0 = arith.constant 0 : i32
    %c0_i32_1 = arith.constant 0 : i32
    return %c0_i32, %c0_i32_0 : i32, i32
  }
  func.func @transform_7(%arg0: i32) -> (i32, i32) {
    %c0_i32 = arith.constant 0 : i32
    %c0_i32_0 = arith.constant 0 : i32
    %c0_i32_1 = arith.constant 0 : i32
    return %c0_i32, %c0_i32_0 : i32, i32
  }
  func.func @transform_8(%arg0: i32) -> (i32, i32) {
    %c0_i32 = arith.constant 0 : i32
    %c0_i32_0 = arith.constant 0 : i32
    %c0_i32_1 = arith.constant 0 : i32
    return %c0_i32, %c0_i32_0 : i32, i32
  }
  func.func @transform_9(%arg0: i32) -> (i32, i32) {
    %c0_i32 = arith.constant 0 : i32
    %c0_i32_0 = arith.constant 0 : i32
    %c0_i32_1 = arith.constant 0 : i32
    return %c0_i32, %c0_i32_0 : i32, i32
  }
  func.func @transform_10(%arg0: i32) -> (i32, i32) {
    %c0_i32 = arith.constant 0 : i32
    %c0_i32_0 = arith.constant 0 : i32
    %c0_i32_1 = arith.constant 0 : i32
    return %c0_i32, %c0_i32_0 : i32, i32
  }
  func.func @transform_11(%arg0: i32) -> (i32, i32, i32) {
    %c0_i32 = arith.constant 0 : i32
    %c0_i32_0 = arith.constant 0 : i32
    %c0_i32_1 = arith.constant 0 : i32
    return %c0_i32, %arg0, %c0_i32_0 : i32, i32, i32
  }
}

</mosaic_0001>

<bundles_post_ra>
// kernel: agent_prediction_head.1
= control target key start
LH: loop header
LB: loop body
LE: loop exit
PB: predicated region body
PF: predicated region fallthrough
CT: control target
= control target key end

     0   :  { %16 = vsyncpa [#allocation4], 0  ;;  %s10761_s0 = inlined_call_operand.vmem [shape: bf16[8,32], index: 0, kind: input, shape index: {}]   ;;  %s10762_s1 = inlined_call_operand.vmem [shape: bf16[32,256], index: 1, kind: input, shape index: {}]   ;;  %s10763_s2 = inlined_call_operand.vmem [shape: f32[1,256], index: 2, kind: input, shape index: {}]   ;;  %s10764_s3 = inlined_call_operand.vmem [shape: f32[1,512], index: 3, kind: input, shape index: {}]   ;;  %s10765_s4 = inlined_call_operand.hbm [shape: bf16[128,512], index: 4, kind: input, shape index: {}]   ;;  %s10766_s5 = inlined_call_operand.vmem [shape: f32[1,128], index: 5, kind: input, shape index: {}]   ;;  %s10767_s6 = inlined_call_operand.hbm [shape: bf16[128,128], index: 6, kind: input, shape index: {}]   ;;  %s10768_s7 = inlined_call_operand.hbm [shape: bf16[128,384], index: 7, kind: input, shape index: {}]   ;;  %s10769_s8 = inlined_call_operand.vmem [shape: f32[1,384], index: 8, kind: input, shape index: {}]   ;;  %s10770_s9 = inlined_call_operand.hbm [shape: bf16[128,128], index: 9, kind: input, shape index: {}]   ;;  %s10771_s10 = inlined_call_operand.vmem [shape: f32[1,128], index: 10, kind: input, shape index: {}]   ;;  %s10772_s11 = inlined_call_operand.vmem [shape: f32[10,8,128], index: 11, kind: output, shape index: {}]  }
   0x1   :  { %17 = vsyncpa [#allocation6], 0 }
   0x2   :  { %18 = vsyncpa [#allocation9], 0  ;;  %s9240_s17 = smov [#allocation5]   ;;  %s9146_s21 = scalar_lea.hbm %s10767_s6, 1024 }
   0x3   :  { %s46_s18 = sshll.u32 %s9240_s17, 4  ;;  %p9147_p0 = scmp.ne.s32.totalorder %s10767_s6, %s9146_s21  ;;  %s47_s18 = int_to_ptr.vmem [resolvable:$true] %s46_s18 }
   0x4   :  { %p9150_p1 = scmp.lt.u32.totalorder %s9146_s21, %s10767_s6 }
   0x6   :  { %p9152_p2 = pnand %p9150_p1, %p9147_p0 }
   0x8   :  { %9155 = shalt.err (!%p9152_p2)
}
   0x9   :  { %s9156_s26 = scalar_lea.vmem %s47_s18, 1024  ;;  %p9161_p4 = scmp.lt.s32.totalorder %s47_s18, %s47_s18 }
   0xa   :  { %p9157_p3 = scmp.ne.s32.totalorder %s47_s18, %s9156_s26  ;;  %p9162_p5 = scmp.lt.s32.totalorder %s9156_s26, %s9156_s26 }
   0xc   :  { %p9163_p6 = por %p9162_p5, %p9161_p4 }
   0xe   :  { %p9164_p7 = pnand %p9163_p6, %p9157_p3 }
  0x10   :  { %9167 = shalt.err (!%p9164_p7)
}
  0x11   :  { %s9241_s27 = smov 64   ;;  %s9242_s28 = smov 4  }
  0x12   :  { %52 = dma.hbm_to_vmem [thread:$0]  %s10767_s6, 1024, %s47_s18, [#allocation6], %s9241_s27, %s9241_s27, %s9242_s28  }
  0x13   :  { %s9243_s12 = smov [#allocation3]   ;;  %s9168_s16 = scalar_lea.hbm %s10765_s4, 4096 }
  0x14   :  { %s32_s13 = sshll.u32 %s9243_s12, 4  ;;  %p9169_p8 = scmp.ne.s32.totalorder %s10765_s4, %s9168_s16  ;;  %s33_s13 = int_to_ptr.vmem [resolvable:$true] %s32_s13 }
  0x15   :  { %p9172_p9 = scmp.lt.u32.totalorder %s9168_s16, %s10765_s4 }
  0x17   :  { %p9174_p10 = pnand %p9172_p9, %p9169_p8 }
  0x19   :  { %9177 = shalt.err (!%p9174_p10)
}
  0x1a   :  { %s9178_s22 = scalar_lea.vmem %s33_s13, 4096  ;;  %p9183_p12 = scmp.lt.s32.totalorder %s33_s13, %s33_s13 }
  0x1b   :  { %p9179_p11 = scmp.ne.s32.totalorder %s33_s13, %s9178_s22  ;;  %p9184_p13 = scmp.lt.s32.totalorder %s9178_s22, %s9178_s22 }
  0x1d   :  { %p9185_p0 = por %p9184_p13, %p9183_p12 }
  0x1f   :  { %p9186_p1 = pnand %p9185_p0, %p9179_p11 }
  0x21   :  { %9189 = shalt.err (!%p9186_p1)
}
  0x22   :  { %s9244_s6 = smov 256   ;;  %s9245_s18 = smov 16  }
  0x23   :  { %38 = dma.hbm_to_vmem [thread:$0]  %s10765_s4, 4096, %s33_s13, [#allocation4], %s9244_s6, %s9244_s6, %s9245_s18  }
  0x24   :  { %s9246_s25 = smov [#allocation7]   ;;  %s9190_s12 = scalar_lea.hbm %s10768_s7, 3072 }
  0x25   :  { %s58_s26 = sshll.u32 %s9246_s25, 4  ;;  %p9191_p2 = scmp.ne.s32.totalorder %s10768_s7, %s9190_s12  ;;  %s59_s26 = int_to_ptr.vmem [resolvable:$true] %s58_s26 }
  0x26   :  { %p9194_p3 = scmp.lt.u32.totalorder %s9190_s12, %s10768_s7 }
  0x28   :  { %p9196_p4 = pnand %p9194_p3, %p9191_p2 }
  0x2a   :  { %9199 = shalt.err (!%p9196_p4)
}
  0x2b   :  { %s9200_s19 = scalar_lea.vmem %s59_s26, 3072  ;;  %p9205_p6 = scmp.lt.s32.totalorder %s59_s26, %s59_s26 }
  0x2c   :  { %p9201_p5 = scmp.ne.s32.totalorder %s59_s26, %s9200_s19  ;;  %p9206_p7 = scmp.lt.s32.totalorder %s9200_s19, %s9200_s19 }
  0x2e   :  { %p9207_p8 = por %p9206_p7, %p9205_p6 }
  0x30   :  { %p9208_p9 = pnand %p9207_p8, %p9201_p5 }
  0x32   :  { %9211 = shalt.err (!%p9208_p9)
}
  0x33   :  { %s9247_s4 = smov 192   ;;  %s9248_s13 = smov 12  }
  0x34   :  { %64 = dma.hbm_to_vmem [thread:$0]  %s10768_s7, 3072, %s59_s26, [#allocation6], %s9247_s4, %s9247_s4, %s9248_s13  }
  0x35   :  { %s9249_s22 = smov [#allocation8]   ;;  %s9212_s24 = scalar_lea.hbm %s10770_s9, 1024 }
  0x36   :  { %s72_s6 = sshll.u32 %s9249_s22, 4  ;;  %p9213_p10 = scmp.ne.s32.totalorder %s10770_s9, %s9212_s24  ;;  %s73_s6 = int_to_ptr.vmem [resolvable:$true] %s72_s6 }
  0x37   :  { %p9216_p11 = scmp.lt.u32.totalorder %s9212_s24, %s10770_s9 }
  0x39   :  { %p9218_p12 = pnand %p9216_p11, %p9213_p10 }
  0x3b   :  { %9221 = shalt.err (!%p9218_p12)
}
  0x3c   :  { %s9222_s14 = scalar_lea.vmem %s73_s6, 1024  ;;  %p9227_p0 = scmp.lt.s32.totalorder %s73_s6, %s73_s6 }
  0x3d   :  { %p9223_p13 = scmp.ne.s32.totalorder %s73_s6, %s9222_s14  ;;  %p9228_p1 = scmp.lt.s32.totalorder %s9222_s14, %s9222_s14 }
  0x3f   :  { %p9229_p2 = por %p9228_p1, %p9227_p0 }
  0x41   :  { %p9230_p3 = pnand %p9229_p2, %p9223_p13 }
  0x43   :  { %9233 = shalt.err (!%p9230_p3)
}
  0x44   :  { %78 = dma.hbm_to_vmem [thread:$0]  %s10770_s9, 1024, %s73_s6, [#allocation9], %s9241_s27, %s9241_s27, %s9242_s28  }
  0x45   :  { %9234 = dma.done.wait [#allocation4], 4096  }
  0x46   :  { %9235 = vsyncadd [#allocation4], 4294963200 }
  0x47   :  { %9236 = dma.done.wait [#allocation6], 4096  }
  0x48   :  { %9237 = vsyncadd [#allocation6], 4294963200 }
  0x49   :  { %9238 = dma.done.wait [#allocation9], 1024  }
  0x4a   :  { %9239 = vsyncadd [#allocation9], 4294966272  ;;  %v10773_v0 = vmov 0   ;;  %v8408_v1 = vld [vmem:[%s10762_s1 + $0x4] ss:$8 sps:$4 sm:$0xff]   ;;  %vm131_vm0 = vcmask 261120   ;;  %v101_v23 = vlaneseq }
  0x4b   :  { %167 = vmatprep.mubr.bf16.mxu0 %v10773_v0  ;;  %v8410_v2 = vld [vmem:[%s10762_s1] ss:$8 sps:$4 sm:$0xff]   ;;  %135 = vmatprep.subr.bf16.mxu0 %v8408_v1  ;;  %v8411_v3 = vld [vmem:[%s10762_s1 + $0x14] ss:$8 sps:$4 sm:$0xff]   ;;  %v8413_v4 = vld [vmem:[%s10762_s1 + $0x10] ss:$8 sps:$4 sm:$0xff]  }
  0x4c   :  { %136 = vmatpush1.bf16.msra.mxu0 %v8410_v2  ;;  %v8416_v5 = vld [vmem:[#allocation3 + $0x4] ss:$16 sps:$4 sm:$0xff]   ;;  %v94_v6 = vld [vmem:[%s10761_s0] sm:$0xf]  ;;  %v8414_v7 = vld [vmem:[#allocation3] ss:$16 sps:$4 sm:$0xff]  }
  0x4d   :  { %137 = vmatprep.subr.bf16.mxu0 %v8411_v3  ;;  %v8419_v8 = vld [vmem:[#allocation3 + $0x24] ss:$16 sps:$4 sm:$0xff]   ;;  %v8417_v9 = vld [vmem:[#allocation3 + $0x20] ss:$16 sps:$4 sm:$0xff]   ;;  %v9384_v22 = vld [vmem:[#allocation3 + $0xc] ss:$16 sps:$4 sm:$0xff]  }
  0x4e   :  { %v8422_v10 = vld [vmem:[#allocation3 + $0x44] ss:$16 sps:$4 sm:$0xff]   ;;  %v8420_v11 = vld [vmem:[#allocation3 + $0x40] ss:$16 sps:$4 sm:$0xff]   ;;  %v9387_v24 = vshrl.u32 %v101_v23, 7  ;;  %v10775_v50 = vmov 0.0  }
  0x4f   :  { %v8425_v12 = vld [vmem:[#allocation3 + $0x64] ss:$16 sps:$4 sm:$0xff]   ;;  %v8423_v13 = vld [vmem:[#allocation3 + $0x60] ss:$16 sps:$4 sm:$0xff]   ;;  %v9395_v26 = vld [vmem:[%s10763_s2] sm:$0x3]  ;;  %7959 = vmatprep.subr.bf16.mxu1 %v10775_v50 }
  0x50   :  { %138 = vmatpush1.bf16.msra.mxu0 %v8413_v4  ;;  %v8428_v14 = vld [vmem:[#allocation3 + $0x84] ss:$16 sps:$4 sm:$0xff]   ;;  %v8426_v15 = vld [vmem:[#allocation3 + $0x80] ss:$16 sps:$4 sm:$0xff]   ;;  %v9390_v25 = vsub.s32 0, %v9387_v24  ;;  %v8463_v51 = vld [vmem:[#allocation5 + $0x8] sm:$0xff]  }
  0x51   :  { %371 = vmatprep.subr.bf16.mxu0 %v8416_v5  ;;  %v8431_v16 = vld [vmem:[#allocation3 + $0xa4] ss:$16 sps:$4 sm:$0xff]   ;;  %v8429_v17 = vld [vmem:[#allocation3 + $0xa0] ss:$16 sps:$4 sm:$0xff]   ;;  %v9401_v32 = vld [vmem:[#allocation3 + $0x8] ss:$16 sps:$4 sm:$0xff]  }
  0x52   :  { %v8434_v18 = vld [vmem:[#allocation3 + $0xc4] ss:$16 sps:$4 sm:$0xff]   ;;  %v8432_v19 = vld [vmem:[#allocation3 + $0xc0] ss:$16 sps:$4 sm:$0xff]   ;;  %v104_v27 = vrot.slane %v9395_v26, %v9390_v25  ;;  %v9403_v35 = vld [vmem:[#allocation3 + $0x2c] ss:$16 sps:$4 sm:$0xff]  }
  0x53   :  { %7110 = vmatmul.mubr.msk.bf16.vlgmr.msra.gmra.mrb[0].mxu0 %vm131_vm0, %v94_v6  ;;  %v8437_v20 = vld [vmem:[#allocation3 + $0xe4] ss:$16 sps:$4 sm:$0xff]   ;;  %v8435_v21 = vld [vmem:[#allocation3 + $0xe0] ss:$16 sps:$4 sm:$0xff]   ;;  %v9406_v36 = vld [vmem:[#allocation3 + $0x28] ss:$16 sps:$4 sm:$0xff]  }
  0x54   :  { %372 = vmatpush1.bf16.msra.mxu0 %v8414_v7  ;;  %403 = vmatprep.mubr.bf16.mxu0 %v10773_v0  ;;  %v9410_v37 = vld [vmem:[#allocation3 + $0x4c] ss:$16 sps:$4 sm:$0xff]   ;;  %v9413_v38 = vld [vmem:[#allocation3 + $0x48] ss:$16 sps:$4 sm:$0xff]   ;;  %v8462_v49 = vld [vmem:[#allocation5] sm:$0xff]   ;;  %vm9252_vm1 = vmmov 0  }
  0x55   :  { %373 = vmatprep.subr.bf16.mxu0 %v8419_v8  ;;  %v9416_v39 = vld [vmem:[#allocation3 + $0x6c] ss:$16 sps:$4 sm:$0xff]   ;;  %v9419_v40 = vld [vmem:[#allocation3 + $0x68] ss:$16 sps:$4 sm:$0xff]   ;;  %7960 = vmatpush3.bf16.msra.mxu1 %v8462_v49  ;;  %v8464_v52 = vld [vmem:[#allocation5 + $0x10] sm:$0xff]   ;;  %v9487_v4 = vsub.s32 1, %v9387_v24 }
  0x56   :  { %v9422_v41 = vld [vmem:[#allocation3 + $0x8c] ss:$16 sps:$4 sm:$0xff]   ;;  %v9425_v42 = vld [vmem:[#allocation3 + $0x88] ss:$16 sps:$4 sm:$0xff]   ;;  %7961 = vmatprep.subr.bf16.mxu1 %v10775_v50  ;;  %v8466_v54 = vld [vmem:[#allocation5 + $0x20] sm:$0xff]   ;;  %7975 = vmatprep.mubr.msk.bf16.mxu1 %vm9252_vm1, %v10775_v50 }
  0x57   :  { %v9428_v43 = vld [vmem:[#allocation3 + $0xac] ss:$16 sps:$4 sm:$0xff]   ;;  %v9431_v44 = vld [vmem:[#allocation3 + $0xa8] ss:$16 sps:$4 sm:$0xff]   ;;  %v8468_v56 = vld [vmem:[#allocation5 + $0x30] sm:$0xff]   ;;  %10797 = vst [vmem:[#allocation13_spill] sm:$0xff] %v9487_v4 }
  0x58   :  { %374 = vmatpush1.bf16.msra.mxu0 %v8417_v9  ;;  %v9434_v45 = vld [vmem:[#allocation3 + $0xcc] ss:$16 sps:$4 sm:$0xff]   ;;  %v9437_v46 = vld [vmem:[#allocation3 + $0xc8] ss:$16 sps:$4 sm:$0xff]   ;;  %v9461_v59 = vld [vmem:[#allocation7 + $0x4] ss:$12 sps:$4 sm:$0xff]  }
  0x59   :  { %375 = vmatprep.subr.bf16.mxu0 %v8422_v10  ;;  %v9440_v47 = vld [vmem:[#allocation3 + $0xec] ss:$16 sps:$4 sm:$0xff]   ;;  %v9443_v48 = vld [vmem:[#allocation3 + $0xe8] ss:$16 sps:$4 sm:$0xff]   ;;  %7962 = vmatpush3.bf16.msra.mxu1 %v8463_v51  ;;  %v9470_v62 = vld [vmem:[#allocation7 + $0x34] ss:$12 sps:$4 sm:$0xff]  }
  0x5a   :  { %7963 = vmatprep.subr.bf16.mxu1 %v10775_v50  ;;  %v8465_v53 = vld [vmem:[#allocation5 + $0x18] sm:$0xff]   ;;  %v8467_v55 = vld [vmem:[#allocation5 + $0x28] sm:$0xff]  }
  0x5b   :  { %v8469_v57 = vld [vmem:[#allocation5 + $0x38] sm:$0xff]   ;;  %v9459_v58 = vld [vmem:[#allocation7] ss:$12 sps:$4 sm:$0xff]   ;;  %v9479_v2 = vld [vmem:[#allocation7 + $0x48] ss:$12 sps:$4 sm:$0xff]  }
  0x5c   :  { %376 = vmatpush1.bf16.msra.mxu0 %v8420_v11  ;;  %v9463_v60 = vld [vmem:[#allocation7 + $0x1c] ss:$12 sps:$4 sm:$0xff]   ;;  %v9467_v61 = vld [vmem:[#allocation7 + $0x18] ss:$12 sps:$4 sm:$0xff]  }
  0x5d   :  { %377 = vmatprep.subr.bf16.mxu0 %v8425_v12  ;;  %7964 = vmatpush3.bf16.msra.mxu1 %v8464_v52  ;;  %v9473_v63 = vld [vmem:[#allocation7 + $0x30] ss:$12 sps:$4 sm:$0xff]   ;;  %v9476_v1 = vld [vmem:[#allocation7 + $0x4c] ss:$12 sps:$4 sm:$0xff]  }
  0x5e   :  { %7965 = vmatprep.subr.bf16.mxu1 %v10775_v50  ;;  %v176_v3 = vld [vmem:[%s10764_s3] sm:$0xf] }
  0x5f   :  { %v9490_v5 = vrot.slane %v176_v3, %v9487_v4  ;;  %v9493_v7 = vrot.slane %v176_v3, %v9390_v25 }
  0x60   :  { %378 = vmatpush1.bf16.msra.mxu0 %v8423_v13 }
  0x61   :  { %379 = vmatprep.subr.bf16.mxu0 %v8428_v14  ;;  %7966 = vmatpush3.bf16.msra.mxu1 %v8465_v53 }
  0x62   :  { %7967 = vmatprep.subr.bf16.mxu1 %v10775_v50 }
  0x64   :  { %380 = vmatpush1.bf16.msra.mxu0 %v8426_v15 }
  0x65   :  { %381 = vmatprep.subr.bf16.mxu0 %v8431_v16  ;;  %7968 = vmatpush3.bf16.msra.mxu1 %v8466_v54 }
  0x66   :  { %7969 = vmatprep.subr.bf16.mxu1 %v10775_v50 }
  0x68   :  { %382 = vmatpush1.bf16.msra.mxu0 %v8429_v17 }
  0x69   :  { %383 = vmatprep.subr.bf16.mxu0 %v8434_v18  ;;  %7970 = vmatpush3.bf16.msra.mxu1 %v8467_v55  ;;  %v9498_v18 = vsub.s32 2, %v9387_v24 }
  0x6a   :  { %7971 = vmatprep.subr.bf16.mxu1 %v10775_v50 }
  0x6c   :  { %384 = vmatpush1.bf16.msra.mxu0 %v8432_v19  ;;  %v9501_v19 = vrot.slane %v176_v3, %v9498_v18 }
  0x6d   :  { %385 = vmatprep.subr.bf16.mxu0 %v8437_v20  ;;  %7972 = vmatpush3.bf16.msra.mxu1 %v8468_v56 }
  0x6e   :  { %7973 = vmatprep.subr.bf16.mxu1 %v10775_v50  ;;  %10798 = vst [vmem:[#allocation14_spill] sm:$0xff] %v9501_v19 }
  0x70   :  { %386 = vmatpush1.bf16.msra.mxu0 %v8435_v21 }
  0x71   :  { %412 = vmatprep.subr.bf16.mxu0 %v9384_v22  ;;  %7974 = vmatpush3.bf16.msra.mxu1 %v8469_v57 }
  0x72   :  { %7979 = vmatprep.subr.bf16.mxu1 %v10775_v50 }
 0x126   :  { %v169_v28 = vpop.f32.mrb[0].mxu0 }
 0x127   :  { %v170_v29 = vadd.f32 %v169_v28, %v104_v27  ;;  %v9399_v30 = vpop.f32.mrb[1].mxu0  ;;  %v468_v27 = vsub.s32 3, %v9387_v24 }
 0x128   :  { %v173_v31 = vpop.f32.mrb[2].mxu0 }
 0x129   :  { %v178_v33 = vpack.c.bf16 %v170_v29, %v170_v29  ;;  %v174_v34 = vpop.f32.mrb[3].mxu0  ;;  %v9505_v31 = vrot.slane %v176_v3, %v468_v27  ;;  %v9543_v27 = vld [vmem:[#allocation7 + $0xa8] ss:$12 sps:$4 sm:$0xff]  }
 0x12a   :  { %v108_v34 = vrot.slane %v9395_v26, %v9487_v4  ;;  %v8477_v26 = vld [vmem:[#allocation7 + $0x20] ss:$12 sps:$4 sm:$0xff]  }
 0x12b   :  { %404 = vmatmul.mubr.bf16.vlgmr.msra.gmra.mrb[4].mxu0 %v178_v33 }
 0x12c   :  { %413 = vmatpush1.bf16.msra.mxu0 %v9401_v32  ;;  %444 = vmatprep.mubr.bf16.mxu0 %v10773_v0  ;;  %v172_v52 = vadd.f32 %v9399_v30, %v108_v34  ;;  %v8481_v30 = vld [vmem:[#allocation7 + $0x38] ss:$12 sps:$4 sm:$0xff]  }
 0x12d   :  { %414 = vmatprep.subr.bf16.mxu0 %v9403_v35 }
 0x130   :  { %415 = vmatpush1.bf16.msra.mxu0 %v9406_v36 }
 0x131   :  { %416 = vmatprep.subr.bf16.mxu0 %v9410_v37 }
 0x134   :  { %417 = vmatpush1.bf16.msra.mxu0 %v9413_v38 }
 0x135   :  { %418 = vmatprep.subr.bf16.mxu0 %v9416_v39 }
 0x138   :  { %419 = vmatpush1.bf16.msra.mxu0 %v9419_v40 }
 0x139   :  { %420 = vmatprep.subr.bf16.mxu0 %v9422_v41 }
 0x13c   :  { %421 = vmatpush1.bf16.msra.mxu0 %v9425_v42 }
 0x13d   :  { %422 = vmatprep.subr.bf16.mxu0 %v9428_v43 }
 0x140   :  { %423 = vmatpush1.bf16.msra.mxu0 %v9431_v44 }
 0x141   :  { %424 = vmatprep.subr.bf16.mxu0 %v9434_v45 }
 0x144   :  { %425 = vmatpush1.bf16.msra.mxu0 %v9437_v46 }
 0x145   :  { %426 = vmatprep.subr.bf16.mxu0 %v9440_v47 }
 0x148   :  { %427 = vmatpush1.bf16.msra.mxu0 %v9443_v48 }
 0x149   :  { %784 = vmatprep.subr.bf16.mxu0 %v9461_v59 }
 0x14b   :  { %445 = vmatmul.mubr.bf16.vlgmr.msra.gmra.mrb[8].mxu0 %v178_v33 }
 0x14c   :  { %816 = vmatprep.mubr.bf16.mxu0 %v10773_v0  ;;  %785 = vmatpush1.bf16.msra.mxu0 %v9459_v58 }
 0x14d   :  { %786 = vmatprep.subr.bf16.mxu0 %v9463_v60 }
 0x150   :  { %787 = vmatpush1.bf16.msra.mxu0 %v9467_v61 }
 0x151   :  { %788 = vmatprep.subr.bf16.mxu0 %v9470_v62 }
 0x154   :  { %789 = vmatpush1.bf16.msra.mxu0 %v9473_v63 }
 0x155   :  { %790 = vmatprep.subr.bf16.mxu0 %v9476_v1 }
 0x158   :  { %791 = vmatpush1.bf16.msra.mxu0 %v9479_v2 }
 0x1fe   :  { %v405_v6 = vpop.f32.mrb[4].mxu0 }
 0x1ff   :  { %v407_v8 = vpop.f32.mrb[5].mxu0  ;;  %v474_v12 = vadd.f32 %v9493_v7, %v405_v6 }
 0x200   :  { %v475_v9 = vadd.f32 %v9490_v5, %v407_v8  ;;  %v409_v10 = vpop.f32.mrb[6].mxu0  ;;  %v8473_v8 = vld [vmem:[#allocation7 + $0x8] ss:$12 sps:$4 sm:$0xff]  }
 0x201   :  { %v410_v11 = vpop.f32.mrb[7].mxu0  ;;  %v8485_v10 = vld [vmem:[#allocation7 + $0x50] ss:$12 sps:$4 sm:$0xff]  }
 0x202   :  { %8947 = vtanh.f32 %v475_v9  ;;  %v9520_v11 = vld [vmem:[#allocation7 + $0x64] ss:$12 sps:$4 sm:$0xff]  }
 0x203   :  { %8949 = vtanh.f32 %v474_v12  ;;  %v9522_v12 = vld [vmem:[#allocation7 + $0x60] ss:$12 sps:$4 sm:$0xff]   ;;  %792 = vmatprep.subr.bf16.mxu0 %v9520_v11 }
 0x204   :  { %793 = vmatpush1.bf16.msra.mxu0 %v9522_v12 }
 0x20c   :  { %v8948_v13 = vpop.eup %8947 }
 0x20d   :  { %v480_v14 = vmul.f32 0.5, %v8948_v13  ;;  %v8950_v16 = vpop.eup %8949  ;;  %v8489_v13 = vld [vmem:[#allocation7 + $0x68] ss:$12 sps:$4 sm:$0xff]  }
 0x20f   :  { %v481_v15 = vadd.f32 0.5, %v480_v14  ;;  %v9526_v14 = vld [vmem:[#allocation7 + $0x7c] ss:$12 sps:$4 sm:$0xff]  }
 0x210   :  { %794 = vmatprep.subr.bf16.mxu0 %v9526_v14 }
 0x211   :  { %v489_v17 = vmul.f32 %v8950_v16, %v481_v15  ;;  %v9529_v15 = vld [vmem:[#allocation7 + $0x78] ss:$12 sps:$4 sm:$0xff]   ;;  %v8493_v16 = vld [vmem:[#allocation7 + $0x80] ss:$12 sps:$4 sm:$0xff]  }
 0x212   :  { %795 = vmatpush1.bf16.msra.mxu0 %v9529_v15 }
 0x21e   :  { %v446_v20 = vpop.f32.mrb[8].mxu0 }
 0x21f   :  { %v476_v21 = vadd.f32 %v9501_v19, %v446_v20  ;;  %v448_v23 = vpop.f32.mrb[9].mxu0  ;;  %v9536_v20 = vld [vmem:[#allocation7 + $0x90] ss:$12 sps:$4 sm:$0xff]  }
 0x220   :  { %v450_v28 = vpop.f32.mrb[10].mxu0  ;;  %v477_v33 = vadd.f32 %v9505_v31, %v448_v23  ;;  %v9540_v23 = vld [vmem:[#allocation7 + $0xac] ss:$12 sps:$4 sm:$0xff]  }
 0x221   :  { %8951 = vtanh.f32 %v476_v21  ;;  %v451_v29 = vpop.f32.mrb[11].mxu0  ;;  %v8497_v21 = vld [vmem:[#allocation7 + $0x98] ss:$12 sps:$4 sm:$0xff]   ;;  %v8501_v28 = vld [vmem:[#allocation7 + $0xb0] ss:$12 sps:$4 sm:$0xff]  }
 0x222   :  { %8953 = vtanh.f32 %v477_v33  ;;  %v9127_v29 = vld [vmem:[#allocation3 + $0x4] ss:$16 sps:$4 sm:$0xff]   ;;  %v9551_v33 = vld [vmem:[%s10766_s5] ss:$0 sm:$0xff] }
 0x22b   :  { %v8952_v49 = vpop.eup %8951 }
 0x22c   :  { %v483_v51 = vmul.f32 0.5, %v8952_v49  ;;  %v8954_v24 = vpop.eup %8953 }
 0x22d   :  { %v486_v56 = vmul.f32 0.5, %v8954_v24 }
 0x22e   :  { %v484_v53 = vadd.f32 0.5, %v483_v51 }
 0x22f   :  { %v487_v57 = vadd.f32 0.5, %v486_v56  ;;  %v9128_v56 = vld [vmem:[#allocation3] ss:$16 sps:$4 sm:$0xff]  }
 0x230   :  { %v488_v54 = vmul.f32 %v484_v53, %v172_v52 }
 0x232   :  { %v9511_v55 = vadd.f32 %v489_v17, %v488_v54  ;;  %v9533_v17 = vld [vmem:[#allocation7 + $0x94] ss:$12 sps:$4 sm:$0xff]  }
 0x233   :  { %796 = vmatprep.subr.bf16.mxu0 %v9533_v17 }
 0x234   :  { %8955 = vtanh.f32 %v9511_v55  ;;  %797 = vmatpush1.bf16.msra.mxu0 %v9536_v20 }
 0x235   :  { %798 = vmatprep.subr.bf16.mxu0 %v9540_v23 }
 0x238   :  { %799 = vmatpush1.bf16.msra.mxu0 %v9543_v27 }
 0x239   :  { %1067 = vmatprep.subr.bf16.mxu0 %v9127_v29 }
 0x23e   :  { %v8956_v3 = vpop.eup %8955 }
 0x23f   :  { %v492_v6 = vmul.f32 %v8956_v3, %v487_v57  ;;  %v9130_v57 = vld [vmem:[#allocation3 + $0x20] ss:$16 sps:$4 sm:$0xff]   ;;  %v9131_v3 = vld [vmem:[#allocation3 + $0x44] ss:$16 sps:$4 sm:$0xff]  }
 0x241   :  { %v493_v9 = vpack.c.bf16 %v492_v6, %v492_v6  ;;  %v9132_v6 = vld [vmem:[#allocation3 + $0x40] ss:$16 sps:$4 sm:$0xff]  }
 0x243   :  { %7976 = vmatmul.mubr.bf16.vlgmr.msra.gmra.mrb[0].mxu1 %v493_v9 }
 0x244   :  { %7980 = vmatpush3.bf16.msra.mxu1 %v8473_v8  ;;  %7995 = vmatprep.mubr.msk.bf16.mxu1 %vm9252_vm1, %v10775_v50  ;;  %v9135_v8 = vld [vmem:[#allocation3 + $0x84] ss:$16 sps:$4 sm:$0xff]  }
 0x245   :  { %7981 = vmatprep.subr.bf16.mxu1 %v10775_v50 }
 0x248   :  { %7982 = vmatpush3.bf16.msra.mxu1 %v8477_v26 }
 0x249   :  { %7983 = vmatprep.subr.bf16.mxu1 %v10775_v50 }
 0x24c   :  { %7984 = vmatpush3.bf16.msra.mxu1 %v8481_v30 }
 0x24d   :  { %7985 = vmatprep.subr.bf16.mxu1 %v10775_v50 }
 0x250   :  { %7986 = vmatpush3.bf16.msra.mxu1 %v8485_v10 }
 0x251   :  { %7987 = vmatprep.subr.bf16.mxu1 %v10775_v50 }
 0x254   :  { %7988 = vmatpush3.bf16.msra.mxu1 %v8489_v13 }
 0x255   :  { %7989 = vmatprep.subr.bf16.mxu1 %v10775_v50 }
 0x258   :  { %7990 = vmatpush3.bf16.msra.mxu1 %v8493_v16 }
 0x259   :  { %7991 = vmatprep.subr.bf16.mxu1 %v10775_v50 }
 0x25c   :  { %7992 = vmatpush3.bf16.msra.mxu1 %v8497_v21 }
 0x25d   :  { %7993 = vmatprep.subr.bf16.mxu1 %v10775_v50 }
 0x260   :  { %7994 = vmatpush3.bf16.msra.mxu1 %v8501_v28 }
 0x261   :  { %1108 = vmatprep.subr.bf16.mxu1 %v9384_v22  ;;  %v9129_v22 = vld [vmem:[#allocation3 + $0x24] ss:$16 sps:$4 sm:$0xff]  }
 0x316   :  { %v592_v34 = vpop.f32.mrb[0].mxu1 }
 0x317   :  { %v604_v49 = vadd.f32 %v9551_v33, %v592_v34  ;;  %v7977_v51 = vpop.f32.mrb[1].mxu1 }
 0x318   :  { %v595_v52 = vpop.f32.mrb[2].mxu1 }
 0x319   :  { %8957 = vtanh.f32 %v604_v49  ;;  %v7978_v53 = vpop.f32.mrb[3].mxu1 }
 0x323   :  { %v8958_v54 = vpop.eup %8957 }
 0x324   :  { %v606_v24 = vpack.c.bf16 %v8958_v54, %v8958_v54 }
 0x326   :  { %817 = vmatmul.mubr.bf16.vlgmr.msra.gmra.mrb[12].mxu0 %v606_v24  ;;  %7996 = vmatmul.mubr.bf16.vlgmr.msra.gmra.mrb[4].mxu1 %v606_v24 }
 0x327   :  { %1068 = vmatpush1.bf16.msra.mxu0 %v9128_v56  ;;  %1109 = vmatpush1.bf16.msra.mxu1 %v9401_v32  ;;  %v9133_v32 = vld [vmem:[#allocation3 + $0x64] ss:$16 sps:$4 sm:$0xff]  }
 0x328   :  { %1069 = vmatprep.subr.bf16.mxu0 %v9129_v22  ;;  %1110 = vmatprep.subr.bf16.mxu1 %v9403_v35  ;;  %v9134_v35 = vld [vmem:[#allocation3 + $0x60] ss:$16 sps:$4 sm:$0xff]  }
 0x329   :  { %1099 = vmatprep.mubr.bf16.mxu0 %v10773_v0  ;;  %1140 = vmatprep.mubr.bf16.mxu1 %v10773_v0 }
 0x32b   :  { %1070 = vmatpush1.bf16.msra.mxu0 %v9130_v57  ;;  %1111 = vmatpush1.bf16.msra.mxu1 %v9406_v36  ;;  %v9136_v36 = vld [vmem:[#allocation3 + $0x80] ss:$16 sps:$4 sm:$0xff]  }
 0x32c   :  { %1071 = vmatprep.subr.bf16.mxu0 %v9131_v3  ;;  %1112 = vmatprep.subr.bf16.mxu1 %v9410_v37  ;;  %v9137_v37 = vld [vmem:[#allocation3 + $0xa4] ss:$16 sps:$4 sm:$0xff]  }
 0x32f   :  { %1072 = vmatpush1.bf16.msra.mxu0 %v9132_v6  ;;  %1113 = vmatpush1.bf16.msra.mxu1 %v9413_v38  ;;  %v9138_v38 = vld [vmem:[#allocation3 + $0xa0] ss:$16 sps:$4 sm:$0xff]  }
 0x330   :  { %1073 = vmatprep.subr.bf16.mxu0 %v9133_v32  ;;  %1114 = vmatprep.subr.bf16.mxu1 %v9416_v39  ;;  %v9139_v39 = vld [vmem:[#allocation3 + $0xc4] ss:$16 sps:$4 sm:$0xff]  }
 0x333   :  { %1074 = vmatpush1.bf16.msra.mxu0 %v9134_v35  ;;  %1115 = vmatpush1.bf16.msra.mxu1 %v9419_v40  ;;  %v9140_v40 = vld [vmem:[#allocation3 + $0xc0] ss:$16 sps:$4 sm:$0xff]  }
 0x334   :  { %1075 = vmatprep.subr.bf16.mxu0 %v9135_v8  ;;  %1116 = vmatprep.subr.bf16.mxu1 %v9422_v41  ;;  %v9141_v41 = vld [vmem:[#allocation3 + $0xe4] ss:$16 sps:$4 sm:$0xff]  }
 0x337   :  { %1076 = vmatpush1.bf16.msra.mxu0 %v9136_v36  ;;  %1117 = vmatpush1.bf16.msra.mxu1 %v9425_v42  ;;  %v9142_v42 = vld [vmem:[#allocation3 + $0xe0] ss:$16 sps:$4 sm:$0xff]  }
 0x338   :  { %1077 = vmatprep.subr.bf16.mxu0 %v9137_v37  ;;  %1118 = vmatprep.subr.bf16.mxu1 %v9428_v43  ;;  %v639_v43 = vld [vmem:[%s10769_s8] sm:$0x7] }
 0x33b   :  { %1078 = vmatpush1.bf16.msra.mxu0 %v9138_v38  ;;  %1119 = vmatpush1.bf16.msra.mxu1 %v9431_v44  ;;  %v644_v44 = vrot.slane %v639_v43, %v9390_v25 }
 0x33c   :  { %1079 = vmatprep.subr.bf16.mxu0 %v9139_v39  ;;  %1120 = vmatprep.subr.bf16.mxu1 %v9434_v45  ;;  %v652_v45 = vrot.slane %v639_v43, %v9498_v18 }
 0x33f   :  { %1080 = vmatpush1.bf16.msra.mxu0 %v9140_v40  ;;  %1121 = vmatpush1.bf16.msra.mxu1 %v9437_v46  ;;  %v648_v46 = vrot.slane %v639_v43, %v9487_v4 }
 0x340   :  { %1081 = vmatprep.subr.bf16.mxu0 %v9141_v41  ;;  %1122 = vmatprep.subr.bf16.mxu1 %v9440_v47 }
 0x343   :  { %1082 = vmatpush1.bf16.msra.mxu0 %v9142_v42  ;;  %1123 = vmatpush1.bf16.msra.mxu1 %v9443_v48 }
 0x344   :  { %7999 = vmatprep.subr.bf16.mxu0 %v10775_v50  ;;  %1453 = vmatprep.subr.bf16.mxu1 %v9461_v59 }
 0x3f9   :  { %v818_v9 = vpop.f32.mrb[12].mxu0  ;;  %v859_v47 = vpop.f32.mrb[4].mxu1 }
 0x3fa   :  { %v819_v26 = vadd.f32 %v818_v9, %v644_v44  ;;  %v860_v30 = vadd.f32 %v859_v47, %v652_v45  ;;  %v820_v10 = vpop.f32.mrb[13].mxu0  ;;  %v7997_v48 = vpop.f32.mrb[5].mxu1 }
 0x3fb   :  { %v821_v13 = vadd.f32 %v820_v10, %v648_v46  ;;  %v822_v16 = vpop.f32.mrb[14].mxu0  ;;  %v862_v21 = vpop.f32.mrb[6].mxu1  ;;  %v8511_v10 = vld [vmem:[#allocation7 + $0x20] ss:$12 sps:$4 sm:$0xff]   ;;  %v8513_v48 = vld [vmem:[#allocation7 + $0x50] ss:$12 sps:$4 sm:$0xff]  }
 0x3fc   :  { %8959 = vtanh.f32 %v819_v26  ;;  %v823_v59 = vpop.f32.mrb[15].mxu0  ;;  %v7998_v28 = vpop.f32.mrb[7].mxu1  ;;  %v8510_v26 = vld [vmem:[#allocation7 + $0x8] ss:$12 sps:$4 sm:$0xff]   ;;  %v8515_v16 = vld [vmem:[#allocation7 + $0x80] ss:$12 sps:$4 sm:$0xff]  }
 0x3fd   :  { %8961 = vtanh.f32 %v860_v30  ;;  %v8516_v21 = vld [vmem:[#allocation7 + $0x98] ss:$12 sps:$4 sm:$0xff]   ;;  %v8517_v59 = vld [vmem:[#allocation7 + $0xb0] ss:$12 sps:$4 sm:$0xff]  }
 0x3fe   :  { %8963 = vtanh.f32 %v821_v13  ;;  %v8514_v13 = vld [vmem:[#allocation7 + $0x68] ss:$12 sps:$4 sm:$0xff]  }
 0x3ff   :  { %v9622_v28 = vld [vmem:[#allocation3 + $0x4] ss:$16 sps:$4 sm:$0xff]  }
 0x406   :  { %v8960_v29 = vpop.eup %8959 }
 0x407   :  { %v8962_v34 = vpop.eup %8961 }
 0x408   :  { %v8964_v49 = vpop.eup %8963  ;;  %v868_v51 = vmul.f32 0.5, %v8962_v34 }
 0x409   :  { %v870_v52 = vsub.f32 %v8964_v49, %v8960_v29 }
 0x40a   :  { %v869_v53 = vadd.f32 0.5, %v868_v51 }
 0x40c   :  { %v871_v54 = vmul.f32 %v870_v52, %v869_v53 }
 0x40e   :  { %v872_v24 = vadd.f32 %v8960_v29, %v871_v54  ;;  %v9624_v29 = vld [vmem:[#allocation3 + $0xc] ss:$16 sps:$4 sm:$0xff]  }
 0x410   :  { %v873_v56 = vpack.c.bf16 %v872_v24, %v872_v24  ;;  %v9629_v24 = vld [vmem:[#allocation3] ss:$16 sps:$4 sm:$0xff]  }
 0x412   :  { %874 = vst [vmem:[#allocation2] sm:$0xf] %v873_v56  ;;  %1100 = vmatmul.mubr.bf16.vlgmr.msra.gmra.mrb[16].mxu0 %v873_v56  ;;  %1141 = vmatmul.mubr.bf16.vlgmr.msra.gmra.mrb[8].mxu1 %v873_v56  ;;  %v9631_v56 = vld [vmem:[#allocation3 + $0x8] ss:$16 sps:$4 sm:$0xff]  }
 0x413   :  { %8015 = vmatprep.mubr.msk.bf16.mxu0 %vm9252_vm1, %v10775_v50  ;;  %1454 = vmatpush1.bf16.msra.mxu1 %v9459_v58  ;;  %v8502_v58 = vld [vmem:[#allocation5] sm:$0xff]  }
 0x414   :  { %1455 = vmatprep.subr.bf16.mxu1 %v9463_v60  ;;  %1485 = vmatprep.mubr.bf16.mxu1 %v10773_v0  ;;  %v8503_v60 = vld [vmem:[#allocation5 + $0x8] sm:$0xff]  }
 0x415   :  { %8000 = vmatpush3.bf16.msra.mxu0 %v8502_v58 }
 0x416   :  { %8001 = vmatprep.subr.bf16.mxu0 %v10775_v50 }
 0x417   :  { %1456 = vmatpush1.bf16.msra.mxu1 %v9467_v61  ;;  %v8504_v61 = vld [vmem:[#allocation5 + $0x10] sm:$0xff]  }
 0x418   :  { %1457 = vmatprep.subr.bf16.mxu1 %v9470_v62  ;;  %v8505_v62 = vld [vmem:[#allocation5 + $0x18] sm:$0xff]  }
 0x419   :  { %8002 = vmatpush3.bf16.msra.mxu0 %v8503_v60  ;;  %v9633_v60 = vld [vmem:[#allocation3 + $0x24] ss:$16 sps:$4 sm:$0xff]  }
 0x41a   :  { %8003 = vmatprep.subr.bf16.mxu0 %v10775_v50 }
 0x41b   :  { %1458 = vmatpush1.bf16.msra.mxu1 %v9473_v63  ;;  %v8506_v63 = vld [vmem:[#allocation5 + $0x20] sm:$0xff]  }
 0x41c   :  { %1459 = vmatprep.subr.bf16.mxu1 %v9476_v1  ;;  %v8507_v1 = vld [vmem:[#allocation5 + $0x28] sm:$0xff]  }
 0x41d   :  { %8004 = vmatpush3.bf16.msra.mxu0 %v8504_v61  ;;  %v9635_v61 = vld [vmem:[#allocation3 + $0x2c] ss:$16 sps:$4 sm:$0xff]  }
 0x41e   :  { %8005 = vmatprep.subr.bf16.mxu0 %v10775_v50 }
 0x41f   :  { %1460 = vmatpush1.bf16.msra.mxu1 %v9479_v2  ;;  %v8508_v2 = vld [vmem:[#allocation5 + $0x30] sm:$0xff]  }
 0x420   :  { %1461 = vmatprep.subr.bf16.mxu1 %v9520_v11  ;;  %v8509_v11 = vld [vmem:[#allocation5 + $0x38] sm:$0xff]  }
 0x421   :  { %8006 = vmatpush3.bf16.msra.mxu0 %v8505_v62  ;;  %v9639_v62 = vld [vmem:[#allocation3 + $0x20] ss:$16 sps:$4 sm:$0xff]  }
 0x422   :  { %8007 = vmatprep.subr.bf16.mxu0 %v10775_v50 }
 0x423   :  { %1462 = vmatpush1.bf16.msra.mxu1 %v9522_v12 }
 0x424   :  { %1463 = vmatprep.subr.bf16.mxu1 %v9526_v14 }
 0x425   :  { %8008 = vmatpush3.bf16.msra.mxu0 %v8506_v63  ;;  %v9641_v63 = vld [vmem:[#allocation3 + $0x28] ss:$16 sps:$4 sm:$0xff]  }
 0x426   :  { %8009 = vmatprep.subr.bf16.mxu0 %v10775_v50 }
 0x427   :  { %1464 = vmatpush1.bf16.msra.mxu1 %v9529_v15 }
 0x428   :  { %1465 = vmatprep.subr.bf16.mxu1 %v9533_v17 }
 0x429   :  { %8010 = vmatpush3.bf16.msra.mxu0 %v8507_v1  ;;  %v9649_v1 = vld [vmem:[#allocation3 + $0x44] ss:$16 sps:$4 sm:$0xff]  }
 0x42a   :  { %8011 = vmatprep.subr.bf16.mxu0 %v10775_v50 }
 0x42b   :  { %1466 = vmatpush1.bf16.msra.mxu1 %v9536_v20 }
 0x42c   :  { %1467 = vmatprep.subr.bf16.mxu1 %v9540_v23 }
 0x42d   :  { %8012 = vmatpush3.bf16.msra.mxu0 %v8508_v2  ;;  %v9651_v2 = vld [vmem:[#allocation3 + $0x4c] ss:$16 sps:$4 sm:$0xff]  }
 0x42e   :  { %8013 = vmatprep.subr.bf16.mxu0 %v10775_v50 }
 0x42f   :  { %1468 = vmatpush1.bf16.msra.mxu1 %v9543_v27 }
 0x430   :  { %1737 = vmatprep.subr.bf16.mxu1 %v9622_v28 }
 0x431   :  { %8014 = vmatpush3.bf16.msra.mxu0 %v8509_v11  ;;  %v9653_v11 = vld [vmem:[#allocation3 + $0x40] ss:$16 sps:$4 sm:$0xff]  }
 0x432   :  { %8019 = vmatprep.subr.bf16.mxu0 %v10775_v50 }
 0x4e5   :  { %v1101_v12 = vpop.f32.mrb[16].mxu0  ;;  %v1142_v14 = vpop.f32.mrb[8].mxu1 }
 0x4e6   :  { %v1151_v15 = vadd.f32 %v1142_v14, %v9501_v19  ;;  %v1103_v17 = vpop.f32.mrb[17].mxu0  ;;  %v1144_v20 = vpop.f32.mrb[9].mxu1  ;;  %v1149_v6 = vadd.f32 %v1101_v12, %v9493_v7  ;;  %v9655_v12 = vld [vmem:[#allocation3 + $0x48] ss:$16 sps:$4 sm:$0xff]   ;;  %v9661_v14 = vld [vmem:[#allocation3 + $0x64] ss:$16 sps:$4 sm:$0xff]  }
 0x4e7   :  { %v1150_v23 = vadd.f32 %v1103_v17, %v9490_v5  ;;  %v1105_v27 = vpop.f32.mrb[18].mxu0  ;;  %v1146_v22 = vpop.f32.mrb[10].mxu1  ;;  %v1152_v32 = vadd.f32 %v1144_v20, %v9505_v31  ;;  %v9665_v17 = vld [vmem:[#allocation3 + $0x60] ss:$16 sps:$4 sm:$0xff]   ;;  %v9667_v20 = vld [vmem:[#allocation3 + $0x68] ss:$16 sps:$4 sm:$0xff]  }
 0x4e8   :  { %v1106_v57 = vpop.f32.mrb[19].mxu0  ;;  %v1147_v3 = vpop.f32.mrb[11].mxu1  ;;  %8965 = vtanh.f32 %v1151_v15  ;;  %v9663_v15 = vld [vmem:[#allocation3 + $0x6c] ss:$16 sps:$4 sm:$0xff]   ;;  %v9677_v22 = vld [vmem:[#allocation3 + $0x80] ss:$16 sps:$4 sm:$0xff]  }
 0x4e9   :  { %8967 = vtanh.f32 %v1150_v23  ;;  %v9673_v23 = vld [vmem:[#allocation3 + $0x84] ss:$16 sps:$4 sm:$0xff]   ;;  %v9675_v27 = vld [vmem:[#allocation3 + $0x8c] ss:$16 sps:$4 sm:$0xff]   ;;  %v9679_v57 = vld [vmem:[#allocation3 + $0x88] ss:$16 sps:$4 sm:$0xff]  }
 0x4ea   :  { %8969 = vtanh.f32 %v1149_v6  ;;  %v9685_v3 = vld [vmem:[#allocation3 + $0xa4] ss:$16 sps:$4 sm:$0xff]   ;;  %v9687_v6 = vld [vmem:[#allocation3 + $0xac] ss:$16 sps:$4 sm:$0xff]  }
 0x4eb   :  { %8971 = vtanh.f32 %v1152_v32  ;;  %v9689_v32 = vld [vmem:[#allocation3 + $0xa0] ss:$16 sps:$4 sm:$0xff]  }
 0x4f2   :  { %v8966_v35 = vpop.eup %8965 }
 0x4f3   :  { %v8968_v8 = vpop.eup %8967  ;;  %v1158_v36 = vmul.f32 0.5, %v8966_v35  ;;  %v9691_v35 = vld [vmem:[#allocation3 + $0xa8] ss:$16 sps:$4 sm:$0xff]  }
 0x4f4   :  { %v1155_v37 = vmul.f32 0.5, %v8968_v8  ;;  %v8970_v40 = vpop.eup %8969  ;;  %v9697_v8 = vld [vmem:[#allocation3 + $0xc4] ss:$16 sps:$4 sm:$0xff]  }
 0x4f5   :  { %v1159_v38 = vadd.f32 0.5, %v1158_v36  ;;  %v8972_v44 = vpop.eup %8971  ;;  %v9699_v36 = vld [vmem:[#allocation3 + $0xcc] ss:$16 sps:$4 sm:$0xff]  }
 0x4f6   :  { %v1156_v39 = vadd.f32 0.5, %v1155_v37  ;;  %v1161_v45 = vmul.f32 0.5, %v8972_v44  ;;  %v9701_v37 = vld [vmem:[#allocation3 + $0xc0] ss:$16 sps:$4 sm:$0xff]   ;;  %v1308_v44 = vld [vmem:[%s10769_s8] sm:$0x7] }
 0x4f7   :  { %v1163_v41 = vmul.f32 %v1159_v38, %v9511_v55  ;;  %v8512_v55 = vld [vmem:[#allocation7 + $0x38] ss:$12 sps:$4 sm:$0xff]  }
 0x4f8   :  { %v1164_v42 = vmul.f32 %v8970_v40, %v1156_v39  ;;  %v1162_v46 = vadd.f32 0.5, %v1161_v45  ;;  %v9703_v38 = vld [vmem:[#allocation3 + $0xc8] ss:$16 sps:$4 sm:$0xff]   ;;  %v9707_v39 = vld [vmem:[#allocation3 + $0xe4] ss:$16 sps:$4 sm:$0xff]   ;;  %v1313_v45 = vrot.slane %v1308_v44, %v9390_v25 }
 0x4f9   :  { %v9711_v40 = vld [vmem:[#allocation3 + $0xe0] ss:$16 sps:$4 sm:$0xff]  }
 0x4fa   :  { %v9610_v43 = vadd.f32 %v1164_v42, %v1163_v41  ;;  %v9713_v41 = vld [vmem:[#allocation3 + $0xe8] ss:$16 sps:$4 sm:$0xff]   ;;  %v9715_v42 = vld [vmem:[#allocation3 + $0xec] ss:$16 sps:$4 sm:$0xff]  }
 0x4fc   :  { %8973 = vtanh.f32 %v9610_v43 }
 0x506   :  { %v8974_v9 = vpop.eup %8973 }
 0x507   :  { %v1167_v47 = vmul.f32 %v8974_v9, %v1162_v46  ;;  %v1321_v46 = vrot.slane %v1308_v44, %v9498_v18  ;;  %v1317_v9 = vrot.slane %v1308_v44, %v9487_v4 }
 0x509   :  { %v1168_v30 = vpack.c.bf16 %v1167_v47, %v1167_v47 }
 0x50b   :  { %8016 = vmatmul.mubr.bf16.vlgmr.msra.gmra.mrb[20].mxu0 %v1168_v30 }
 0x50c   :  { %8020 = vmatpush3.bf16.msra.mxu0 %v8510_v26  ;;  %8035 = vmatprep.mubr.msk.bf16.mxu0 %vm9252_vm1, %v10775_v50 }
 0x50d   :  { %8021 = vmatprep.subr.bf16.mxu0 %v10775_v50 }
 0x510   :  { %8022 = vmatpush3.bf16.msra.mxu0 %v8511_v10 }
 0x511   :  { %8023 = vmatprep.subr.bf16.mxu0 %v10775_v50 }
 0x514   :  { %8024 = vmatpush3.bf16.msra.mxu0 %v8512_v55 }
 0x515   :  { %8025 = vmatprep.subr.bf16.mxu0 %v10775_v50 }
 0x518   :  { %8026 = vmatpush3.bf16.msra.mxu0 %v8513_v48 }
 0x519   :  { %8027 = vmatprep.subr.bf16.mxu0 %v10775_v50 }
 0x51c   :  { %8028 = vmatpush3.bf16.msra.mxu0 %v8514_v13 }
 0x51d   :  { %8029 = vmatprep.subr.bf16.mxu0 %v10775_v50 }
 0x520   :  { %8030 = vmatpush3.bf16.msra.mxu0 %v8515_v16 }
 0x521   :  { %8031 = vmatprep.subr.bf16.mxu0 %v10775_v50 }
 0x524   :  { %8032 = vmatpush3.bf16.msra.mxu0 %v8516_v21 }
 0x525   :  { %8033 = vmatprep.subr.bf16.mxu0 %v10775_v50 }
 0x528   :  { %8034 = vmatpush3.bf16.msra.mxu0 %v8517_v59 }
 0x529   :  { %1778 = vmatprep.subr.bf16.mxu0 %v9624_v29 }
 0x5de   :  { %v1267_v34 = vpop.f32.mrb[20].mxu0 }
 0x5df   :  { %v1273_v49 = vadd.f32 %v9551_v33, %v1267_v34  ;;  %v8017_v51 = vpop.f32.mrb[21].mxu0 }
 0x5e0   :  { %v1270_v52 = vpop.f32.mrb[22].mxu0 }
 0x5e1   :  { %8975 = vtanh.f32 %v1273_v49  ;;  %v8018_v53 = vpop.f32.mrb[23].mxu0 }
 0x5eb   :  { %v8976_v54 = vpop.eup %8975 }
 0x5ec   :  { %v1275_v58 = vpack.c.bf16 %v8976_v54, %v8976_v54 }
 0x5ee   :  { %1486 = vmatmul.mubr.bf16.vlgmr.msra.gmra.mrb[12].mxu1 %v1275_v58  ;;  %8036 = vmatmul.mubr.bf16.vlgmr.msra.gmra.mrb[24].mxu0 %v1275_v58 }
 0x5ef   :  { %1738 = vmatpush1.bf16.msra.mxu1 %v9629_v24  ;;  %1779 = vmatpush1.bf16.msra.mxu0 %v9631_v56 }
 0x5f0   :  { %1739 = vmatprep.subr.bf16.mxu1 %v9633_v60  ;;  %1780 = vmatprep.subr.bf16.mxu0 %v9635_v61 }
 0x5f1   :  { %1769 = vmatprep.mubr.bf16.mxu1 %v10773_v0  ;;  %1810 = vmatprep.mubr.bf16.mxu0 %v10773_v0 }
 0x5f3   :  { %1740 = vmatpush1.bf16.msra.mxu1 %v9639_v62  ;;  %1781 = vmatpush1.bf16.msra.mxu0 %v9641_v63 }
 0x5f4   :  { %1741 = vmatprep.subr.bf16.mxu1 %v9649_v1  ;;  %1782 = vmatprep.subr.bf16.mxu0 %v9651_v2 }
 0x5f7   :  { %1742 = vmatpush1.bf16.msra.mxu1 %v9653_v11  ;;  %1783 = vmatpush1.bf16.msra.mxu0 %v9655_v12 }
 0x5f8   :  { %1743 = vmatprep.subr.bf16.mxu1 %v9661_v14  ;;  %1784 = vmatprep.subr.bf16.mxu0 %v9663_v15 }
 0x5fb   :  { %1744 = vmatpush1.bf16.msra.mxu1 %v9665_v17  ;;  %1785 = vmatpush1.bf16.msra.mxu0 %v9667_v20 }
 0x5fc   :  { %1745 = vmatprep.subr.bf16.mxu1 %v9673_v23  ;;  %1786 = vmatprep.subr.bf16.mxu0 %v9675_v27 }
 0x5ff   :  { %1746 = vmatpush1.bf16.msra.mxu1 %v9677_v22  ;;  %1787 = vmatpush1.bf16.msra.mxu0 %v9679_v57 }
 0x600   :  { %1747 = vmatprep.subr.bf16.mxu1 %v9685_v3  ;;  %1788 = vmatprep.subr.bf16.mxu0 %v9687_v6 }
 0x603   :  { %1748 = vmatpush1.bf16.msra.mxu1 %v9689_v32  ;;  %1789 = vmatpush1.bf16.msra.mxu0 %v9691_v35 }
 0x604   :  { %1749 = vmatprep.subr.bf16.mxu1 %v9697_v8  ;;  %1790 = vmatprep.subr.bf16.mxu0 %v9699_v36 }
 0x607   :  { %1750 = vmatpush1.bf16.msra.mxu1 %v9701_v37  ;;  %1791 = vmatpush1.bf16.msra.mxu0 %v9703_v38 }
 0x608   :  { %1751 = vmatprep.subr.bf16.mxu1 %v9707_v39  ;;  %1792 = vmatprep.subr.bf16.mxu0 %v9715_v42 }
 0x60b   :  { %1752 = vmatpush1.bf16.msra.mxu1 %v9711_v40  ;;  %1793 = vmatpush1.bf16.msra.mxu0 %v9713_v41 }
 0x60c   :  { %8039 = vmatprep.subr.bf16.mxu1 %v10775_v50 }
 0x6c1   :  { %v1487_v47 = vpop.f32.mrb[12].mxu1  ;;  %v1528_v26 = vpop.f32.mrb[24].mxu0 }
 0x6c2   :  { %v1488_v30 = vadd.f32 %v1487_v47, %v1313_v45  ;;  %v1529_v10 = vadd.f32 %v1528_v26, %v1321_v46  ;;  %v1489_v55 = vpop.f32.mrb[13].mxu1  ;;  %v8037_v48 = vpop.f32.mrb[25].mxu0  ;;  %v10799_v46 = vmov 0   ;;  %v8567_v47 = vld [vmem:[#allocation5 + $0x8] sm:$0xff]   ;;  %v8568_v26 = vld [vmem:[#allocation5 + $0x10] sm:$0xff]  }
 0x6c3   :  { %v1490_v13 = vadd.f32 %v1489_v55, %v1317_v9  ;;  %v1491_v16 = vpop.f32.mrb[14].mxu1  ;;  %v1531_v21 = vpop.f32.mrb[26].mxu0  ;;  %v8566_v9 = vld [vmem:[#allocation5] sm:$0xff]   ;;  %v8572_v55 = vld [vmem:[#allocation5 + $0x30] sm:$0xff]   ;;  %v8573_v48 = vld [vmem:[#allocation5 + $0x38] sm:$0xff]  }
 0x6c4   :  { %8977 = vtanh.f32 %v1488_v30  ;;  %v1492_v59 = vpop.f32.mrb[15].mxu1  ;;  %v8038_v34 = vpop.f32.mrb[27].mxu0  ;;  %v8570_v30 = vld [vmem:[#allocation5 + $0x20] sm:$0xff]   ;;  %v9743_v21 = vld [vmem:[#allocation7 + $0x1c] ss:$12 sps:$4 sm:$0xff]  }
 0x6c5   :  { %8979 = vtanh.f32 %v1529_v10  ;;  %v8571_v10 = vld [vmem:[#allocation5 + $0x28] sm:$0xff]   ;;  %v9741_v16 = vld [vmem:[#allocation7 + $0x4] ss:$12 sps:$4 sm:$0xff]   ;;  %v9750_v34 = vld [vmem:[#allocation7 + $0x34] ss:$12 sps:$4 sm:$0xff]  }
 0x6c6   :  { %8981 = vtanh.f32 %v1490_v13  ;;  %v9739_v13 = vld [vmem:[#allocation7] ss:$12 sps:$4 sm:$0xff]   ;;  %2123 = vmatprep.subr.bf16.mxu0 %v9741_v16  ;;  %v9747_v59 = vld [vmem:[#allocation7 + $0x18] ss:$12 sps:$4 sm:$0xff]  }
 0x6ce   :  { %v8978_v49 = vpop.eup %8977 }
 0x6cf   :  { %v8980_v51 = vpop.eup %8979 }
 0x6d0   :  { %v8982_v52 = vpop.eup %8981  ;;  %v1537_v53 = vmul.f32 0.5, %v8980_v51  ;;  %v9756_v51 = vld [vmem:[#allocation7 + $0x4c] ss:$12 sps:$4 sm:$0xff]  }
 0x6d1   :  { %v1539_v54 = vsub.f32 %v8982_v52, %v8978_v49  ;;  %10801 = vst [vmem:[#allocation16_spill] sm:$0xff] %v9756_v51  ;;  %v9759_v52 = vld [vmem:[#allocation7 + $0x48] ss:$12 sps:$4 sm:$0xff]  }
 0x6d2   :  { %v1538_v58 = vadd.f32 0.5, %v1537_v53  ;;  %10802 = vst [vmem:[#allocation17_spill] sm:$0xff] %v9759_v52 }
 0x6d4   :  { %v1540_v44 = vmul.f32 %v1539_v54, %v1538_v58 }
 0x6d6   :  { %v1541_v0 = vadd.f32 %v8978_v49, %v1540_v44  ;;  %v9753_v49 = vld [vmem:[#allocation7 + $0x30] ss:$12 sps:$4 sm:$0xff]  }
 0x6d7   :  { %10800 = vst [vmem:[#allocation15_spill] sm:$0xff] %v9753_v49 }
 0x6d8   :  { %v1542_v45 = vpack.c.bf16 %v1541_v0, %v1541_v0  ;;  %v8569_v0 = vld [vmem:[#allocation5 + $0x18] sm:$0xff]  }
 0x6da   :  { %1544 = vst [vmem:[#allocation2 + $0x4] sm:$0xf] %v1542_v45  ;;  %1770 = vmatmul.mubr.bf16.vlgmr.msra.gmra.mrb[16].mxu1 %v1542_v45  ;;  %1811 = vmatmul.mubr.bf16.vlgmr.msra.gmra.mrb[28].mxu0 %v1542_v45 }
 0x6db   :  { %8055 = vmatprep.mubr.msk.bf16.mxu1 %vm9252_vm1, %v10775_v50  ;;  %2155 = vmatprep.mubr.bf16.mxu0 %v10799_v46 }
 0x6dc   :  { %8040 = vmatpush3.bf16.msra.mxu1 %v8566_v9  ;;  %2124 = vmatpush1.bf16.msra.mxu0 %v9739_v13 }
 0x6dd   :  { %8041 = vmatprep.subr.bf16.mxu1 %v10775_v50  ;;  %2125 = vmatprep.subr.bf16.mxu0 %v9743_v21 }
 0x6e0   :  { %8042 = vmatpush3.bf16.msra.mxu1 %v8567_v47  ;;  %2126 = vmatpush1.bf16.msra.mxu0 %v9747_v59 }
 0x6e1   :  { %8043 = vmatprep.subr.bf16.mxu1 %v10775_v50  ;;  %2127 = vmatprep.subr.bf16.mxu0 %v9750_v34 }
 0x6e4   :  { %8044 = vmatpush3.bf16.msra.mxu1 %v8568_v26  ;;  %2128 = vmatpush1.bf16.msra.mxu0 %v9753_v49 }
 0x6e5   :  { %8045 = vmatprep.subr.bf16.mxu1 %v10775_v50  ;;  %2129 = vmatprep.subr.bf16.mxu0 %v9756_v51 }
 0x6e8   :  { %8046 = vmatpush3.bf16.msra.mxu1 %v8569_v0  ;;  %2130 = vmatpush1.bf16.msra.mxu0 %v9759_v52 }
 0x6e9   :  { %8047 = vmatprep.subr.bf16.mxu1 %v10775_v50 }
 0x6ec   :  { %8048 = vmatpush3.bf16.msra.mxu1 %v8570_v30 }
 0x6ed   :  { %8049 = vmatprep.subr.bf16.mxu1 %v10775_v50 }
 0x6f0   :  { %8050 = vmatpush3.bf16.msra.mxu1 %v8571_v10 }
 0x6f1   :  { %8051 = vmatprep.subr.bf16.mxu1 %v10775_v50 }
 0x6f4   :  { %8052 = vmatpush3.bf16.msra.mxu1 %v8572_v55 }
 0x6f5   :  { %8053 = vmatprep.subr.bf16.mxu1 %v10775_v50 }
 0x6f8   :  { %8054 = vmatpush3.bf16.msra.mxu1 %v8573_v48 }
 0x6f9   :  { %8059 = vmatprep.subr.bf16.mxu1 %v10775_v50 }
 0x7ad   :  { %v1771_v53 = vpop.f32.mrb[16].mxu1  ;;  %v1812_v54 = vpop.f32.mrb[28].mxu0 }
 0x7ae   :  { %v1821_v58 = vadd.f32 %v1812_v54, %v9501_v19  ;;  %v1773_v44 = vpop.f32.mrb[17].mxu1  ;;  %v1814_v45 = vpop.f32.mrb[29].mxu0  ;;  %v1819_v10 = vadd.f32 %v1771_v53, %v9493_v7 }
 0x7af   :  { %v1820_v9 = vadd.f32 %v1773_v44, %v9490_v5  ;;  %v1775_v47 = vpop.f32.mrb[18].mxu1  ;;  %v1816_v26 = vpop.f32.mrb[30].mxu0  ;;  %v1822_v55 = vadd.f32 %v1814_v45, %v9505_v31 }
 0x7b0   :  { %v1776_v0 = vpop.f32.mrb[19].mxu1  ;;  %v1817_v30 = vpop.f32.mrb[31].mxu0  ;;  %8983 = vtanh.f32 %v1821_v58 }
 0x7b1   :  { %8985 = vtanh.f32 %v1820_v9  ;;  %v8577_v30 = vld [vmem:[#allocation7 + $0x8] ss:$12 sps:$4 sm:$0xff]  }
 0x7b2   :  { %8987 = vtanh.f32 %v1819_v10 }
 0x7b3   :  { %8989 = vtanh.f32 %v1822_v55  ;;  %v8593_v55 = vld [vmem:[#allocation7 + $0x68] ss:$12 sps:$4 sm:$0xff]  }
 0x7ba   :  { %v8984_v48 = vpop.eup %8983 }
 0x7bb   :  { %v8986_v50 = vpop.eup %8985  ;;  %v1828_v52 = vmul.f32 0.5, %v8984_v48  ;;  %v9783_v48 = vld [vmem:[#allocation7 + $0x7c] ss:$12 sps:$4 sm:$0xff]  }
 0x7bc   :  { %v1825_v51 = vmul.f32 0.5, %v8986_v50  ;;  %v8988_v49 = vpop.eup %8987  ;;  %v8581_v50 = vld [vmem:[#allocation7 + $0x20] ss:$12 sps:$4 sm:$0xff]  }
 0x7bd   :  { %v1829_v54 = vadd.f32 0.5, %v1828_v52  ;;  %v8990_v53 = vpop.eup %8989  ;;  %v10803_v52 = vmov 0.0  }
 0x7be   :  { %v1826_v19 = vadd.f32 0.5, %v1825_v51  ;;  %v1831_v58 = vmul.f32 0.5, %v8990_v53  ;;  %v9779_v51 = vld [vmem:[#allocation7 + $0x60] ss:$12 sps:$4 sm:$0xff]   ;;  %v9793_v53 = vld [vmem:[#allocation7 + $0x90] ss:$12 sps:$4 sm:$0xff]  }
 0x7bf   :  { %v1833_v44 = vmul.f32 %v1829_v54, %v9610_v43  ;;  %v8589_v43 = vld [vmem:[#allocation7 + $0x50] ss:$12 sps:$4 sm:$0xff]   ;;  %v9786_v54 = vld [vmem:[#allocation7 + $0x78] ss:$12 sps:$4 sm:$0xff]  }
 0x7c0   :  { %v1834_v47 = vmul.f32 %v8988_v49, %v1826_v19  ;;  %v1832_v9 = vadd.f32 0.5, %v1831_v58  ;;  %v8585_v19 = vld [vmem:[#allocation7 + $0x38] ss:$12 sps:$4 sm:$0xff]  }
 0x7c1   :  { %v9777_v49 = vld [vmem:[#allocation7 + $0x64] ss:$12 sps:$4 sm:$0xff]  }
 0x7c2   :  { %v9768_v26 = vadd.f32 %v1834_v47, %v1833_v44  ;;  %2131 = vmatprep.subr.bf16.mxu0 %v9777_v49  ;;  %v8597_v44 = vld [vmem:[#allocation7 + $0x80] ss:$12 sps:$4 sm:$0xff]   ;;  %v8601_v58 = vld [vmem:[#allocation7 + $0x98] ss:$12 sps:$4 sm:$0xff]  }
 0x7c3   :  { %2132 = vmatpush1.bf16.msra.mxu0 %v9779_v51  ;;  %v9790_v47 = vld [vmem:[#allocation7 + $0x94] ss:$12 sps:$4 sm:$0xff]  }
 0x7c4   :  { %8991 = vtanh.f32 %v9768_v26  ;;  %2133 = vmatprep.subr.bf16.mxu0 %v9783_v48 }
 0x7c7   :  { %2134 = vmatpush1.bf16.msra.mxu0 %v9786_v54 }
 0x7c8   :  { %2135 = vmatprep.subr.bf16.mxu0 %v9790_v47 }
 0x7cb   :  { %2136 = vmatpush1.bf16.msra.mxu0 %v9793_v53 }
 0x7ce   :  { %v8992_v0 = vpop.eup %8991 }
 0x7cf   :  { %v1837_v45 = vmul.f32 %v8992_v0, %v1832_v9  ;;  %v9797_v9 = vld [vmem:[#allocation7 + $0xac] ss:$12 sps:$4 sm:$0xff]   ;;  %v9800_v0 = vld [vmem:[#allocation7 + $0xa8] ss:$12 sps:$4 sm:$0xff]  }
 0x7d0   :  { %2137 = vmatprep.subr.bf16.mxu0 %v9797_v9 }
 0x7d1   :  { %v1838_v10 = vpack.c.bf16 %v1837_v45, %v1837_v45  ;;  %v8605_v45 = vld [vmem:[#allocation7 + $0xb0] ss:$12 sps:$4 sm:$0xff]   ;;  %2138 = vmatpush1.bf16.msra.mxu0 %v9800_v0 }
 0x7d2   :  { %2407 = vmatprep.subr.bf16.mxu0 %v9622_v28 }
 0x7d3   :  { %8056 = vmatmul.mubr.bf16.vlgmr.msra.gmra.mrb[20].mxu1 %v1838_v10 }
 0x7d4   :  { %8060 = vmatpush3.bf16.msra.mxu1 %v8577_v30  ;;  %8075 = vmatprep.mubr.msk.bf16.mxu1 %vm9252_vm1, %v10803_v52 }
 0x7d5   :  { %8061 = vmatprep.subr.bf16.mxu1 %v10803_v52 }
 0x7d8   :  { %8062 = vmatpush3.bf16.msra.mxu1 %v8581_v50 }
 0x7d9   :  { %8063 = vmatprep.subr.bf16.mxu1 %v10803_v52 }
 0x7dc   :  { %8064 = vmatpush3.bf16.msra.mxu1 %v8585_v19 }
 0x7dd   :  { %8065 = vmatprep.subr.bf16.mxu1 %v10803_v52 }
 0x7e0   :  { %8066 = vmatpush3.bf16.msra.mxu1 %v8589_v43 }
 0x7e1   :  { %8067 = vmatprep.subr.bf16.mxu1 %v10803_v52 }
 0x7e4   :  { %8068 = vmatpush3.bf16.msra.mxu1 %v8593_v55 }
 0x7e5   :  { %8069 = vmatprep.subr.bf16.mxu1 %v10803_v52 }
 0x7e8   :  { %8070 = vmatpush3.bf16.msra.mxu1 %v8597_v44 }
 0x7e9   :  { %8071 = vmatprep.subr.bf16.mxu1 %v10803_v52 }
 0x7ec   :  { %8072 = vmatpush3.bf16.msra.mxu1 %v8601_v58 }
 0x7ed   :  { %8073 = vmatprep.subr.bf16.mxu1 %v10803_v52 }
 0x7f0   :  { %8074 = vmatpush3.bf16.msra.mxu1 %v8605_v45 }
 0x7f1   :  { %2448 = vmatprep.subr.bf16.mxu1 %v9624_v29 }
 0x8a6   :  { %v1937_v30 = vpop.f32.mrb[20].mxu1 }
 0x8a7   :  { %v1943_v10 = vadd.f32 %v9551_v33, %v1937_v30  ;;  %v8057_v50 = vpop.f32.mrb[21].mxu1  ;;  %v1978_v33 = vld [vmem:[%s10769_s8] sm:$0x7] }
 0x8a8   :  { %v1940_v19 = vpop.f32.mrb[22].mxu1  ;;  %v1983_v28 = vrot.slane %v1978_v33, %v9390_v25  ;;  %v1991_v29 = vrot.slane %v1978_v33, %v9498_v18 }
 0x8a9   :  { %8993 = vtanh.f32 %v1943_v10  ;;  %v8058_v43 = vpop.f32.mrb[23].mxu1 }
 0x8b3   :  { %v8994_v55 = vpop.eup %8993 }
 0x8b4   :  { %v1945_v44 = vpack.c.bf16 %v8994_v55, %v8994_v55 }
 0x8b6   :  { %2156 = vmatmul.mubr.bf16.vlgmr.msra.gmra.mrb[32].mxu0 %v1945_v44  ;;  %8076 = vmatmul.mubr.bf16.vlgmr.msra.gmra.mrb[24].mxu1 %v1945_v44 }
 0x8b7   :  { %2408 = vmatpush1.bf16.msra.mxu0 %v9629_v24  ;;  %2449 = vmatpush1.bf16.msra.mxu1 %v9631_v56  ;;  %v1987_v24 = vrot.slane %v1978_v33, %v9487_v4 }
 0x8b8   :  { %2409 = vmatprep.subr.bf16.mxu0 %v9633_v60  ;;  %2450 = vmatprep.subr.bf16.mxu1 %v9635_v61 }
 0x8b9   :  { %2439 = vmatprep.mubr.bf16.mxu0 %v10799_v46  ;;  %2480 = vmatprep.mubr.bf16.mxu1 %v10799_v46 }
 0x8bb   :  { %2410 = vmatpush1.bf16.msra.mxu0 %v9639_v62  ;;  %2451 = vmatpush1.bf16.msra.mxu1 %v9641_v63 }
 0x8bc   :  { %2411 = vmatprep.subr.bf16.mxu0 %v9649_v1  ;;  %2452 = vmatprep.subr.bf16.mxu1 %v9651_v2 }
 0x8bf   :  { %2412 = vmatpush1.bf16.msra.mxu0 %v9653_v11  ;;  %2453 = vmatpush1.bf16.msra.mxu1 %v9655_v12 }
 0x8c0   :  { %2413 = vmatprep.subr.bf16.mxu0 %v9661_v14  ;;  %2454 = vmatprep.subr.bf16.mxu1 %v9663_v15 }
 0x8c3   :  { %2414 = vmatpush1.bf16.msra.mxu0 %v9665_v17  ;;  %2455 = vmatpush1.bf16.msra.mxu1 %v9667_v20 }
 0x8c4   :  { %2415 = vmatprep.subr.bf16.mxu0 %v9673_v23  ;;  %2456 = vmatprep.subr.bf16.mxu1 %v9675_v27 }
 0x8c7   :  { %2416 = vmatpush1.bf16.msra.mxu0 %v9677_v22  ;;  %2457 = vmatpush1.bf16.msra.mxu1 %v9679_v57 }
 0x8c8   :  { %2417 = vmatprep.subr.bf16.mxu0 %v9685_v3  ;;  %2458 = vmatprep.subr.bf16.mxu1 %v9687_v6 }
 0x8cb   :  { %2418 = vmatpush1.bf16.msra.mxu0 %v9689_v32  ;;  %2459 = vmatpush1.bf16.msra.mxu1 %v9691_v35  ;;  %v10804_v35 = vld [vmem:[#allocation15_spill] sm:$0xff] }
 0x8cc   :  { %2419 = vmatprep.subr.bf16.mxu0 %v9697_v8  ;;  %2460 = vmatprep.subr.bf16.mxu1 %v9699_v36  ;;  %v10805_v8 = vld [vmem:[#allocation16_spill] sm:$0xff]  ;;  %v10806_v36 = vld [vmem:[#allocation17_spill] sm:$0xff] }
 0x8cf   :  { %2420 = vmatpush1.bf16.msra.mxu0 %v9701_v37  ;;  %2461 = vmatpush1.bf16.msra.mxu1 %v9703_v38  ;;  %v8606_v37 = vld [vmem:[#allocation5] sm:$0xff]   ;;  %v8607_v38 = vld [vmem:[#allocation5 + $0x8] sm:$0xff]  }
 0x8d0   :  { %2421 = vmatprep.subr.bf16.mxu0 %v9707_v39  ;;  %2462 = vmatprep.subr.bf16.mxu1 %v9715_v42  ;;  %v8608_v39 = vld [vmem:[#allocation5 + $0x10] sm:$0xff]   ;;  %v8611_v42 = vld [vmem:[#allocation5 + $0x28] sm:$0xff]  }
 0x8d3   :  { %2422 = vmatpush1.bf16.msra.mxu0 %v9711_v40  ;;  %2463 = vmatpush1.bf16.msra.mxu1 %v9713_v41  ;;  %v8609_v40 = vld [vmem:[#allocation5 + $0x18] sm:$0xff]   ;;  %v8610_v41 = vld [vmem:[#allocation5 + $0x20] sm:$0xff]  }
 0x8d4   :  { %8079 = vmatprep.subr.bf16.mxu0 %v10803_v52  ;;  %2793 = vmatprep.subr.bf16.mxu1 %v9741_v16  ;;  %v8613_v16 = vld [vmem:[#allocation5 + $0x38] sm:$0xff]  }
 0x989   :  { %v2157_v56 = vpop.f32.mrb[32].mxu0  ;;  %v2198_v60 = vpop.f32.mrb[24].mxu1 }
 0x98a   :  { %v2158_v61 = vadd.f32 %v2157_v56, %v1983_v28  ;;  %v2199_v62 = vadd.f32 %v2198_v60, %v1991_v29  ;;  %v2159_v63 = vpop.f32.mrb[33].mxu0  ;;  %v8077_v1 = vpop.f32.mrb[25].mxu1 }
 0x98b   :  { %v2160_v2 = vadd.f32 %v2159_v63, %v1987_v24  ;;  %v2161_v11 = vpop.f32.mrb[34].mxu0  ;;  %v2201_v12 = vpop.f32.mrb[26].mxu1  ;;  %v8614_v63 = vld [vmem:[#allocation7 + $0x8] ss:$12 sps:$4 sm:$0xff]  }
 0x98c   :  { %8995 = vtanh.f32 %v2158_v61  ;;  %v2162_v14 = vpop.f32.mrb[35].mxu0  ;;  %v8078_v15 = vpop.f32.mrb[27].mxu1  ;;  %v8617_v11 = vld [vmem:[#allocation7 + $0x50] ss:$12 sps:$4 sm:$0xff]   ;;  %v8618_v12 = vld [vmem:[#allocation7 + $0x68] ss:$12 sps:$4 sm:$0xff]  }
 0x98d   :  { %8997 = vtanh.f32 %v2199_v62  ;;  %v8619_v14 = vld [vmem:[#allocation7 + $0x80] ss:$12 sps:$4 sm:$0xff]   ;;  %v8620_v15 = vld [vmem:[#allocation7 + $0x98] ss:$12 sps:$4 sm:$0xff]  }
 0x98e   :  { %8999 = vtanh.f32 %v2160_v2  ;;  %v8615_v2 = vld [vmem:[#allocation7 + $0x20] ss:$12 sps:$4 sm:$0xff]  }
 0x996   :  { %v8996_v17 = vpop.eup %8995 }
 0x997   :  { %v8998_v20 = vpop.eup %8997 }
 0x998   :  { %v9000_v23 = vpop.eup %8999  ;;  %v2207_v27 = vmul.f32 0.5, %v8998_v20  ;;  %v9890_v20 = vld [vmem:[#allocation3 + $0x4] ss:$16 sps:$4 sm:$0xff]  }
 0x999   :  { %v2209_v22 = vsub.f32 %v9000_v23, %v8996_v17  ;;  %v9892_v23 = vld [vmem:[#allocation3 + $0xc] ss:$16 sps:$4 sm:$0xff]  }
 0x99a   :  { %v2208_v57 = vadd.f32 0.5, %v2207_v27 }
 0x99c   :  { %v2210_v3 = vmul.f32 %v2209_v22, %v2208_v57  ;;  %v9899_v22 = vld [vmem:[%s10766_s5] ss:$0 sm:$0xff] }
 0x99e   :  { %v2211_v6 = vadd.f32 %v8996_v17, %v2210_v3  ;;  %v8621_v17 = vld [vmem:[#allocation7 + $0xb0] ss:$12 sps:$4 sm:$0xff]  }
 0x9a0   :  { %v2212_v32 = vpack.c.bf16 %v2211_v6, %v2211_v6 }
 0x9a2   :  { %2214 = vst [vmem:[#allocation2 + $0x8] sm:$0xf] %v2212_v32  ;;  %2440 = vmatmul.mubr.bf16.vlgmr.msra.gmra.mrb[36].mxu0 %v2212_v32  ;;  %2481 = vmatmul.mubr.bf16.vlgmr.msra.gmra.mrb[28].mxu1 %v2212_v32 }
 0x9a3   :  { %8095 = vmatprep.mubr.msk.bf16.mxu0 %vm9252_vm1, %v10803_v52  ;;  %2794 = vmatpush1.bf16.msra.mxu1 %v9739_v13  ;;  %v8612_v13 = vld [vmem:[#allocation5 + $0x30] sm:$0xff]  }
 0x9a4   :  { %2795 = vmatprep.subr.bf16.mxu1 %v9743_v21  ;;  %2825 = vmatprep.mubr.bf16.mxu1 %v10799_v46 }
 0x9a5   :  { %8080 = vmatpush3.bf16.msra.mxu0 %v8606_v37 }
 0x9a6   :  { %8081 = vmatprep.subr.bf16.mxu0 %v10803_v52 }
 0x9a7   :  { %2796 = vmatpush1.bf16.msra.mxu1 %v9747_v59 }
 0x9a8   :  { %2797 = vmatprep.subr.bf16.mxu1 %v9750_v34  ;;  %v10807_v34 = vld [vmem:[#allocation14_spill] sm:$0xff] }
 0x9a9   :  { %8082 = vmatpush3.bf16.msra.mxu0 %v8607_v38  ;;  %v9906_v38 = vld [vmem:[#allocation3 + $0x24] ss:$16 sps:$4 sm:$0xff]  }
 0x9aa   :  { %8083 = vmatprep.subr.bf16.mxu0 %v10803_v52 }
 0x9ab   :  { %2798 = vmatpush1.bf16.msra.mxu1 %v10804_v35 }
 0x9ac   :  { %2799 = vmatprep.subr.bf16.mxu1 %v10805_v8  ;;  %v9902_v8 = vld [vmem:[#allocation3] ss:$16 sps:$4 sm:$0xff]  }
 0x9ad   :  { %8084 = vmatpush3.bf16.msra.mxu0 %v8608_v39  ;;  %v9908_v39 = vld [vmem:[#allocation3 + $0x2c] ss:$16 sps:$4 sm:$0xff]  }
 0x9ae   :  { %8085 = vmatprep.subr.bf16.mxu0 %v10803_v52 }
 0x9af   :  { %2800 = vmatpush1.bf16.msra.mxu1 %v10806_v36  ;;  %v9904_v36 = vld [vmem:[#allocation3 + $0x8] ss:$16 sps:$4 sm:$0xff]  }
 0x9b0   :  { %2801 = vmatprep.subr.bf16.mxu1 %v9777_v49 }
 0x9b1   :  { %8086 = vmatpush3.bf16.msra.mxu0 %v8609_v40  ;;  %v9912_v40 = vld [vmem:[#allocation3 + $0x20] ss:$16 sps:$4 sm:$0xff]  }
 0x9b2   :  { %8087 = vmatprep.subr.bf16.mxu0 %v10803_v52 }
 0x9b3   :  { %2802 = vmatpush1.bf16.msra.mxu1 %v9779_v51 }
 0x9b4   :  { %2803 = vmatprep.subr.bf16.mxu1 %v9783_v48 }
 0x9b5   :  { %8088 = vmatpush3.bf16.msra.mxu0 %v8610_v41  ;;  %v9914_v41 = vld [vmem:[#allocation3 + $0x28] ss:$16 sps:$4 sm:$0xff]  }
 0x9b6   :  { %8089 = vmatprep.subr.bf16.mxu0 %v10803_v52 }
 0x9b7   :  { %2804 = vmatpush1.bf16.msra.mxu1 %v9786_v54 }
 0x9b8   :  { %2805 = vmatprep.subr.bf16.mxu1 %v9790_v47 }
 0x9b9   :  { %8090 = vmatpush3.bf16.msra.mxu0 %v8611_v42  ;;  %v9922_v42 = vld [vmem:[#allocation3 + $0x44] ss:$16 sps:$4 sm:$0xff]  }
 0x9ba   :  { %8091 = vmatprep.subr.bf16.mxu0 %v10803_v52 }
 0x9bb   :  { %2806 = vmatpush1.bf16.msra.mxu1 %v9793_v53 }
 0x9bc   :  { %2807 = vmatprep.subr.bf16.mxu1 %v9797_v9 }
 0x9bd   :  { %8092 = vmatpush3.bf16.msra.mxu0 %v8612_v13  ;;  %v9924_v13 = vld [vmem:[#allocation3 + $0x4c] ss:$16 sps:$4 sm:$0xff]  }
 0x9be   :  { %8093 = vmatprep.subr.bf16.mxu0 %v10803_v52 }
 0x9bf   :  { %2808 = vmatpush1.bf16.msra.mxu1 %v9800_v0 }
 0x9c0   :  { %3077 = vmatprep.subr.bf16.mxu1 %v9890_v20 }
 0x9c1   :  { %8094 = vmatpush3.bf16.msra.mxu0 %v8613_v16  ;;  %v9926_v16 = vld [vmem:[#allocation3 + $0x40] ss:$16 sps:$4 sm:$0xff]  }
 0x9c2   :  { %8099 = vmatprep.subr.bf16.mxu0 %v10803_v52 }
 0xa75   :  { %v2441_v21 = vpop.f32.mrb[36].mxu0  ;;  %v2482_v59 = vpop.f32.mrb[28].mxu1 }
 0xa76   :  { %v2491_v49 = vadd.f32 %v2482_v59, %v10807_v34  ;;  %v2443_v51 = vpop.f32.mrb[37].mxu0  ;;  %v2484_v48 = vpop.f32.mrb[29].mxu1  ;;  %v2489_v0 = vadd.f32 %v2441_v21, %v9493_v7  ;;  %v9928_v21 = vld [vmem:[#allocation3 + $0x48] ss:$16 sps:$4 sm:$0xff]   ;;  %v9934_v59 = vld [vmem:[#allocation3 + $0x64] ss:$16 sps:$4 sm:$0xff]  }
 0xa77   :  { %v2490_v54 = vadd.f32 %v2443_v51, %v9490_v5  ;;  %v2445_v47 = vpop.f32.mrb[38].mxu0  ;;  %v2486_v53 = vpop.f32.mrb[30].mxu1  ;;  %v2492_v45 = vadd.f32 %v2484_v48, %v9505_v31  ;;  %v9938_v51 = vld [vmem:[#allocation3 + $0x60] ss:$16 sps:$4 sm:$0xff]   ;;  %v9940_v48 = vld [vmem:[#allocation3 + $0x68] ss:$16 sps:$4 sm:$0xff]  }
 0xa78   :  { %v2446_v58 = vpop.f32.mrb[39].mxu0  ;;  %v2487_v9 = vpop.f32.mrb[31].mxu1  ;;  %9001 = vtanh.f32 %v2491_v49  ;;  %v9936_v49 = vld [vmem:[#allocation3 + $0x6c] ss:$16 sps:$4 sm:$0xff]   ;;  %v9950_v53 = vld [vmem:[#allocation3 + $0x80] ss:$16 sps:$4 sm:$0xff]  }
 0xa79   :  { %9003 = vtanh.f32 %v2490_v54  ;;  %v9946_v54 = vld [vmem:[#allocation3 + $0x84] ss:$16 sps:$4 sm:$0xff]   ;;  %v9948_v47 = vld [vmem:[#allocation3 + $0x8c] ss:$16 sps:$4 sm:$0xff]   ;;  %v9952_v58 = vld [vmem:[#allocation3 + $0x88] ss:$16 sps:$4 sm:$0xff]  }
 0xa7a   :  { %9005 = vtanh.f32 %v2489_v0  ;;  %v9958_v9 = vld [vmem:[#allocation3 + $0xa4] ss:$16 sps:$4 sm:$0xff]   ;;  %v9960_v0 = vld [vmem:[#allocation3 + $0xac] ss:$16 sps:$4 sm:$0xff]  }
 0xa7b   :  { %9007 = vtanh.f32 %v2492_v45  ;;  %v9962_v45 = vld [vmem:[#allocation3 + $0xa0] ss:$16 sps:$4 sm:$0xff]  }
 0xa82   :  { %v9002_v30 = vpop.eup %9001 }
 0xa83   :  { %v9004_v10 = vpop.eup %9003  ;;  %v2498_v50 = vmul.f32 0.5, %v9002_v30  ;;  %v9964_v30 = vld [vmem:[#allocation3 + $0xa8] ss:$16 sps:$4 sm:$0xff]  }
 0xa84   :  { %v2495_v19 = vmul.f32 0.5, %v9004_v10  ;;  %v9006_v44 = vpop.eup %9005  ;;  %v9970_v10 = vld [vmem:[#allocation3 + $0xc4] ss:$16 sps:$4 sm:$0xff]  }
 0xa85   :  { %v2499_v43 = vadd.f32 0.5, %v2498_v50  ;;  %v9008_v24 = vpop.eup %9007  ;;  %v9972_v50 = vld [vmem:[#allocation3 + $0xcc] ss:$16 sps:$4 sm:$0xff]  }
 0xa86   :  { %v2496_v55 = vadd.f32 0.5, %v2495_v19  ;;  %v2501_v56 = vmul.f32 0.5, %v9008_v24  ;;  %v9974_v19 = vld [vmem:[#allocation3 + $0xc0] ss:$16 sps:$4 sm:$0xff]   ;;  %v2648_v24 = vld [vmem:[%s10769_s8] sm:$0x7] }
 0xa87   :  { %v2503_v33 = vmul.f32 %v2499_v43, %v9768_v26  ;;  %v8616_v26 = vld [vmem:[#allocation7 + $0x38] ss:$12 sps:$4 sm:$0xff]  }
 0xa88   :  { %v2504_v28 = vmul.f32 %v9006_v44, %v2496_v55  ;;  %v2502_v60 = vadd.f32 0.5, %v2501_v56  ;;  %v9976_v43 = vld [vmem:[#allocation3 + $0xc8] ss:$16 sps:$4 sm:$0xff]   ;;  %v9980_v55 = vld [vmem:[#allocation3 + $0xe4] ss:$16 sps:$4 sm:$0xff]   ;;  %v2653_v56 = vrot.slane %v2648_v24, %v9390_v25 }
 0xa89   :  { %v9984_v44 = vld [vmem:[#allocation3 + $0xe0] ss:$16 sps:$4 sm:$0xff]  }
 0xa8a   :  { %v9878_v29 = vadd.f32 %v2504_v28, %v2503_v33  ;;  %v9986_v33 = vld [vmem:[#allocation3 + $0xe8] ss:$16 sps:$4 sm:$0xff]   ;;  %v9988_v28 = vld [vmem:[#allocation3 + $0xec] ss:$16 sps:$4 sm:$0xff]  }
 0xa8c   :  { %9009 = vtanh.f32 %v9878_v29 }
 0xa96   :  { %v9010_v61 = vpop.eup %9009 }
 0xa97   :  { %v2507_v62 = vmul.f32 %v9010_v61, %v2502_v60  ;;  %v2661_v60 = vrot.slane %v2648_v24, %v9498_v18  ;;  %v2657_v61 = vrot.slane %v2648_v24, %v9487_v4 }
 0xa99   :  { %v2508_v1 = vpack.c.bf16 %v2507_v62, %v2507_v62 }
 0xa9b   :  { %8096 = vmatmul.mubr.bf16.vlgmr.msra.gmra.mrb[40].mxu0 %v2508_v1 }
 0xa9c   :  { %8100 = vmatpush3.bf16.msra.mxu0 %v8614_v63  ;;  %8115 = vmatprep.mubr.msk.bf16.mxu0 %vm9252_vm1, %v10803_v52 }
 0xa9d   :  { %8101 = vmatprep.subr.bf16.mxu0 %v10803_v52 }
 0xaa0   :  { %8102 = vmatpush3.bf16.msra.mxu0 %v8615_v2 }
 0xaa1   :  { %8103 = vmatprep.subr.bf16.mxu0 %v10803_v52 }
 0xaa4   :  { %8104 = vmatpush3.bf16.msra.mxu0 %v8616_v26 }
 0xaa5   :  { %8105 = vmatprep.subr.bf16.mxu0 %v10803_v52 }
 0xaa8   :  { %8106 = vmatpush3.bf16.msra.mxu0 %v8617_v11 }
 0xaa9   :  { %8107 = vmatprep.subr.bf16.mxu0 %v10803_v52 }
 0xaac   :  { %8108 = vmatpush3.bf16.msra.mxu0 %v8618_v12 }
 0xaad   :  { %8109 = vmatprep.subr.bf16.mxu0 %v10803_v52 }
 0xab0   :  { %8110 = vmatpush3.bf16.msra.mxu0 %v8619_v14 }
 0xab1   :  { %8111 = vmatprep.subr.bf16.mxu0 %v10803_v52 }
 0xab4   :  { %8112 = vmatpush3.bf16.msra.mxu0 %v8620_v15 }
 0xab5   :  { %8113 = vmatprep.subr.bf16.mxu0 %v10803_v52 }
 0xab8   :  { %8114 = vmatpush3.bf16.msra.mxu0 %v8621_v17 }
 0xab9   :  { %3118 = vmatprep.subr.bf16.mxu0 %v9892_v23 }
 0xb6e   :  { %v2607_v27 = vpop.f32.mrb[40].mxu0 }
 0xb6f   :  { %v2613_v57 = vadd.f32 %v9899_v22, %v2607_v27  ;;  %v8097_v3 = vpop.f32.mrb[41].mxu0 }
 0xb70   :  { %v2610_v6 = vpop.f32.mrb[42].mxu0 }
 0xb71   :  { %9011 = vtanh.f32 %v2613_v57  ;;  %v8098_v32 = vpop.f32.mrb[43].mxu0 }
 0xb7b   :  { %v9012_v35 = vpop.eup %9011 }
 0xb7c   :  { %v2615_v37 = vpack.c.bf16 %v9012_v35, %v9012_v35 }
 0xb7e   :  { %2826 = vmatmul.mubr.bf16.vlgmr.msra.gmra.mrb[32].mxu1 %v2615_v37  ;;  %8116 = vmatmul.mubr.bf16.vlgmr.msra.gmra.mrb[44].mxu0 %v2615_v37 }
 0xb7f   :  { %3078 = vmatpush1.bf16.msra.mxu1 %v9902_v8  ;;  %3119 = vmatpush1.bf16.msra.mxu0 %v9904_v36 }
 0xb80   :  { %3079 = vmatprep.subr.bf16.mxu1 %v9906_v38  ;;  %3120 = vmatprep.subr.bf16.mxu0 %v9908_v39 }
 0xb81   :  { %3109 = vmatprep.mubr.bf16.mxu1 %v10799_v46  ;;  %3150 = vmatprep.mubr.bf16.mxu0 %v10799_v46 }
 0xb83   :  { %3080 = vmatpush1.bf16.msra.mxu1 %v9912_v40  ;;  %3121 = vmatpush1.bf16.msra.mxu0 %v9914_v41 }
 0xb84   :  { %3081 = vmatprep.subr.bf16.mxu1 %v9922_v42  ;;  %3122 = vmatprep.subr.bf16.mxu0 %v9924_v13 }
 0xb87   :  { %3082 = vmatpush1.bf16.msra.mxu1 %v9926_v16  ;;  %3123 = vmatpush1.bf16.msra.mxu0 %v9928_v21 }
 0xb88   :  { %3083 = vmatprep.subr.bf16.mxu1 %v9934_v59  ;;  %3124 = vmatprep.subr.bf16.mxu0 %v9936_v49 }
 0xb8b   :  { %3084 = vmatpush1.bf16.msra.mxu1 %v9938_v51  ;;  %3125 = vmatpush1.bf16.msra.mxu0 %v9940_v48 }
 0xb8c   :  { %3085 = vmatprep.subr.bf16.mxu1 %v9946_v54  ;;  %3126 = vmatprep.subr.bf16.mxu0 %v9948_v47 }
 0xb8f   :  { %3086 = vmatpush1.bf16.msra.mxu1 %v9950_v53  ;;  %3127 = vmatpush1.bf16.msra.mxu0 %v9952_v58 }
 0xb90   :  { %3087 = vmatprep.subr.bf16.mxu1 %v9958_v9  ;;  %3128 = vmatprep.subr.bf16.mxu0 %v9960_v0 }
 0xb93   :  { %3088 = vmatpush1.bf16.msra.mxu1 %v9962_v45  ;;  %3129 = vmatpush1.bf16.msra.mxu0 %v9964_v30 }
 0xb94   :  { %3089 = vmatprep.subr.bf16.mxu1 %v9970_v10  ;;  %3130 = vmatprep.subr.bf16.mxu0 %v9972_v50 }
 0xb97   :  { %3090 = vmatpush1.bf16.msra.mxu1 %v9974_v19  ;;  %3131 = vmatpush1.bf16.msra.mxu0 %v9976_v43 }
 0xb98   :  { %3091 = vmatprep.subr.bf16.mxu1 %v9980_v55  ;;  %3132 = vmatprep.subr.bf16.mxu0 %v9988_v28 }
 0xb9b   :  { %3092 = vmatpush1.bf16.msra.mxu1 %v9984_v44  ;;  %3133 = vmatpush1.bf16.msra.mxu0 %v9986_v33 }
 0xb9c   :  { %8119 = vmatprep.subr.bf16.mxu1 %v10803_v52 }
 0xc51   :  { %v2827_v62 = vpop.f32.mrb[32].mxu1  ;;  %v2868_v63 = vpop.f32.mrb[44].mxu0 }
 0xc52   :  { %v2828_v1 = vadd.f32 %v2827_v62, %v2653_v56  ;;  %v2869_v2 = vadd.f32 %v2868_v63, %v2661_v60  ;;  %v2829_v26 = vpop.f32.mrb[33].mxu1  ;;  %v8117_v11 = vpop.f32.mrb[45].mxu0  ;;  %v8670_v60 = vld [vmem:[#allocation5] sm:$0xff]   ;;  %v8672_v62 = vld [vmem:[#allocation5 + $0x10] sm:$0xff]  }
 0xc53   :  { %v2830_v12 = vadd.f32 %v2829_v26, %v2657_v61  ;;  %v2831_v14 = vpop.f32.mrb[34].mxu1  ;;  %v2871_v15 = vpop.f32.mrb[46].mxu0  ;;  %v8671_v61 = vld [vmem:[#allocation5 + $0x8] sm:$0xff]   ;;  %v8674_v63 = vld [vmem:[#allocation5 + $0x20] sm:$0xff]   ;;  %v8677_v26 = vld [vmem:[#allocation5 + $0x38] sm:$0xff]  }
 0xc54   :  { %9013 = vtanh.f32 %v2828_v1  ;;  %v2832_v17 = vpop.f32.mrb[35].mxu1  ;;  %v8118_v27 = vpop.f32.mrb[47].mxu0  ;;  %v8675_v1 = vld [vmem:[#allocation5 + $0x28] sm:$0xff]   ;;  %v10020_v15 = vld [vmem:[#allocation7 + $0x18] ss:$12 sps:$4 sm:$0xff]  }
 0xc55   :  { %9015 = vtanh.f32 %v2869_v2  ;;  %v8676_v2 = vld [vmem:[#allocation5 + $0x30] sm:$0xff]   ;;  %v10012_v11 = vld [vmem:[#allocation7] ss:$12 sps:$4 sm:$0xff]   ;;  %v10016_v14 = vld [vmem:[#allocation7 + $0x1c] ss:$12 sps:$4 sm:$0xff]  }
 0xc56   :  { %9017 = vtanh.f32 %v2830_v12  ;;  %v10014_v12 = vld [vmem:[#allocation7 + $0x4] ss:$12 sps:$4 sm:$0xff]   ;;  %v10023_v17 = vld [vmem:[#allocation7 + $0x34] ss:$12 sps:$4 sm:$0xff]  }
 0xc57   :  { %3463 = vmatprep.subr.bf16.mxu0 %v10014_v12  ;;  %v10026_v27 = vld [vmem:[#allocation7 + $0x30] ss:$12 sps:$4 sm:$0xff]  }
 0xc58   :  { %10808 = vst [vmem:[#allocation15_spill] sm:$0xff] %v10026_v27 }
 0xc5e   :  { %v9014_v57 = vpop.eup %9013 }
 0xc5f   :  { %v9016_v3 = vpop.eup %9015 }
 0xc60   :  { %v9018_v6 = vpop.eup %9017  ;;  %v2877_v32 = vmul.f32 0.5, %v9016_v3  ;;  %v10032_v3 = vld [vmem:[#allocation7 + $0x48] ss:$12 sps:$4 sm:$0xff]  }
 0xc61   :  { %v2879_v35 = vsub.f32 %v9018_v6, %v9014_v57  ;;  %10810 = vst [vmem:[#allocation17_spill] sm:$0xff] %v10032_v3 }
 0xc62   :  { %v2878_v37 = vadd.f32 0.5, %v2877_v32 }
 0xc64   :  { %v2880_v24 = vmul.f32 %v2879_v35, %v2878_v37 }
 0xc66   :  { %v2881_v4 = vadd.f32 %v9014_v57, %v2880_v24  ;;  %v10029_v57 = vld [vmem:[#allocation7 + $0x4c] ss:$12 sps:$4 sm:$0xff]  }
 0xc67   :  { %10809 = vst [vmem:[#allocation16_spill] sm:$0xff] %v10029_v57 }
 0xc68   :  { %v2882_v56 = vpack.c.bf16 %v2881_v4, %v2881_v4  ;;  %v8673_v4 = vld [vmem:[#allocation5 + $0x18] sm:$0xff]  }
 0xc6a   :  { %2884 = vst [vmem:[#allocation2 + $0xc] sm:$0xf] %v2882_v56  ;;  %3110 = vmatmul.mubr.bf16.vlgmr.msra.gmra.mrb[36].mxu1 %v2882_v56  ;;  %3151 = vmatmul.mubr.bf16.vlgmr.msra.gmra.mrb[48].mxu0 %v2882_v56 }
 0xc6b   :  { %8135 = vmatprep.mubr.msk.bf16.mxu1 %vm9252_vm1, %v10803_v52  ;;  %3495 = vmatprep.mubr.bf16.mxu0 %v10799_v46 }
 0xc6c   :  { %8120 = vmatpush3.bf16.msra.mxu1 %v8670_v60  ;;  %3464 = vmatpush1.bf16.msra.mxu0 %v10012_v11 }
 0xc6d   :  { %8121 = vmatprep.subr.bf16.mxu1 %v10803_v52  ;;  %3465 = vmatprep.subr.bf16.mxu0 %v10016_v14 }
 0xc70   :  { %8122 = vmatpush3.bf16.msra.mxu1 %v8671_v61  ;;  %3466 = vmatpush1.bf16.msra.mxu0 %v10020_v15 }
 0xc71   :  { %8123 = vmatprep.subr.bf16.mxu1 %v10803_v52  ;;  %3467 = vmatprep.subr.bf16.mxu0 %v10023_v17 }
 0xc74   :  { %8124 = vmatpush3.bf16.msra.mxu1 %v8672_v62  ;;  %3468 = vmatpush1.bf16.msra.mxu0 %v10026_v27 }
 0xc75   :  { %8125 = vmatprep.subr.bf16.mxu1 %v10803_v52  ;;  %3469 = vmatprep.subr.bf16.mxu0 %v10029_v57 }
 0xc78   :  { %8126 = vmatpush3.bf16.msra.mxu1 %v8673_v4  ;;  %3470 = vmatpush1.bf16.msra.mxu0 %v10032_v3 }
 0xc79   :  { %8127 = vmatprep.subr.bf16.mxu1 %v10803_v52 }
 0xc7c   :  { %8128 = vmatpush3.bf16.msra.mxu1 %v8674_v63 }
 0xc7d   :  { %8129 = vmatprep.subr.bf16.mxu1 %v10803_v52 }
 0xc80   :  { %8130 = vmatpush3.bf16.msra.mxu1 %v8675_v1 }
 0xc81   :  { %8131 = vmatprep.subr.bf16.mxu1 %v10803_v52 }
 0xc84   :  { %8132 = vmatpush3.bf16.msra.mxu1 %v8676_v2 }
 0xc85   :  { %8133 = vmatprep.subr.bf16.mxu1 %v10803_v52 }
 0xc88   :  { %8134 = vmatpush3.bf16.msra.mxu1 %v8677_v26 }
 0xc89   :  { %8139 = vmatprep.subr.bf16.mxu1 %v10803_v52 }
 0xd3d   :  { %v3111_v6 = vpop.f32.mrb[36].mxu1  ;;  %v3152_v32 = vpop.f32.mrb[48].mxu0 }
 0xd3e   :  { %v3161_v35 = vadd.f32 %v3152_v32, %v10807_v34  ;;  %v3113_v37 = vpop.f32.mrb[37].mxu1  ;;  %v3154_v24 = vpop.f32.mrb[49].mxu0  ;;  %v3159_v63 = vadd.f32 %v3111_v6, %v9493_v7 }
 0xd3f   :  { %v3160_v56 = vadd.f32 %v3113_v37, %v9490_v5  ;;  %v3115_v60 = vpop.f32.mrb[38].mxu1  ;;  %v3156_v61 = vpop.f32.mrb[50].mxu0  ;;  %v3162_v1 = vadd.f32 %v3154_v24, %v9505_v31 }
 0xd40   :  { %v3116_v62 = vpop.f32.mrb[39].mxu1  ;;  %v3157_v4 = vpop.f32.mrb[51].mxu0  ;;  %9019 = vtanh.f32 %v3161_v35 }
 0xd41   :  { %9021 = vtanh.f32 %v3160_v56  ;;  %v8681_v4 = vld [vmem:[#allocation7 + $0x8] ss:$12 sps:$4 sm:$0xff]  }
 0xd42   :  { %9023 = vtanh.f32 %v3159_v63 }
 0xd43   :  { %9025 = vtanh.f32 %v3162_v1  ;;  %v8685_v1 = vld [vmem:[#allocation7 + $0x20] ss:$12 sps:$4 sm:$0xff]  }
 0xd4a   :  { %v9020_v2 = vpop.eup %9019 }
 0xd4b   :  { %v9022_v26 = vpop.eup %9021  ;;  %v3168_v3 = vmul.f32 0.5, %v9020_v2  ;;  %v10056_v2 = vld [vmem:[#allocation7 + $0x7c] ss:$12 sps:$4 sm:$0xff]  }
 0xd4c   :  { %v3165_v57 = vmul.f32 0.5, %v9022_v26  ;;  %v9024_v27 = vpop.eup %9023  ;;  %v10059_v26 = vld [vmem:[#allocation7 + $0x78] ss:$12 sps:$4 sm:$0xff]  }
 0xd4d   :  { %v3169_v32 = vadd.f32 0.5, %v3168_v3  ;;  %v9026_v6 = vpop.eup %9025  ;;  %v8697_v3 = vld [vmem:[#allocation7 + $0x68] ss:$12 sps:$4 sm:$0xff]  }
 0xd4e   :  { %v3166_v34 = vadd.f32 0.5, %v3165_v57  ;;  %v3171_v35 = vmul.f32 0.5, %v9026_v6  ;;  %v10052_v57 = vld [vmem:[#allocation7 + $0x60] ss:$12 sps:$4 sm:$0xff]   ;;  %v8705_v6 = vld [vmem:[#allocation7 + $0x98] ss:$12 sps:$4 sm:$0xff]  }
 0xd4f   :  { %v3173_v37 = vmul.f32 %v3169_v32, %v9878_v29  ;;  %v8693_v29 = vld [vmem:[#allocation7 + $0x50] ss:$12 sps:$4 sm:$0xff]   ;;  %v8701_v32 = vld [vmem:[#allocation7 + $0x80] ss:$12 sps:$4 sm:$0xff]  }
 0xd50   :  { %v3174_v60 = vmul.f32 %v9024_v27, %v3166_v34  ;;  %v3172_v56 = vadd.f32 0.5, %v3171_v35  ;;  %v8689_v34 = vld [vmem:[#allocation7 + $0x38] ss:$12 sps:$4 sm:$0xff]  }
 0xd51   :  { %v10050_v27 = vld [vmem:[#allocation7 + $0x64] ss:$12 sps:$4 sm:$0xff]   ;;  %v10070_v35 = vld [vmem:[#allocation7 + $0xac] ss:$12 sps:$4 sm:$0xff]  }
 0xd52   :  { %v10041_v61 = vadd.f32 %v3174_v60, %v3173_v37  ;;  %3471 = vmatprep.subr.bf16.mxu0 %v10050_v27  ;;  %v10063_v37 = vld [vmem:[#allocation7 + $0x94] ss:$12 sps:$4 sm:$0xff]   ;;  %v10066_v60 = vld [vmem:[#allocation7 + $0x90] ss:$12 sps:$4 sm:$0xff]  }
 0xd53   :  { %3472 = vmatpush1.bf16.msra.mxu0 %v10052_v57 }
 0xd54   :  { %9027 = vtanh.f32 %v10041_v61  ;;  %3473 = vmatprep.subr.bf16.mxu0 %v10056_v2 }
 0xd57   :  { %3474 = vmatpush1.bf16.msra.mxu0 %v10059_v26 }
 0xd58   :  { %3475 = vmatprep.subr.bf16.mxu0 %v10063_v37 }
 0xd5b   :  { %3476 = vmatpush1.bf16.msra.mxu0 %v10066_v60 }
 0xd5c   :  { %3477 = vmatprep.subr.bf16.mxu0 %v10070_v35 }
 0xd5e   :  { %v9028_v62 = vpop.eup %9027 }
 0xd5f   :  { %v3177_v24 = vmul.f32 %v9028_v62, %v3172_v56  ;;  %v10073_v56 = vld [vmem:[#allocation7 + $0xa8] ss:$12 sps:$4 sm:$0xff]   ;;  %v8709_v62 = vld [vmem:[#allocation7 + $0xb0] ss:$12 sps:$4 sm:$0xff]  }
 0xd60   :  { %3478 = vmatpush1.bf16.msra.mxu0 %v10073_v56 }
 0xd61   :  { %v3178_v63 = vpack.c.bf16 %v3177_v24, %v3177_v24  ;;  %3747 = vmatprep.subr.bf16.mxu0 %v9890_v20  ;;  %v3318_v20 = vld [vmem:[%s10769_s8] sm:$0x7] }
 0xd63   :  { %8136 = vmatmul.mubr.bf16.vlgmr.msra.gmra.mrb[40].mxu1 %v3178_v63 }
 0xd64   :  { %8140 = vmatpush3.bf16.msra.mxu1 %v8681_v4  ;;  %8155 = vmatprep.mubr.msk.bf16.mxu1 %vm9252_vm1, %v10803_v52 }
 0xd65   :  { %8141 = vmatprep.subr.bf16.mxu1 %v10803_v52 }
 0xd68   :  { %8142 = vmatpush3.bf16.msra.mxu1 %v8685_v1 }
 0xd69   :  { %8143 = vmatprep.subr.bf16.mxu1 %v10803_v52 }
 0xd6c   :  { %8144 = vmatpush3.bf16.msra.mxu1 %v8689_v34 }
 0xd6d   :  { %8145 = vmatprep.subr.bf16.mxu1 %v10803_v52 }
 0xd70   :  { %8146 = vmatpush3.bf16.msra.mxu1 %v8693_v29 }
 0xd71   :  { %8147 = vmatprep.subr.bf16.mxu1 %v10803_v52 }
 0xd74   :  { %8148 = vmatpush3.bf16.msra.mxu1 %v8697_v3 }
 0xd75   :  { %8149 = vmatprep.subr.bf16.mxu1 %v10803_v52 }
 0xd78   :  { %8150 = vmatpush3.bf16.msra.mxu1 %v8701_v32 }
 0xd79   :  { %8151 = vmatprep.subr.bf16.mxu1 %v10803_v52 }
 0xd7c   :  { %8152 = vmatpush3.bf16.msra.mxu1 %v8705_v6 }
 0xd7d   :  { %8153 = vmatprep.subr.bf16.mxu1 %v10803_v52 }
 0xd80   :  { %8154 = vmatpush3.bf16.msra.mxu1 %v8709_v62 }
 0xd81   :  { %3788 = vmatprep.subr.bf16.mxu1 %v9892_v23  ;;  %v3323_v23 = vrot.slane %v3318_v20, %v9390_v25 }
 0xe36   :  { %v3277_v24 = vpop.f32.mrb[40].mxu1 }
 0xe37   :  { %v3283_v4 = vadd.f32 %v9899_v22, %v3277_v24  ;;  %v8137_v63 = vpop.f32.mrb[41].mxu1 }
 0xe38   :  { %v3280_v1 = vpop.f32.mrb[42].mxu1 }
 0xe39   :  { %9029 = vtanh.f32 %v3283_v4  ;;  %v8138_v34 = vpop.f32.mrb[43].mxu1 }
 0xe43   :  { %v9030_v29 = vpop.eup %9029 }
 0xe44   :  { %v3285_v3 = vpack.c.bf16 %v9030_v29, %v9030_v29 }
 0xe46   :  { %3496 = vmatmul.mubr.bf16.vlgmr.msra.gmra.mrb[52].mxu0 %v3285_v3  ;;  %8156 = vmatmul.mubr.bf16.vlgmr.msra.gmra.mrb[44].mxu1 %v3285_v3 }
 0xe47   :  { %3748 = vmatpush1.bf16.msra.mxu0 %v9902_v8  ;;  %3789 = vmatpush1.bf16.msra.mxu1 %v9904_v36  ;;  %v3331_v8 = vrot.slane %v3318_v20, %v9498_v18  ;;  %v10811_v36 = vld [vmem:[#allocation13_spill] sm:$0xff] }
 0xe48   :  { %3749 = vmatprep.subr.bf16.mxu0 %v9906_v38  ;;  %3790 = vmatprep.subr.bf16.mxu1 %v9908_v39  ;;  %v3327_v38 = vrot.slane %v3318_v20, %v10811_v36 }
 0xe49   :  { %3779 = vmatprep.mubr.bf16.mxu0 %v10799_v46  ;;  %3820 = vmatprep.mubr.bf16.mxu1 %v10799_v46 }
 0xe4b   :  { %3750 = vmatpush1.bf16.msra.mxu0 %v9912_v40  ;;  %3791 = vmatpush1.bf16.msra.mxu1 %v9914_v41 }
 0xe4c   :  { %3751 = vmatprep.subr.bf16.mxu0 %v9922_v42  ;;  %3792 = vmatprep.subr.bf16.mxu1 %v9924_v13 }
 0xe4f   :  { %3752 = vmatpush1.bf16.msra.mxu0 %v9926_v16  ;;  %3793 = vmatpush1.bf16.msra.mxu1 %v9928_v21 }
 0xe50   :  { %3753 = vmatprep.subr.bf16.mxu0 %v9934_v59  ;;  %3794 = vmatprep.subr.bf16.mxu1 %v9936_v49 }
 0xe53   :  { %3754 = vmatpush1.bf16.msra.mxu0 %v9938_v51  ;;  %3795 = vmatpush1.bf16.msra.mxu1 %v9940_v48 }
 0xe54   :  { %3755 = vmatprep.subr.bf16.mxu0 %v9946_v54  ;;  %3796 = vmatprep.subr.bf16.mxu1 %v9948_v47 }
 0xe57   :  { %3756 = vmatpush1.bf16.msra.mxu0 %v9950_v53  ;;  %3797 = vmatpush1.bf16.msra.mxu1 %v9952_v58 }
 0xe58   :  { %3757 = vmatprep.subr.bf16.mxu0 %v9958_v9  ;;  %3798 = vmatprep.subr.bf16.mxu1 %v9960_v0 }
 0xe5b   :  { %3758 = vmatpush1.bf16.msra.mxu0 %v9962_v45  ;;  %3799 = vmatpush1.bf16.msra.mxu1 %v9964_v30 }
 0xe5c   :  { %3759 = vmatprep.subr.bf16.mxu0 %v9970_v10  ;;  %3800 = vmatprep.subr.bf16.mxu1 %v9972_v50  ;;  %v10812_v50 = vld [vmem:[#allocation15_spill] sm:$0xff] }
 0xe5f   :  { %3760 = vmatpush1.bf16.msra.mxu0 %v9974_v19  ;;  %3801 = vmatpush1.bf16.msra.mxu1 %v9976_v43  ;;  %v10813_v19 = vld [vmem:[#allocation16_spill] sm:$0xff]  ;;  %v10814_v43 = vld [vmem:[#allocation17_spill] sm:$0xff] }
 0xe60   :  { %3761 = vmatprep.subr.bf16.mxu0 %v9980_v55  ;;  %3802 = vmatprep.subr.bf16.mxu1 %v9988_v28  ;;  %v8710_v55 = vld [vmem:[#allocation5] sm:$0xff]   ;;  %v8713_v28 = vld [vmem:[#allocation5 + $0x18] sm:$0xff]  }
 0xe63   :  { %3762 = vmatpush1.bf16.msra.mxu0 %v9984_v44  ;;  %3803 = vmatpush1.bf16.msra.mxu1 %v9986_v33  ;;  %v8711_v44 = vld [vmem:[#allocation5 + $0x8] sm:$0xff]   ;;  %v8712_v33 = vld [vmem:[#allocation5 + $0x10] sm:$0xff]  }
 0xe64   :  { %8159 = vmatprep.subr.bf16.mxu0 %v10803_v52  ;;  %4133 = vmatprep.subr.bf16.mxu1 %v10014_v12  ;;  %v8715_v12 = vld [vmem:[#allocation5 + $0x28] sm:$0xff]  }
 0xf19   :  { %v3497_v39 = vpop.f32.mrb[52].mxu0  ;;  %v3538_v40 = vpop.f32.mrb[44].mxu1 }
 0xf1a   :  { %v3498_v41 = vadd.f32 %v3497_v39, %v3323_v23  ;;  %v3539_v42 = vadd.f32 %v3538_v40, %v3331_v8  ;;  %v3499_v13 = vpop.f32.mrb[53].mxu0  ;;  %v8157_v16 = vpop.f32.mrb[45].mxu1 }
 0xf1b   :  { %v3500_v21 = vadd.f32 %v3499_v13, %v3327_v38  ;;  %v3501_v59 = vpop.f32.mrb[54].mxu0  ;;  %v3541_v49 = vpop.f32.mrb[46].mxu1  ;;  %v8718_v16 = vld [vmem:[#allocation7 + $0x8] ss:$12 sps:$4 sm:$0xff]  }
 0xf1c   :  { %9031 = vtanh.f32 %v3498_v41  ;;  %v3502_v51 = vpop.f32.mrb[55].mxu0  ;;  %v8158_v48 = vpop.f32.mrb[47].mxu1  ;;  %v8719_v59 = vld [vmem:[#allocation7 + $0x20] ss:$12 sps:$4 sm:$0xff]   ;;  %v8721_v49 = vld [vmem:[#allocation7 + $0x50] ss:$12 sps:$4 sm:$0xff]  }
 0xf1d   :  { %9033 = vtanh.f32 %v3539_v42  ;;  %v8722_v51 = vld [vmem:[#allocation7 + $0x68] ss:$12 sps:$4 sm:$0xff]   ;;  %v8723_v48 = vld [vmem:[#allocation7 + $0x80] ss:$12 sps:$4 sm:$0xff]  }
 0xf1e   :  { %9035 = vtanh.f32 %v3500_v21 }
 0xf26   :  { %v9032_v54 = vpop.eup %9031 }
 0xf27   :  { %v9034_v47 = vpop.eup %9033 }
 0xf28   :  { %v9036_v53 = vpop.eup %9035  ;;  %v3547_v58 = vmul.f32 0.5, %v9034_v47  ;;  %v8725_v47 = vld [vmem:[#allocation7 + $0xb0] ss:$12 sps:$4 sm:$0xff]  }
 0xf29   :  { %v3549_v9 = vsub.f32 %v9036_v53, %v9032_v54  ;;  %v10163_v53 = vld [vmem:[#allocation3 + $0x4] ss:$16 sps:$4 sm:$0xff]  }
 0xf2a   :  { %v3548_v0 = vadd.f32 0.5, %v3547_v58  ;;  %v10165_v58 = vld [vmem:[#allocation3 + $0xc] ss:$16 sps:$4 sm:$0xff]  }
 0xf2c   :  { %v3550_v45 = vmul.f32 %v3549_v9, %v3548_v0 }
 0xf2e   :  { %v3551_v30 = vadd.f32 %v9032_v54, %v3550_v45  ;;  %v8724_v54 = vld [vmem:[#allocation7 + $0x98] ss:$12 sps:$4 sm:$0xff]  }
 0xf30   :  { %v3552_v10 = vpack.c.bf16 %v3551_v30, %v3551_v30 }
 0xf32   :  { %3554 = vst [vmem:[#allocation2 + $0x10] sm:$0xf] %v3552_v10  ;;  %3780 = vmatmul.mubr.bf16.vlgmr.msra.gmra.mrb[56].mxu0 %v3552_v10  ;;  %3821 = vmatmul.mubr.bf16.vlgmr.msra.gmra.mrb[48].mxu1 %v3552_v10 }
 0xf33   :  { %8175 = vmatprep.mubr.msk.bf16.mxu0 %vm9252_vm1, %v10803_v52  ;;  %4134 = vmatpush1.bf16.msra.mxu1 %v10012_v11  ;;  %v8714_v11 = vld [vmem:[#allocation5 + $0x20] sm:$0xff]  }
 0xf34   :  { %4135 = vmatprep.subr.bf16.mxu1 %v10016_v14  ;;  %4165 = vmatprep.mubr.bf16.mxu1 %v10799_v46  ;;  %v8716_v14 = vld [vmem:[#allocation5 + $0x30] sm:$0xff]  }
 0xf35   :  { %8160 = vmatpush3.bf16.msra.mxu0 %v8710_v55 }
 0xf36   :  { %8161 = vmatprep.subr.bf16.mxu0 %v10803_v52 }
 0xf37   :  { %4136 = vmatpush1.bf16.msra.mxu1 %v10020_v15  ;;  %v8717_v15 = vld [vmem:[#allocation5 + $0x38] sm:$0xff]  }
 0xf38   :  { %4137 = vmatprep.subr.bf16.mxu1 %v10023_v17 }
 0xf39   :  { %8162 = vmatpush3.bf16.msra.mxu0 %v8711_v44  ;;  %v10174_v44 = vld [vmem:[#allocation3 + $0x24] ss:$16 sps:$4 sm:$0xff]  }
 0xf3a   :  { %8163 = vmatprep.subr.bf16.mxu0 %v10803_v52 }
 0xf3b   :  { %4138 = vmatpush1.bf16.msra.mxu1 %v10812_v50 }
 0xf3c   :  { %4139 = vmatprep.subr.bf16.mxu1 %v10813_v19  ;;  %v10170_v19 = vld [vmem:[#allocation3] ss:$16 sps:$4 sm:$0xff]  }
 0xf3d   :  { %8164 = vmatpush3.bf16.msra.mxu0 %v8712_v33  ;;  %v10176_v33 = vld [vmem:[#allocation3 + $0x2c] ss:$16 sps:$4 sm:$0xff]  }
 0xf3e   :  { %8165 = vmatprep.subr.bf16.mxu0 %v10803_v52 }
 0xf3f   :  { %4140 = vmatpush1.bf16.msra.mxu1 %v10814_v43  ;;  %v10172_v43 = vld [vmem:[#allocation3 + $0x8] ss:$16 sps:$4 sm:$0xff]  }
 0xf40   :  { %4141 = vmatprep.subr.bf16.mxu1 %v10050_v27 }
 0xf41   :  { %8166 = vmatpush3.bf16.msra.mxu0 %v8713_v28  ;;  %v10182_v28 = vld [vmem:[#allocation3 + $0x28] ss:$16 sps:$4 sm:$0xff]  }
 0xf42   :  { %8167 = vmatprep.subr.bf16.mxu0 %v10803_v52 }
 0xf43   :  { %4142 = vmatpush1.bf16.msra.mxu1 %v10052_v57  ;;  %v10815_v57 = vld [vmem:[#allocation14_spill] sm:$0xff] }
 0xf44   :  { %4143 = vmatprep.subr.bf16.mxu1 %v10056_v2 }
 0xf45   :  { %8168 = vmatpush3.bf16.msra.mxu0 %v8714_v11  ;;  %v10190_v11 = vld [vmem:[#allocation3 + $0x44] ss:$16 sps:$4 sm:$0xff]  }
 0xf46   :  { %8169 = vmatprep.subr.bf16.mxu0 %v10803_v52 }
 0xf47   :  { %4144 = vmatpush1.bf16.msra.mxu1 %v10059_v26 }
 0xf48   :  { %4145 = vmatprep.subr.bf16.mxu1 %v10063_v37 }
 0xf49   :  { %8170 = vmatpush3.bf16.msra.mxu0 %v8715_v12  ;;  %v10192_v12 = vld [vmem:[#allocation3 + $0x4c] ss:$16 sps:$4 sm:$0xff]  }
 0xf4a   :  { %8171 = vmatprep.subr.bf16.mxu0 %v10803_v52 }
 0xf4b   :  { %4146 = vmatpush1.bf16.msra.mxu1 %v10066_v60 }
 0xf4c   :  { %4147 = vmatprep.subr.bf16.mxu1 %v10070_v35 }
 0xf4d   :  { %8172 = vmatpush3.bf16.msra.mxu0 %v8716_v14  ;;  %v10194_v14 = vld [vmem:[#allocation3 + $0x40] ss:$16 sps:$4 sm:$0xff]  }
 0xf4e   :  { %8173 = vmatprep.subr.bf16.mxu0 %v10803_v52 }
 0xf4f   :  { %4148 = vmatpush1.bf16.msra.mxu1 %v10073_v56 }
 0xf50   :  { %4417 = vmatprep.subr.bf16.mxu1 %v10163_v53 }
 0xf51   :  { %8174 = vmatpush3.bf16.msra.mxu0 %v8717_v15  ;;  %v10196_v15 = vld [vmem:[#allocation3 + $0x48] ss:$16 sps:$4 sm:$0xff]  }
 0xf52   :  { %8179 = vmatprep.subr.bf16.mxu0 %v10803_v52 }
0x1005   :  { %v3781_v17 = vpop.f32.mrb[56].mxu0  ;;  %v3822_v27 = vpop.f32.mrb[48].mxu1 }
0x1006   :  { %v3831_v2 = vadd.f32 %v3822_v27, %v10815_v57  ;;  %v3783_v26 = vpop.f32.mrb[57].mxu0  ;;  %v3824_v32 = vpop.f32.mrb[49].mxu1  ;;  %v3829_v62 = vadd.f32 %v3781_v17, %v9493_v7  ;;  %v10202_v17 = vld [vmem:[#allocation3 + $0x64] ss:$16 sps:$4 sm:$0xff]   ;;  %v10204_v27 = vld [vmem:[#allocation3 + $0x6c] ss:$16 sps:$4 sm:$0xff]  }
0x1007   :  { %v3830_v37 = vadd.f32 %v3783_v26, %v9490_v5  ;;  %v3785_v60 = vpop.f32.mrb[58].mxu0  ;;  %v3826_v6 = vpop.f32.mrb[50].mxu1  ;;  %v3832_v24 = vadd.f32 %v3824_v32, %v9505_v31  ;;  %v10208_v26 = vld [vmem:[#allocation3 + $0x68] ss:$16 sps:$4 sm:$0xff]   ;;  %v10214_v32 = vld [vmem:[#allocation3 + $0x84] ss:$16 sps:$4 sm:$0xff]  }
0x1008   :  { %v3786_v35 = vpop.f32.mrb[59].mxu0  ;;  %v3827_v56 = vpop.f32.mrb[51].mxu1  ;;  %9037 = vtanh.f32 %v3831_v2  ;;  %v10206_v2 = vld [vmem:[#allocation3 + $0x60] ss:$16 sps:$4 sm:$0xff]   ;;  %v10220_v6 = vld [vmem:[#allocation3 + $0x88] ss:$16 sps:$4 sm:$0xff]  }
0x1009   :  { %9039 = vtanh.f32 %v3830_v37  ;;  %v10216_v37 = vld [vmem:[#allocation3 + $0x8c] ss:$16 sps:$4 sm:$0xff]   ;;  %v10218_v60 = vld [vmem:[#allocation3 + $0x80] ss:$16 sps:$4 sm:$0xff]   ;;  %v10226_v35 = vld [vmem:[#allocation3 + $0xa4] ss:$16 sps:$4 sm:$0xff]  }
0x100a   :  { %9041 = vtanh.f32 %v3829_v62  ;;  %v10228_v56 = vld [vmem:[#allocation3 + $0xac] ss:$16 sps:$4 sm:$0xff]   ;;  %v10230_v62 = vld [vmem:[#allocation3 + $0xa0] ss:$16 sps:$4 sm:$0xff]  }
0x100b   :  { %9043 = vtanh.f32 %v3832_v24  ;;  %v10232_v24 = vld [vmem:[#allocation3 + $0xa8] ss:$16 sps:$4 sm:$0xff]  }
0x1012   :  { %v9038_v4 = vpop.eup %9037 }
0x1013   :  { %v9040_v63 = vpop.eup %9039  ;;  %v3838_v1 = vmul.f32 0.5, %v9038_v4  ;;  %v10238_v4 = vld [vmem:[#allocation3 + $0xc4] ss:$16 sps:$4 sm:$0xff]  }
0x1014   :  { %v3835_v34 = vmul.f32 0.5, %v9040_v63  ;;  %v9042_v20 = vpop.eup %9041  ;;  %v10240_v63 = vld [vmem:[#allocation3 + $0xcc] ss:$16 sps:$4 sm:$0xff]  }
0x1015   :  { %v3839_v29 = vadd.f32 0.5, %v3838_v1  ;;  %v9044_v39 = vpop.eup %9043  ;;  %v10242_v1 = vld [vmem:[#allocation3 + $0xc0] ss:$16 sps:$4 sm:$0xff]  }
0x1016   :  { %v3836_v3 = vadd.f32 0.5, %v3835_v34  ;;  %v3841_v40 = vmul.f32 0.5, %v9044_v39  ;;  %v10244_v34 = vld [vmem:[#allocation3 + $0xc8] ss:$16 sps:$4 sm:$0xff]  }
0x1017   :  { %v3843_v23 = vmul.f32 %v3839_v29, %v10041_v61  ;;  %v8720_v61 = vld [vmem:[#allocation7 + $0x38] ss:$12 sps:$4 sm:$0xff]  }
0x1018   :  { %v3844_v8 = vmul.f32 %v9042_v20, %v3836_v3  ;;  %v3842_v41 = vadd.f32 0.5, %v3841_v40  ;;  %v10248_v29 = vld [vmem:[#allocation3 + $0xe4] ss:$16 sps:$4 sm:$0xff]   ;;  %v10252_v3 = vld [vmem:[#allocation3 + $0xe0] ss:$16 sps:$4 sm:$0xff]  }
0x1019   :  { %v10254_v20 = vld [vmem:[#allocation3 + $0xe8] ss:$16 sps:$4 sm:$0xff]  }
0x101a   :  { %v10151_v38 = vadd.f32 %v3844_v8, %v3843_v23  ;;  %v10256_v23 = vld [vmem:[#allocation3 + $0xec] ss:$16 sps:$4 sm:$0xff]   ;;  %v3988_v8 = vld [vmem:[%s10769_s8] sm:$0x7] }
0x101b   :  { %v3993_v39 = vrot.slane %v3988_v8, %v9390_v25  ;;  %v4001_v40 = vrot.slane %v3988_v8, %v9498_v18 }
0x101c   :  { %9045 = vtanh.f32 %v10151_v38 }
0x1026   :  { %v9046_v42 = vpop.eup %9045 }
0x1027   :  { %v3847_v13 = vmul.f32 %v9046_v42, %v3842_v41  ;;  %v3997_v41 = vrot.slane %v3988_v8, %v10811_v36 }
0x1029   :  { %v3848_v21 = vpack.c.bf16 %v3847_v13, %v3847_v13 }
0x102b   :  { %8176 = vmatmul.mubr.bf16.vlgmr.msra.gmra.mrb[60].mxu0 %v3848_v21 }
0x102c   :  { %8180 = vmatpush3.bf16.msra.mxu0 %v8718_v16  ;;  %8195 = vmatprep.mubr.msk.bf16.mxu0 %vm9252_vm1, %v10803_v52 }
0x102d   :  { %8181 = vmatprep.subr.bf16.mxu0 %v10803_v52 }
0x1030   :  { %8182 = vmatpush3.bf16.msra.mxu0 %v8719_v59 }
0x1031   :  { %8183 = vmatprep.subr.bf16.mxu0 %v10803_v52 }
0x1034   :  { %8184 = vmatpush3.bf16.msra.mxu0 %v8720_v61 }
0x1035   :  { %8185 = vmatprep.subr.bf16.mxu0 %v10803_v52 }
0x1038   :  { %8186 = vmatpush3.bf16.msra.mxu0 %v8721_v49 }
0x1039   :  { %8187 = vmatprep.subr.bf16.mxu0 %v10803_v52 }
0x103c   :  { %8188 = vmatpush3.bf16.msra.mxu0 %v8722_v51 }
0x103d   :  { %8189 = vmatprep.subr.bf16.mxu0 %v10803_v52 }
0x1040   :  { %8190 = vmatpush3.bf16.msra.mxu0 %v8723_v48 }
0x1041   :  { %8191 = vmatprep.subr.bf16.mxu0 %v10803_v52 }
0x1044   :  { %8192 = vmatpush3.bf16.msra.mxu0 %v8724_v54 }
0x1045   :  { %8193 = vmatprep.subr.bf16.mxu0 %v10803_v52 }
0x1048   :  { %8194 = vmatpush3.bf16.msra.mxu0 %v8725_v47 }
0x1049   :  { %4458 = vmatprep.subr.bf16.mxu0 %v10165_v58 }
0x10fe   :  { %v3947_v9 = vpop.f32.mrb[60].mxu0 }
0x10ff   :  { %v3953_v0 = vadd.f32 %v9899_v22, %v3947_v9  ;;  %v8177_v45 = vpop.f32.mrb[61].mxu0  ;;  %v10180_v22 = vld [vmem:[#allocation3 + $0x20] ss:$16 sps:$4 sm:$0xff]  }
0x1100   :  { %v3950_v30 = vpop.f32.mrb[62].mxu0 }
0x1101   :  { %9047 = vtanh.f32 %v3953_v0  ;;  %v8178_v10 = vpop.f32.mrb[63].mxu0 }
0x110b   :  { %v9048_v50 = vpop.eup %9047 }
0x110c   :  { %v3955_v55 = vpack.c.bf16 %v9048_v50, %v9048_v50 }
0x110e   :  { %4166 = vmatmul.mubr.bf16.vlgmr.msra.gmra.mrb[52].mxu1 %v3955_v55  ;;  %8196 = vmatmul.mubr.bf16.vlgmr.msra.gmra.mrb[64].mxu0 %v3955_v55 }
0x110f   :  { %4418 = vmatpush1.bf16.msra.mxu1 %v10170_v19  ;;  %4459 = vmatpush1.bf16.msra.mxu0 %v10172_v43 }
0x1110   :  { %4419 = vmatprep.subr.bf16.mxu1 %v10174_v44  ;;  %4460 = vmatprep.subr.bf16.mxu0 %v10176_v33 }
0x1111   :  { %4449 = vmatprep.mubr.bf16.mxu1 %v10799_v46  ;;  %4490 = vmatprep.mubr.bf16.mxu0 %v10799_v46 }
0x1113   :  { %4420 = vmatpush1.bf16.msra.mxu1 %v10180_v22  ;;  %4461 = vmatpush1.bf16.msra.mxu0 %v10182_v28 }
0x1114   :  { %4421 = vmatprep.subr.bf16.mxu1 %v10190_v11  ;;  %4462 = vmatprep.subr.bf16.mxu0 %v10192_v12 }
0x1117   :  { %4422 = vmatpush1.bf16.msra.mxu1 %v10194_v14  ;;  %4463 = vmatpush1.bf16.msra.mxu0 %v10196_v15 }
0x1118   :  { %4423 = vmatprep.subr.bf16.mxu1 %v10202_v17  ;;  %4464 = vmatprep.subr.bf16.mxu0 %v10204_v27 }
0x111b   :  { %4424 = vmatpush1.bf16.msra.mxu1 %v10206_v2  ;;  %4465 = vmatpush1.bf16.msra.mxu0 %v10208_v26 }
0x111c   :  { %4425 = vmatprep.subr.bf16.mxu1 %v10214_v32  ;;  %4466 = vmatprep.subr.bf16.mxu0 %v10216_v37 }
0x111f   :  { %4426 = vmatpush1.bf16.msra.mxu1 %v10218_v60  ;;  %4467 = vmatpush1.bf16.msra.mxu0 %v10220_v6 }
0x1120   :  { %4427 = vmatprep.subr.bf16.mxu1 %v10226_v35  ;;  %4468 = vmatprep.subr.bf16.mxu0 %v10228_v56 }
0x1123   :  { %4428 = vmatpush1.bf16.msra.mxu1 %v10230_v62  ;;  %4469 = vmatpush1.bf16.msra.mxu0 %v10232_v24 }
0x1124   :  { %4429 = vmatprep.subr.bf16.mxu1 %v10238_v4  ;;  %4470 = vmatprep.subr.bf16.mxu0 %v10240_v63 }
0x1127   :  { %4430 = vmatpush1.bf16.msra.mxu1 %v10242_v1  ;;  %4471 = vmatpush1.bf16.msra.mxu0 %v10244_v34 }
0x1128   :  { %4431 = vmatprep.subr.bf16.mxu1 %v10248_v29  ;;  %4472 = vmatprep.subr.bf16.mxu0 %v10256_v23 }
0x112b   :  { %4432 = vmatpush1.bf16.msra.mxu1 %v10252_v3  ;;  %4473 = vmatpush1.bf16.msra.mxu0 %v10254_v20 }
0x112c   :  { %8199 = vmatprep.subr.bf16.mxu1 %v10803_v52 }
0x11e1   :  { %v4167_v42 = vpop.f32.mrb[52].mxu1  ;;  %v4208_v13 = vpop.f32.mrb[64].mxu0 }
0x11e2   :  { %v4168_v16 = vadd.f32 %v4167_v42, %v3993_v39  ;;  %v4209_v21 = vadd.f32 %v4208_v13, %v4001_v40  ;;  %v4169_v59 = vpop.f32.mrb[53].mxu1  ;;  %v8197_v61 = vpop.f32.mrb[65].mxu0  ;;  %v8774_v40 = vld [vmem:[#allocation5] sm:$0xff]   ;;  %v8776_v42 = vld [vmem:[#allocation5 + $0x10] sm:$0xff]   ;;  %v8777_v13 = vld [vmem:[#allocation5 + $0x18] sm:$0xff]  }
0x11e3   :  { %v4170_v49 = vadd.f32 %v4169_v59, %v3997_v41  ;;  %v4171_v51 = vpop.f32.mrb[54].mxu1  ;;  %v4211_v48 = vpop.f32.mrb[66].mxu0  ;;  %v8775_v41 = vld [vmem:[#allocation5 + $0x8] sm:$0xff]   ;;  %v8780_v59 = vld [vmem:[#allocation5 + $0x30] sm:$0xff]   ;;  %v8781_v61 = vld [vmem:[#allocation5 + $0x38] sm:$0xff]  }
0x11e4   :  { %9049 = vtanh.f32 %v4168_v16  ;;  %v4172_v54 = vpop.f32.mrb[55].mxu1  ;;  %v8198_v47 = vpop.f32.mrb[67].mxu0  ;;  %v8778_v16 = vld [vmem:[#allocation5 + $0x20] sm:$0xff]   ;;  %v10284_v48 = vld [vmem:[#allocation7 + $0x1c] ss:$12 sps:$4 sm:$0xff]  }
0x11e5   :  { %9051 = vtanh.f32 %v4209_v21  ;;  %v8779_v21 = vld [vmem:[#allocation5 + $0x28] sm:$0xff]   ;;  %v10282_v51 = vld [vmem:[#allocation7 + $0x4] ss:$12 sps:$4 sm:$0xff]   ;;  %v10291_v47 = vld [vmem:[#allocation7 + $0x34] ss:$12 sps:$4 sm:$0xff]  }
0x11e6   :  { %9053 = vtanh.f32 %v4170_v49  ;;  %v10280_v49 = vld [vmem:[#allocation7] ss:$12 sps:$4 sm:$0xff]   ;;  %4803 = vmatprep.subr.bf16.mxu0 %v10282_v51  ;;  %v10288_v54 = vld [vmem:[#allocation7 + $0x18] ss:$12 sps:$4 sm:$0xff]  }
0x11ee   :  { %v9050_v9 = vpop.eup %9049 }
0x11ef   :  { %v9052_v0 = vpop.eup %9051 }
0x11f0   :  { %v9054_v45 = vpop.eup %9053  ;;  %v4217_v30 = vmul.f32 0.5, %v9052_v0  ;;  %v10297_v0 = vld [vmem:[#allocation7 + $0x4c] ss:$12 sps:$4 sm:$0xff]  }
0x11f1   :  { %v4219_v10 = vsub.f32 %v9054_v45, %v9050_v9  ;;  %10817 = vst [vmem:[#allocation16_spill] sm:$0xff] %v10297_v0  ;;  %v10300_v45 = vld [vmem:[#allocation7 + $0x48] ss:$12 sps:$4 sm:$0xff]  }
0x11f2   :  { %v4218_v50 = vadd.f32 0.5, %v4217_v30  ;;  %10818 = vst [vmem:[#allocation17_spill] sm:$0xff] %v10300_v45 }
0x11f4   :  { %v4220_v55 = vmul.f32 %v4219_v10, %v4218_v50 }
0x11f6   :  { %v4221_v8 = vadd.f32 %v9050_v9, %v4220_v55  ;;  %v10294_v9 = vld [vmem:[#allocation7 + $0x30] ss:$12 sps:$4 sm:$0xff]  }
0x11f7   :  { %10816 = vst [vmem:[#allocation15_spill] sm:$0xff] %v10294_v9 }
0x11f8   :  { %v4222_v39 = vpack.c.bf16 %v4221_v8, %v4221_v8 }
0x11fa   :  { %4224 = vst [vmem:[#allocation2 + $0x14] sm:$0xf] %v4222_v39  ;;  %4450 = vmatmul.mubr.bf16.vlgmr.msra.gmra.mrb[56].mxu1 %v4222_v39  ;;  %4491 = vmatmul.mubr.bf16.vlgmr.msra.gmra.mrb[68].mxu0 %v4222_v39 }
0x11fb   :  { %8215 = vmatprep.mubr.msk.bf16.mxu1 %vm9252_vm1, %v10803_v52  ;;  %4835 = vmatprep.mubr.bf16.mxu0 %v10799_v46 }
0x11fc   :  { %8200 = vmatpush3.bf16.msra.mxu1 %v8774_v40  ;;  %4804 = vmatpush1.bf16.msra.mxu0 %v10280_v49 }
0x11fd   :  { %8201 = vmatprep.subr.bf16.mxu1 %v10803_v52  ;;  %4805 = vmatprep.subr.bf16.mxu0 %v10284_v48 }
0x1200   :  { %8202 = vmatpush3.bf16.msra.mxu1 %v8775_v41  ;;  %4806 = vmatpush1.bf16.msra.mxu0 %v10288_v54 }
0x1201   :  { %8203 = vmatprep.subr.bf16.mxu1 %v10803_v52  ;;  %4807 = vmatprep.subr.bf16.mxu0 %v10291_v47 }
0x1204   :  { %8204 = vmatpush3.bf16.msra.mxu1 %v8776_v42  ;;  %4808 = vmatpush1.bf16.msra.mxu0 %v10294_v9 }
0x1205   :  { %8205 = vmatprep.subr.bf16.mxu1 %v10803_v52  ;;  %4809 = vmatprep.subr.bf16.mxu0 %v10297_v0 }
0x1208   :  { %8206 = vmatpush3.bf16.msra.mxu1 %v8777_v13  ;;  %4810 = vmatpush1.bf16.msra.mxu0 %v10300_v45 }
0x1209   :  { %8207 = vmatprep.subr.bf16.mxu1 %v10803_v52 }
0x120c   :  { %8208 = vmatpush3.bf16.msra.mxu1 %v8778_v16 }
0x120d   :  { %8209 = vmatprep.subr.bf16.mxu1 %v10803_v52 }
0x1210   :  { %8210 = vmatpush3.bf16.msra.mxu1 %v8779_v21 }
0x1211   :  { %8211 = vmatprep.subr.bf16.mxu1 %v10803_v52 }
0x1214   :  { %8212 = vmatpush3.bf16.msra.mxu1 %v8780_v59 }
0x1215   :  { %8213 = vmatprep.subr.bf16.mxu1 %v10803_v52 }
0x1218   :  { %8214 = vmatpush3.bf16.msra.mxu1 %v8781_v61 }
0x1219   :  { %8219 = vmatprep.subr.bf16.mxu1 %v10803_v52 }
0x12cd   :  { %v4451_v30 = vpop.f32.mrb[56].mxu1  ;;  %v4492_v10 = vpop.f32.mrb[68].mxu0 }
0x12ce   :  { %v4501_v50 = vadd.f32 %v4492_v10, %v10815_v57  ;;  %v4453_v55 = vpop.f32.mrb[57].mxu1  ;;  %v4494_v8 = vpop.f32.mrb[69].mxu0  ;;  %v4499_v16 = vadd.f32 %v4451_v30, %v9493_v7 }
0x12cf   :  { %v4500_v39 = vadd.f32 %v4453_v55, %v9490_v5  ;;  %v4455_v40 = vpop.f32.mrb[58].mxu1  ;;  %v4496_v41 = vpop.f32.mrb[70].mxu0  ;;  %v4502_v21 = vadd.f32 %v4494_v8, %v9505_v31 }
0x12d0   :  { %v4456_v42 = vpop.f32.mrb[59].mxu1  ;;  %v4497_v13 = vpop.f32.mrb[71].mxu0  ;;  %9055 = vtanh.f32 %v4501_v50 }
0x12d1   :  { %9057 = vtanh.f32 %v4500_v39  ;;  %v8785_v13 = vld [vmem:[#allocation7 + $0x8] ss:$12 sps:$4 sm:$0xff]  }
0x12d2   :  { %9059 = vtanh.f32 %v4499_v16 }
0x12d3   :  { %9061 = vtanh.f32 %v4502_v21  ;;  %v8789_v21 = vld [vmem:[#allocation7 + $0x20] ss:$12 sps:$4 sm:$0xff]  }
0x12da   :  { %v9056_v59 = vpop.eup %9055 }
0x12db   :  { %v9058_v61 = vpop.eup %9057  ;;  %v4508_v45 = vmul.f32 0.5, %v9056_v59  ;;  %v10324_v59 = vld [vmem:[#allocation7 + $0x7c] ss:$12 sps:$4 sm:$0xff]  }
0x12dc   :  { %v4505_v0 = vmul.f32 0.5, %v9058_v61  ;;  %v9060_v9 = vpop.eup %9059  ;;  %v10327_v61 = vld [vmem:[#allocation7 + $0x78] ss:$12 sps:$4 sm:$0xff]  }
0x12dd   :  { %v4509_v10 = vadd.f32 0.5, %v4508_v45  ;;  %v9062_v30 = vpop.eup %9061  ;;  %v8801_v45 = vld [vmem:[#allocation7 + $0x68] ss:$12 sps:$4 sm:$0xff]  }
0x12de   :  { %v4506_v57 = vadd.f32 0.5, %v4505_v0  ;;  %v4511_v50 = vmul.f32 0.5, %v9062_v30  ;;  %v10320_v0 = vld [vmem:[#allocation7 + $0x60] ss:$12 sps:$4 sm:$0xff]   ;;  %v8809_v30 = vld [vmem:[#allocation7 + $0x98] ss:$12 sps:$4 sm:$0xff]  }
0x12df   :  { %v4513_v55 = vmul.f32 %v4509_v10, %v10151_v38  ;;  %v8797_v38 = vld [vmem:[#allocation7 + $0x50] ss:$12 sps:$4 sm:$0xff]   ;;  %v8805_v10 = vld [vmem:[#allocation7 + $0x80] ss:$12 sps:$4 sm:$0xff]  }
0x12e0   :  { %v4514_v40 = vmul.f32 %v9060_v9, %v4506_v57  ;;  %v4512_v39 = vadd.f32 0.5, %v4511_v50  ;;  %v8793_v57 = vld [vmem:[#allocation7 + $0x38] ss:$12 sps:$4 sm:$0xff]  }
0x12e1   :  { %v10318_v9 = vld [vmem:[#allocation7 + $0x64] ss:$12 sps:$4 sm:$0xff]   ;;  %v10338_v50 = vld [vmem:[#allocation7 + $0xac] ss:$12 sps:$4 sm:$0xff]  }
0x12e2   :  { %v10309_v41 = vadd.f32 %v4514_v40, %v4513_v55  ;;  %4811 = vmatprep.subr.bf16.mxu0 %v10318_v9  ;;  %v10331_v55 = vld [vmem:[#allocation7 + $0x94] ss:$12 sps:$4 sm:$0xff]   ;;  %v10334_v40 = vld [vmem:[#allocation7 + $0x90] ss:$12 sps:$4 sm:$0xff]  }
0x12e3   :  { %4812 = vmatpush1.bf16.msra.mxu0 %v10320_v0 }
0x12e4   :  { %9063 = vtanh.f32 %v10309_v41  ;;  %4813 = vmatprep.subr.bf16.mxu0 %v10324_v59 }
0x12e7   :  { %4814 = vmatpush1.bf16.msra.mxu0 %v10327_v61 }
0x12e8   :  { %4815 = vmatprep.subr.bf16.mxu0 %v10331_v55 }
0x12eb   :  { %4816 = vmatpush1.bf16.msra.mxu0 %v10334_v40 }
0x12ec   :  { %4817 = vmatprep.subr.bf16.mxu0 %v10338_v50 }
0x12ee   :  { %v9064_v42 = vpop.eup %9063 }
0x12ef   :  { %v4517_v8 = vmul.f32 %v9064_v42, %v4512_v39  ;;  %v10341_v39 = vld [vmem:[#allocation7 + $0xa8] ss:$12 sps:$4 sm:$0xff]   ;;  %v8813_v42 = vld [vmem:[#allocation7 + $0xb0] ss:$12 sps:$4 sm:$0xff]  }
0x12f0   :  { %4818 = vmatpush1.bf16.msra.mxu0 %v10341_v39 }
0x12f1   :  { %v4518_v16 = vpack.c.bf16 %v4517_v8, %v4517_v8  ;;  %5087 = vmatprep.subr.bf16.mxu0 %v10163_v53  ;;  %v4658_v53 = vld [vmem:[%s10769_s8] sm:$0x7] }
0x12f3   :  { %8216 = vmatmul.mubr.bf16.vlgmr.msra.gmra.mrb[60].mxu1 %v4518_v16 }
0x12f4   :  { %8220 = vmatpush3.bf16.msra.mxu1 %v8785_v13  ;;  %8235 = vmatprep.mubr.msk.bf16.mxu1 %vm9252_vm1, %v10803_v52  ;;  %v10350_v13 = vld [vmem:[%s10766_s5] ss:$0 sm:$0xff] }
0x12f5   :  { %8221 = vmatprep.subr.bf16.mxu1 %v10803_v52 }
0x12f8   :  { %8222 = vmatpush3.bf16.msra.mxu1 %v8789_v21 }
0x12f9   :  { %8223 = vmatprep.subr.bf16.mxu1 %v10803_v52 }
0x12fc   :  { %8224 = vmatpush3.bf16.msra.mxu1 %v8793_v57 }
0x12fd   :  { %8225 = vmatprep.subr.bf16.mxu1 %v10803_v52 }
0x1300   :  { %8226 = vmatpush3.bf16.msra.mxu1 %v8797_v38 }
0x1301   :  { %8227 = vmatprep.subr.bf16.mxu1 %v10803_v52 }
0x1304   :  { %8228 = vmatpush3.bf16.msra.mxu1 %v8801_v45 }
0x1305   :  { %8229 = vmatprep.subr.bf16.mxu1 %v10803_v52 }
0x1308   :  { %8230 = vmatpush3.bf16.msra.mxu1 %v8805_v10 }
0x1309   :  { %8231 = vmatprep.subr.bf16.mxu1 %v10803_v52 }
0x130c   :  { %8232 = vmatpush3.bf16.msra.mxu1 %v8809_v30 }
0x130d   :  { %8233 = vmatprep.subr.bf16.mxu1 %v10803_v52 }
0x1310   :  { %8234 = vmatpush3.bf16.msra.mxu1 %v8813_v42 }
0x1311   :  { %5128 = vmatprep.subr.bf16.mxu1 %v10165_v58  ;;  %v4663_v58 = vrot.slane %v4658_v53, %v9390_v25 }
0x13c6   :  { %v4617_v8 = vpop.f32.mrb[60].mxu1 }
0x13c7   :  { %v4623_v16 = vadd.f32 %v10350_v13, %v4617_v8  ;;  %v8217_v21 = vpop.f32.mrb[61].mxu1 }
0x13c8   :  { %v4620_v57 = vpop.f32.mrb[62].mxu1 }
0x13c9   :  { %9065 = vtanh.f32 %v4623_v16  ;;  %v8218_v38 = vpop.f32.mrb[63].mxu1 }
0x13d3   :  { %v9066_v45 = vpop.eup %9065 }
0x13d4   :  { %v4625_v10 = vpack.c.bf16 %v9066_v45, %v9066_v45 }
0x13d6   :  { %4836 = vmatmul.mubr.bf16.vlgmr.msra.gmra.mrb[72].mxu0 %v4625_v10  ;;  %8236 = vmatmul.mubr.bf16.vlgmr.msra.gmra.mrb[64].mxu1 %v4625_v10 }
0x13d7   :  { %5088 = vmatpush1.bf16.msra.mxu0 %v10170_v19  ;;  %5129 = vmatpush1.bf16.msra.mxu1 %v10172_v43  ;;  %v4671_v19 = vrot.slane %v4658_v53, %v9498_v18  ;;  %v4667_v43 = vrot.slane %v4658_v53, %v10811_v36 }
0x13d8   :  { %5089 = vmatprep.subr.bf16.mxu0 %v10174_v44  ;;  %5130 = vmatprep.subr.bf16.mxu1 %v10176_v33 }
0x13d9   :  { %5119 = vmatprep.mubr.bf16.mxu0 %v10799_v46  ;;  %5160 = vmatprep.mubr.bf16.mxu1 %v10799_v46 }
0x13db   :  { %5090 = vmatpush1.bf16.msra.mxu0 %v10180_v22  ;;  %5131 = vmatpush1.bf16.msra.mxu1 %v10182_v28 }
0x13dc   :  { %5091 = vmatprep.subr.bf16.mxu0 %v10190_v11  ;;  %5132 = vmatprep.subr.bf16.mxu1 %v10192_v12 }
0x13df   :  { %5092 = vmatpush1.bf16.msra.mxu0 %v10194_v14  ;;  %5133 = vmatpush1.bf16.msra.mxu1 %v10196_v15 }
0x13e0   :  { %5093 = vmatprep.subr.bf16.mxu0 %v10202_v17  ;;  %5134 = vmatprep.subr.bf16.mxu1 %v10204_v27 }
0x13e3   :  { %5094 = vmatpush1.bf16.msra.mxu0 %v10206_v2  ;;  %5135 = vmatpush1.bf16.msra.mxu1 %v10208_v26 }
0x13e4   :  { %5095 = vmatprep.subr.bf16.mxu0 %v10214_v32  ;;  %5136 = vmatprep.subr.bf16.mxu1 %v10216_v37 }
0x13e7   :  { %5096 = vmatpush1.bf16.msra.mxu0 %v10218_v60  ;;  %5137 = vmatpush1.bf16.msra.mxu1 %v10220_v6 }
0x13e8   :  { %5097 = vmatprep.subr.bf16.mxu0 %v10226_v35  ;;  %5138 = vmatprep.subr.bf16.mxu1 %v10228_v56 }
0x13eb   :  { %5098 = vmatpush1.bf16.msra.mxu0 %v10230_v62  ;;  %5139 = vmatpush1.bf16.msra.mxu1 %v10232_v24 }
0x13ec   :  { %5099 = vmatprep.subr.bf16.mxu0 %v10238_v4  ;;  %5140 = vmatprep.subr.bf16.mxu1 %v10240_v63  ;;  %v10819_v4 = vld [vmem:[#allocation15_spill] sm:$0xff]  ;;  %v10820_v63 = vld [vmem:[#allocation16_spill] sm:$0xff] }
0x13ef   :  { %5100 = vmatpush1.bf16.msra.mxu0 %v10242_v1  ;;  %5141 = vmatpush1.bf16.msra.mxu1 %v10244_v34  ;;  %v10821_v1 = vld [vmem:[#allocation17_spill] sm:$0xff] }
0x13f0   :  { %5101 = vmatprep.subr.bf16.mxu0 %v10248_v29  ;;  %5142 = vmatprep.subr.bf16.mxu1 %v10256_v23  ;;  %v8814_v34 = vld [vmem:[#allocation5] sm:$0xff]   ;;  %v8815_v29 = vld [vmem:[#allocation5 + $0x8] sm:$0xff]  }
0x13f1   :  { %v8818_v23 = vld [vmem:[#allocation5 + $0x20] sm:$0xff]  }
0x13f3   :  { %5102 = vmatpush1.bf16.msra.mxu0 %v10252_v3  ;;  %5143 = vmatpush1.bf16.msra.mxu1 %v10254_v20  ;;  %v8816_v3 = vld [vmem:[#allocation5 + $0x10] sm:$0xff]   ;;  %v8817_v20 = vld [vmem:[#allocation5 + $0x18] sm:$0xff]  }
0x13f4   :  { %8239 = vmatprep.subr.bf16.mxu0 %v10803_v52  ;;  %5473 = vmatprep.subr.bf16.mxu1 %v10282_v51  ;;  %v8820_v51 = vld [vmem:[#allocation5 + $0x30] sm:$0xff]  }
0x14a9   :  { %v4837_v44 = vpop.f32.mrb[72].mxu0  ;;  %v4878_v33 = vpop.f32.mrb[64].mxu1 }
0x14aa   :  { %v4838_v22 = vadd.f32 %v4837_v44, %v4663_v58  ;;  %v4879_v28 = vadd.f32 %v4878_v33, %v4671_v19  ;;  %v4839_v11 = vpop.f32.mrb[73].mxu0  ;;  %v8237_v12 = vpop.f32.mrb[65].mxu1 }
0x14ab   :  { %v4840_v14 = vadd.f32 %v4839_v11, %v4667_v43  ;;  %v4841_v15 = vpop.f32.mrb[74].mxu0  ;;  %v4881_v17 = vpop.f32.mrb[66].mxu1  ;;  %v8822_v12 = vld [vmem:[#allocation7 + $0x8] ss:$12 sps:$4 sm:$0xff]  }
0x14ac   :  { %9067 = vtanh.f32 %v4838_v22  ;;  %v4842_v27 = vpop.f32.mrb[75].mxu0  ;;  %v8238_v2 = vpop.f32.mrb[67].mxu1  ;;  %v8823_v15 = vld [vmem:[#allocation7 + $0x20] ss:$12 sps:$4 sm:$0xff]   ;;  %v8825_v17 = vld [vmem:[#allocation7 + $0x50] ss:$12 sps:$4 sm:$0xff]  }
0x14ad   :  { %9069 = vtanh.f32 %v4879_v28  ;;  %v8826_v27 = vld [vmem:[#allocation7 + $0x68] ss:$12 sps:$4 sm:$0xff]   ;;  %v8827_v2 = vld [vmem:[#allocation7 + $0x80] ss:$12 sps:$4 sm:$0xff]  }
0x14ae   :  { %9071 = vtanh.f32 %v4840_v14 }
0x14b6   :  { %v9068_v26 = vpop.eup %9067 }
0x14b7   :  { %v9070_v32 = vpop.eup %9069 }
0x14b8   :  { %v9072_v37 = vpop.eup %9071  ;;  %v4887_v60 = vmul.f32 0.5, %v9070_v32  ;;  %v8829_v32 = vld [vmem:[#allocation7 + $0xb0] ss:$12 sps:$4 sm:$0xff]  }
0x14b9   :  { %v4889_v6 = vsub.f32 %v9072_v37, %v9068_v26  ;;  %v10436_v37 = vld [vmem:[#allocation3 + $0x4] ss:$16 sps:$4 sm:$0xff]  }
0x14ba   :  { %v4888_v35 = vadd.f32 0.5, %v4887_v60  ;;  %v10438_v60 = vld [vmem:[#allocation3 + $0xc] ss:$16 sps:$4 sm:$0xff]  }
0x14bc   :  { %v4890_v56 = vmul.f32 %v4889_v6, %v4888_v35 }
0x14be   :  { %v4891_v62 = vadd.f32 %v9068_v26, %v4890_v56  ;;  %v8828_v26 = vld [vmem:[#allocation7 + $0x98] ss:$12 sps:$4 sm:$0xff]  }
0x14c0   :  { %v4892_v24 = vpack.c.bf16 %v4891_v62, %v4891_v62 }
0x14c2   :  { %4894 = vst [vmem:[#allocation2 + $0x18] sm:$0xf] %v4892_v24  ;;  %5120 = vmatmul.mubr.bf16.vlgmr.msra.gmra.mrb[76].mxu0 %v4892_v24  ;;  %5161 = vmatmul.mubr.bf16.vlgmr.msra.gmra.mrb[68].mxu1 %v4892_v24 }
0x14c3   :  { %8255 = vmatprep.mubr.msk.bf16.mxu0 %vm9252_vm1, %v10803_v52  ;;  %5474 = vmatpush1.bf16.msra.mxu1 %v10280_v49  ;;  %v8819_v49 = vld [vmem:[#allocation5 + $0x28] sm:$0xff]  }
0x14c4   :  { %5475 = vmatprep.subr.bf16.mxu1 %v10284_v48  ;;  %5505 = vmatprep.mubr.bf16.mxu1 %v10799_v46  ;;  %v8821_v48 = vld [vmem:[#allocation5 + $0x38] sm:$0xff]  }
0x14c5   :  { %8240 = vmatpush3.bf16.msra.mxu0 %v8814_v34 }
0x14c6   :  { %8241 = vmatprep.subr.bf16.mxu0 %v10803_v52 }
0x14c7   :  { %5476 = vmatpush1.bf16.msra.mxu1 %v10288_v54 }
0x14c8   :  { %5477 = vmatprep.subr.bf16.mxu1 %v10291_v47 }
0x14c9   :  { %8242 = vmatpush3.bf16.msra.mxu0 %v8815_v29  ;;  %v10447_v29 = vld [vmem:[#allocation3 + $0x24] ss:$16 sps:$4 sm:$0xff]  }
0x14ca   :  { %8243 = vmatprep.subr.bf16.mxu0 %v10803_v52 }
0x14cb   :  { %5478 = vmatpush1.bf16.msra.mxu1 %v10819_v4 }
0x14cc   :  { %5479 = vmatprep.subr.bf16.mxu1 %v10820_v63  ;;  %v10443_v63 = vld [vmem:[#allocation3] ss:$16 sps:$4 sm:$0xff]  }
0x14cd   :  { %8244 = vmatpush3.bf16.msra.mxu0 %v8816_v3  ;;  %v10449_v3 = vld [vmem:[#allocation3 + $0x2c] ss:$16 sps:$4 sm:$0xff]  }
0x14ce   :  { %8245 = vmatprep.subr.bf16.mxu0 %v10803_v52 }
0x14cf   :  { %5480 = vmatpush1.bf16.msra.mxu1 %v10821_v1  ;;  %v10445_v1 = vld [vmem:[#allocation3 + $0x8] ss:$16 sps:$4 sm:$0xff]  }
0x14d0   :  { %5481 = vmatprep.subr.bf16.mxu1 %v10318_v9  ;;  %v10822_v9 = vld [vmem:[#allocation14_spill] sm:$0xff] }
0x14d1   :  { %8246 = vmatpush3.bf16.msra.mxu0 %v8817_v20  ;;  %v10453_v20 = vld [vmem:[#allocation3 + $0x20] ss:$16 sps:$4 sm:$0xff]  }
0x14d2   :  { %8247 = vmatprep.subr.bf16.mxu0 %v10803_v52 }
0x14d3   :  { %5482 = vmatpush1.bf16.msra.mxu1 %v10320_v0 }
0x14d4   :  { %5483 = vmatprep.subr.bf16.mxu1 %v10324_v59 }
0x14d5   :  { %8248 = vmatpush3.bf16.msra.mxu0 %v8818_v23  ;;  %v10455_v23 = vld [vmem:[#allocation3 + $0x28] ss:$16 sps:$4 sm:$0xff]  }
0x14d6   :  { %8249 = vmatprep.subr.bf16.mxu0 %v10803_v52 }
0x14d7   :  { %5484 = vmatpush1.bf16.msra.mxu1 %v10327_v61 }
0x14d8   :  { %5485 = vmatprep.subr.bf16.mxu1 %v10331_v55 }
0x14d9   :  { %8250 = vmatpush3.bf16.msra.mxu0 %v8819_v49  ;;  %v10463_v49 = vld [vmem:[#allocation3 + $0x44] ss:$16 sps:$4 sm:$0xff]  }
0x14da   :  { %8251 = vmatprep.subr.bf16.mxu0 %v10803_v52 }
0x14db   :  { %5486 = vmatpush1.bf16.msra.mxu1 %v10334_v40 }
0x14dc   :  { %5487 = vmatprep.subr.bf16.mxu1 %v10338_v50 }
0x14dd   :  { %8252 = vmatpush3.bf16.msra.mxu0 %v8820_v51  ;;  %v10465_v51 = vld [vmem:[#allocation3 + $0x4c] ss:$16 sps:$4 sm:$0xff]  }
0x14de   :  { %8253 = vmatprep.subr.bf16.mxu0 %v10803_v52 }
0x14df   :  { %5488 = vmatpush1.bf16.msra.mxu1 %v10341_v39 }
0x14e0   :  { %5757 = vmatprep.subr.bf16.mxu1 %v10436_v37 }
0x14e1   :  { %8254 = vmatpush3.bf16.msra.mxu0 %v8821_v48  ;;  %v10467_v48 = vld [vmem:[#allocation3 + $0x40] ss:$16 sps:$4 sm:$0xff]  }
0x14e2   :  { %8259 = vmatprep.subr.bf16.mxu0 %v10803_v52 }
0x1595   :  { %v5121_v54 = vpop.f32.mrb[76].mxu0  ;;  %v5162_v47 = vpop.f32.mrb[68].mxu1 }
0x1596   :  { %v5171_v0 = vadd.f32 %v5162_v47, %v10822_v9  ;;  %v5123_v59 = vpop.f32.mrb[77].mxu0  ;;  %v5164_v61 = vpop.f32.mrb[69].mxu1  ;;  %v5169_v42 = vadd.f32 %v5121_v54, %v9493_v7  ;;  %v10469_v54 = vld [vmem:[#allocation3 + $0x48] ss:$16 sps:$4 sm:$0xff]   ;;  %v10475_v47 = vld [vmem:[#allocation3 + $0x64] ss:$16 sps:$4 sm:$0xff]  }
0x1597   :  { %v5170_v55 = vadd.f32 %v5123_v59, %v9490_v5  ;;  %v5125_v40 = vpop.f32.mrb[78].mxu0  ;;  %v5166_v30 = vpop.f32.mrb[70].mxu1  ;;  %v5172_v8 = vadd.f32 %v5164_v61, %v9505_v31  ;;  %v10479_v59 = vld [vmem:[#allocation3 + $0x60] ss:$16 sps:$4 sm:$0xff]   ;;  %v10481_v61 = vld [vmem:[#allocation3 + $0x68] ss:$16 sps:$4 sm:$0xff]  }
0x1598   :  { %v5126_v50 = vpop.f32.mrb[79].mxu0  ;;  %v5167_v39 = vpop.f32.mrb[71].mxu1  ;;  %9073 = vtanh.f32 %v5171_v0  ;;  %v10477_v0 = vld [vmem:[#allocation3 + $0x6c] ss:$16 sps:$4 sm:$0xff]   ;;  %v10491_v30 = vld [vmem:[#allocation3 + $0x80] ss:$16 sps:$4 sm:$0xff]  }
0x1599   :  { %9075 = vtanh.f32 %v5170_v55  ;;  %v10487_v55 = vld [vmem:[#allocation3 + $0x84] ss:$16 sps:$4 sm:$0xff]   ;;  %v10489_v40 = vld [vmem:[#allocation3 + $0x8c] ss:$16 sps:$4 sm:$0xff]   ;;  %v10493_v50 = vld [vmem:[#allocation3 + $0x88] ss:$16 sps:$4 sm:$0xff]  }
0x159a   :  { %9077 = vtanh.f32 %v5169_v42  ;;  %v10499_v39 = vld [vmem:[#allocation3 + $0xa4] ss:$16 sps:$4 sm:$0xff]   ;;  %v10501_v42 = vld [vmem:[#allocation3 + $0xac] ss:$16 sps:$4 sm:$0xff]  }
0x159b   :  { %9079 = vtanh.f32 %v5172_v8  ;;  %v10503_v8 = vld [vmem:[#allocation3 + $0xa0] ss:$16 sps:$4 sm:$0xff]  }
0x15a2   :  { %v9074_v16 = vpop.eup %9073 }
0x15a3   :  { %v9076_v21 = vpop.eup %9075  ;;  %v5178_v57 = vmul.f32 0.5, %v9074_v16  ;;  %v10505_v16 = vld [vmem:[#allocation3 + $0xa8] ss:$16 sps:$4 sm:$0xff]  }
0x15a4   :  { %v5175_v38 = vmul.f32 0.5, %v9076_v21  ;;  %v9078_v53 = vpop.eup %9077  ;;  %v10511_v21 = vld [vmem:[#allocation3 + $0xc4] ss:$16 sps:$4 sm:$0xff]  }
0x15a5   :  { %v5179_v45 = vadd.f32 0.5, %v5178_v57  ;;  %v9080_v44 = vpop.eup %9079  ;;  %v10513_v57 = vld [vmem:[#allocation3 + $0xcc] ss:$16 sps:$4 sm:$0xff]  }
0x15a6   :  { %v5176_v10 = vadd.f32 0.5, %v5175_v38  ;;  %v5181_v33 = vmul.f32 0.5, %v9080_v44  ;;  %v10515_v38 = vld [vmem:[#allocation3 + $0xc0] ss:$16 sps:$4 sm:$0xff]   ;;  %v5328_v44 = vld [vmem:[%s10769_s8] sm:$0x7] }
0x15a7   :  { %v5183_v58 = vmul.f32 %v5179_v45, %v10309_v41  ;;  %v8824_v41 = vld [vmem:[#allocation7 + $0x38] ss:$12 sps:$4 sm:$0xff]  }
0x15a8   :  { %v5184_v19 = vmul.f32 %v9078_v53, %v5176_v10  ;;  %v5182_v22 = vadd.f32 0.5, %v5181_v33  ;;  %v10517_v45 = vld [vmem:[#allocation3 + $0xc8] ss:$16 sps:$4 sm:$0xff]   ;;  %v10521_v10 = vld [vmem:[#allocation3 + $0xe4] ss:$16 sps:$4 sm:$0xff]   ;;  %v5333_v33 = vrot.slane %v5328_v44, %v9390_v25 }
0x15a9   :  { %v10525_v53 = vld [vmem:[#allocation3 + $0xe0] ss:$16 sps:$4 sm:$0xff]  }
0x15aa   :  { %v10424_v43 = vadd.f32 %v5184_v19, %v5183_v58  ;;  %v10527_v58 = vld [vmem:[#allocation3 + $0xe8] ss:$16 sps:$4 sm:$0xff]   ;;  %v10529_v19 = vld [vmem:[#allocation3 + $0xec] ss:$16 sps:$4 sm:$0xff]  }
0x15ac   :  { %9081 = vtanh.f32 %v10424_v43 }
0x15b6   :  { %v9082_v28 = vpop.eup %9081 }
0x15b7   :  { %v5187_v11 = vmul.f32 %v9082_v28, %v5182_v22  ;;  %v5341_v22 = vrot.slane %v5328_v44, %v9498_v18  ;;  %v5337_v28 = vrot.slane %v5328_v44, %v10811_v36 }
0x15b9   :  { %v5188_v14 = vpack.c.bf16 %v5187_v11, %v5187_v11 }
0x15bb   :  { %8256 = vmatmul.mubr.bf16.vlgmr.msra.gmra.mrb[80].mxu0 %v5188_v14 }
0x15bc   :  { %8260 = vmatpush3.bf16.msra.mxu0 %v8822_v12  ;;  %8275 = vmatprep.mubr.msk.bf16.mxu0 %vm9252_vm1, %v10803_v52 }
0x15bd   :  { %8261 = vmatprep.subr.bf16.mxu0 %v10803_v52 }
0x15c0   :  { %8262 = vmatpush3.bf16.msra.mxu0 %v8823_v15 }
0x15c1   :  { %8263 = vmatprep.subr.bf16.mxu0 %v10803_v52 }
0x15c4   :  { %8264 = vmatpush3.bf16.msra.mxu0 %v8824_v41 }
0x15c5   :  { %8265 = vmatprep.subr.bf16.mxu0 %v10803_v52 }
0x15c8   :  { %8266 = vmatpush3.bf16.msra.mxu0 %v8825_v17 }
0x15c9   :  { %8267 = vmatprep.subr.bf16.mxu0 %v10803_v52 }
0x15cc   :  { %8268 = vmatpush3.bf16.msra.mxu0 %v8826_v27 }
0x15cd   :  { %8269 = vmatprep.subr.bf16.mxu0 %v10803_v52 }
0x15d0   :  { %8270 = vmatpush3.bf16.msra.mxu0 %v8827_v2 }
0x15d1   :  { %8271 = vmatprep.subr.bf16.mxu0 %v10803_v52 }
0x15d4   :  { %8272 = vmatpush3.bf16.msra.mxu0 %v8828_v26 }
0x15d5   :  { %8273 = vmatprep.subr.bf16.mxu0 %v10803_v52 }
0x15d8   :  { %8274 = vmatpush3.bf16.msra.mxu0 %v8829_v32 }
0x15d9   :  { %5798 = vmatprep.subr.bf16.mxu0 %v10438_v60 }
0x168e   :  { %v5287_v6 = vpop.f32.mrb[80].mxu0 }
0x168f   :  { %v5293_v35 = vadd.f32 %v10350_v13, %v5287_v6  ;;  %v8257_v56 = vpop.f32.mrb[81].mxu0 }
0x1690   :  { %v5290_v62 = vpop.f32.mrb[82].mxu0 }
0x1691   :  { %9083 = vtanh.f32 %v5293_v35  ;;  %v8258_v24 = vpop.f32.mrb[83].mxu0 }
0x169b   :  { %v9084_v4 = vpop.eup %9083 }
0x169c   :  { %v5295_v34 = vpack.c.bf16 %v9084_v4, %v9084_v4 }
0x169e   :  { %5506 = vmatmul.mubr.bf16.vlgmr.msra.gmra.mrb[72].mxu1 %v5295_v34  ;;  %8276 = vmatmul.mubr.bf16.vlgmr.msra.gmra.mrb[84].mxu0 %v5295_v34 }
0x169f   :  { %5758 = vmatpush1.bf16.msra.mxu1 %v10443_v63  ;;  %5799 = vmatpush1.bf16.msra.mxu0 %v10445_v1 }
0x16a0   :  { %5759 = vmatprep.subr.bf16.mxu1 %v10447_v29  ;;  %5800 = vmatprep.subr.bf16.mxu0 %v10449_v3 }
0x16a1   :  { %5789 = vmatprep.mubr.bf16.mxu1 %v10799_v46  ;;  %5830 = vmatprep.mubr.bf16.mxu0 %v10799_v46 }
0x16a3   :  { %5760 = vmatpush1.bf16.msra.mxu1 %v10453_v20  ;;  %5801 = vmatpush1.bf16.msra.mxu0 %v10455_v23 }
0x16a4   :  { %5761 = vmatprep.subr.bf16.mxu1 %v10463_v49  ;;  %5802 = vmatprep.subr.bf16.mxu0 %v10465_v51 }
0x16a7   :  { %5762 = vmatpush1.bf16.msra.mxu1 %v10467_v48  ;;  %5803 = vmatpush1.bf16.msra.mxu0 %v10469_v54 }
0x16a8   :  { %5763 = vmatprep.subr.bf16.mxu1 %v10475_v47  ;;  %5804 = vmatprep.subr.bf16.mxu0 %v10477_v0 }
0x16ab   :  { %5764 = vmatpush1.bf16.msra.mxu1 %v10479_v59  ;;  %5805 = vmatpush1.bf16.msra.mxu0 %v10481_v61 }
0x16ac   :  { %5765 = vmatprep.subr.bf16.mxu1 %v10487_v55  ;;  %5806 = vmatprep.subr.bf16.mxu0 %v10489_v40 }
0x16af   :  { %5766 = vmatpush1.bf16.msra.mxu1 %v10491_v30  ;;  %5807 = vmatpush1.bf16.msra.mxu0 %v10493_v50 }
0x16b0   :  { %5767 = vmatprep.subr.bf16.mxu1 %v10499_v39  ;;  %5808 = vmatprep.subr.bf16.mxu0 %v10501_v42 }
0x16b3   :  { %5768 = vmatpush1.bf16.msra.mxu1 %v10503_v8  ;;  %5809 = vmatpush1.bf16.msra.mxu0 %v10505_v16 }
0x16b4   :  { %5769 = vmatprep.subr.bf16.mxu1 %v10511_v21  ;;  %5810 = vmatprep.subr.bf16.mxu0 %v10513_v57 }
0x16b7   :  { %5770 = vmatpush1.bf16.msra.mxu1 %v10515_v38  ;;  %5811 = vmatpush1.bf16.msra.mxu0 %v10517_v45 }
0x16b8   :  { %5771 = vmatprep.subr.bf16.mxu1 %v10521_v10  ;;  %5812 = vmatprep.subr.bf16.mxu0 %v10529_v19 }
0x16bb   :  { %5772 = vmatpush1.bf16.msra.mxu1 %v10525_v53  ;;  %5813 = vmatpush1.bf16.msra.mxu0 %v10527_v58 }
0x16bc   :  { %8279 = vmatprep.subr.bf16.mxu1 %v10803_v52 }
0x1771   :  { %v5507_v11 = vpop.f32.mrb[72].mxu1  ;;  %v5548_v12 = vpop.f32.mrb[84].mxu0 }
0x1772   :  { %v5508_v14 = vadd.f32 %v5507_v11, %v5333_v33  ;;  %v5549_v15 = vadd.f32 %v5548_v12, %v5341_v22  ;;  %v5509_v41 = vpop.f32.mrb[73].mxu1  ;;  %v8277_v17 = vpop.f32.mrb[85].mxu0  ;;  %v8878_v22 = vld [vmem:[#allocation5] sm:$0xff]   ;;  %v8880_v11 = vld [vmem:[#allocation5 + $0x10] sm:$0xff]  }
0x1773   :  { %v5510_v27 = vadd.f32 %v5509_v41, %v5337_v28  ;;  %v5511_v2 = vpop.f32.mrb[74].mxu1  ;;  %v5551_v26 = vpop.f32.mrb[86].mxu0  ;;  %v8879_v28 = vld [vmem:[#allocation5 + $0x8] sm:$0xff]   ;;  %v8882_v12 = vld [vmem:[#allocation5 + $0x20] sm:$0xff]   ;;  %v8885_v41 = vld [vmem:[#allocation5 + $0x38] sm:$0xff]  }
0x1774   :  { %9085 = vtanh.f32 %v5508_v14  ;;  %v5512_v32 = vpop.f32.mrb[75].mxu1  ;;  %v8278_v6 = vpop.f32.mrb[87].mxu0  ;;  %v8883_v14 = vld [vmem:[#allocation5 + $0x28] sm:$0xff]   ;;  %v10561_v26 = vld [vmem:[#allocation7 + $0x18] ss:$12 sps:$4 sm:$0xff]  }
0x1775   :  { %9087 = vtanh.f32 %v5549_v15  ;;  %v8884_v15 = vld [vmem:[#allocation5 + $0x30] sm:$0xff]   ;;  %v10553_v17 = vld [vmem:[#allocation7] ss:$12 sps:$4 sm:$0xff]   ;;  %v10557_v2 = vld [vmem:[#allocation7 + $0x1c] ss:$12 sps:$4 sm:$0xff]  }
0x1776   :  { %9089 = vtanh.f32 %v5510_v27  ;;  %v10555_v27 = vld [vmem:[#allocation7 + $0x4] ss:$12 sps:$4 sm:$0xff]   ;;  %v10564_v32 = vld [vmem:[#allocation7 + $0x34] ss:$12 sps:$4 sm:$0xff]  }
0x1777   :  { %6143 = vmatprep.subr.bf16.mxu0 %v10555_v27  ;;  %v10567_v6 = vld [vmem:[#allocation7 + $0x30] ss:$12 sps:$4 sm:$0xff]  }
0x1778   :  { %10823 = vst [vmem:[#allocation15_spill] sm:$0xff] %v10567_v6 }
0x177e   :  { %v9086_v35 = vpop.eup %9085 }
0x177f   :  { %v9088_v56 = vpop.eup %9087 }
0x1780   :  { %v9090_v62 = vpop.eup %9089  ;;  %v5557_v24 = vmul.f32 0.5, %v9088_v56  ;;  %v10573_v56 = vld [vmem:[#allocation7 + $0x48] ss:$12 sps:$4 sm:$0xff]  }
0x1781   :  { %v5559_v4 = vsub.f32 %v9090_v62, %v9086_v35  ;;  %10825 = vst [vmem:[#allocation17_spill] sm:$0xff] %v10573_v56 }
0x1782   :  { %v5558_v34 = vadd.f32 0.5, %v5557_v24 }
0x1784   :  { %v5560_v44 = vmul.f32 %v5559_v4, %v5558_v34 }
0x1786   :  { %v5561_v36 = vadd.f32 %v9086_v35, %v5560_v44  ;;  %v10570_v35 = vld [vmem:[#allocation7 + $0x4c] ss:$12 sps:$4 sm:$0xff]  }
0x1787   :  { %10824 = vst [vmem:[#allocation16_spill] sm:$0xff] %v10570_v35 }
0x1788   :  { %v5562_v33 = vpack.c.bf16 %v5561_v36, %v5561_v36  ;;  %v8881_v36 = vld [vmem:[#allocation5 + $0x18] sm:$0xff]  }
0x178a   :  { %5564 = vst [vmem:[#allocation2 + $0x1c] sm:$0xf] %v5562_v33  ;;  %5790 = vmatmul.mubr.bf16.vlgmr.msra.gmra.mrb[76].mxu1 %v5562_v33  ;;  %5831 = vmatmul.mubr.bf16.vlgmr.msra.gmra.mrb[88].mxu0 %v5562_v33 }
0x178b   :  { %8295 = vmatprep.mubr.msk.bf16.mxu1 %vm9252_vm1, %v10803_v52  ;;  %6175 = vmatprep.mubr.bf16.mxu0 %v10799_v46 }
0x178c   :  { %8280 = vmatpush3.bf16.msra.mxu1 %v8878_v22  ;;  %6144 = vmatpush1.bf16.msra.mxu0 %v10553_v17 }
0x178d   :  { %8281 = vmatprep.subr.bf16.mxu1 %v10803_v52  ;;  %6145 = vmatprep.subr.bf16.mxu0 %v10557_v2 }
0x1790   :  { %8282 = vmatpush3.bf16.msra.mxu1 %v8879_v28  ;;  %6146 = vmatpush1.bf16.msra.mxu0 %v10561_v26 }
0x1791   :  { %8283 = vmatprep.subr.bf16.mxu1 %v10803_v52  ;;  %6147 = vmatprep.subr.bf16.mxu0 %v10564_v32 }
0x1794   :  { %8284 = vmatpush3.bf16.msra.mxu1 %v8880_v11  ;;  %6148 = vmatpush1.bf16.msra.mxu0 %v10567_v6 }
0x1795   :  { %8285 = vmatprep.subr.bf16.mxu1 %v10803_v52  ;;  %6149 = vmatprep.subr.bf16.mxu0 %v10570_v35 }
0x1798   :  { %8286 = vmatpush3.bf16.msra.mxu1 %v8881_v36  ;;  %6150 = vmatpush1.bf16.msra.mxu0 %v10573_v56 }
0x1799   :  { %8287 = vmatprep.subr.bf16.mxu1 %v10803_v52 }
0x179c   :  { %8288 = vmatpush3.bf16.msra.mxu1 %v8882_v12 }
0x179d   :  { %8289 = vmatprep.subr.bf16.mxu1 %v10803_v52 }
0x17a0   :  { %8290 = vmatpush3.bf16.msra.mxu1 %v8883_v14 }
0x17a1   :  { %8291 = vmatprep.subr.bf16.mxu1 %v10803_v52 }
0x17a4   :  { %8292 = vmatpush3.bf16.msra.mxu1 %v8884_v15 }
0x17a5   :  { %8293 = vmatprep.subr.bf16.mxu1 %v10803_v52 }
0x17a8   :  { %8294 = vmatpush3.bf16.msra.mxu1 %v8885_v41 }
0x17a9   :  { %8299 = vmatprep.subr.bf16.mxu1 %v10803_v52 }
0x185d   :  { %v5791_v62 = vpop.f32.mrb[76].mxu1  ;;  %v5832_v24 = vpop.f32.mrb[88].mxu0 }
0x185e   :  { %v5841_v4 = vadd.f32 %v5832_v24, %v10822_v9  ;;  %v5793_v34 = vpop.f32.mrb[77].mxu1  ;;  %v5834_v44 = vpop.f32.mrb[89].mxu0  ;;  %v5839_v12 = vadd.f32 %v5791_v62, %v9493_v7 }
0x185f   :  { %v5840_v33 = vadd.f32 %v5793_v34, %v9490_v5  ;;  %v5795_v22 = vpop.f32.mrb[78].mxu1  ;;  %v5836_v28 = vpop.f32.mrb[90].mxu0  ;;  %v5842_v14 = vadd.f32 %v5834_v44, %v9505_v31 }
0x1860   :  { %v5796_v11 = vpop.f32.mrb[79].mxu1  ;;  %v5837_v36 = vpop.f32.mrb[91].mxu0  ;;  %9091 = vtanh.f32 %v5841_v4 }
0x1861   :  { %9093 = vtanh.f32 %v5840_v33  ;;  %v8889_v36 = vld [vmem:[#allocation7 + $0x8] ss:$12 sps:$4 sm:$0xff]  }
0x1862   :  { %9095 = vtanh.f32 %v5839_v12 }
0x1863   :  { %9097 = vtanh.f32 %v5842_v14  ;;  %v8893_v14 = vld [vmem:[#allocation7 + $0x20] ss:$12 sps:$4 sm:$0xff]  }
0x186a   :  { %v9092_v15 = vpop.eup %9091 }
0x186b   :  { %v9094_v41 = vpop.eup %9093  ;;  %v5848_v56 = vmul.f32 0.5, %v9092_v15  ;;  %v10597_v15 = vld [vmem:[#allocation7 + $0x7c] ss:$12 sps:$4 sm:$0xff]  }
0x186c   :  { %v5845_v35 = vmul.f32 0.5, %v9094_v41  ;;  %v9096_v6 = vpop.eup %9095  ;;  %v10600_v41 = vld [vmem:[#allocation7 + $0x78] ss:$12 sps:$4 sm:$0xff]  }
0x186d   :  { %v5849_v24 = vadd.f32 0.5, %v5848_v56  ;;  %v9098_v62 = vpop.eup %9097  ;;  %v8905_v56 = vld [vmem:[#allocation7 + $0x68] ss:$12 sps:$4 sm:$0xff]  }
0x186e   :  { %v5846_v9 = vadd.f32 0.5, %v5845_v35  ;;  %v5851_v4 = vmul.f32 0.5, %v9098_v62  ;;  %v10593_v35 = vld [vmem:[#allocation7 + $0x60] ss:$12 sps:$4 sm:$0xff]   ;;  %v8913_v62 = vld [vmem:[#allocation7 + $0x98] ss:$12 sps:$4 sm:$0xff]  }
0x186f   :  { %v5853_v34 = vmul.f32 %v5849_v24, %v10424_v43  ;;  %v8901_v43 = vld [vmem:[#allocation7 + $0x50] ss:$12 sps:$4 sm:$0xff]   ;;  %v8909_v24 = vld [vmem:[#allocation7 + $0x80] ss:$12 sps:$4 sm:$0xff]  }
0x1870   :  { %v5854_v22 = vmul.f32 %v9096_v6, %v5846_v9  ;;  %v5852_v33 = vadd.f32 0.5, %v5851_v4  ;;  %v8897_v9 = vld [vmem:[#allocation7 + $0x38] ss:$12 sps:$4 sm:$0xff]  }
0x1871   :  { %v10591_v6 = vld [vmem:[#allocation7 + $0x64] ss:$12 sps:$4 sm:$0xff]   ;;  %v10611_v4 = vld [vmem:[#allocation7 + $0xac] ss:$12 sps:$4 sm:$0xff]  }
0x1872   :  { %v10582_v28 = vadd.f32 %v5854_v22, %v5853_v34  ;;  %6151 = vmatprep.subr.bf16.mxu0 %v10591_v6  ;;  %v10604_v34 = vld [vmem:[#allocation7 + $0x94] ss:$12 sps:$4 sm:$0xff]   ;;  %v10607_v22 = vld [vmem:[#allocation7 + $0x90] ss:$12 sps:$4 sm:$0xff]  }
0x1873   :  { %6152 = vmatpush1.bf16.msra.mxu0 %v10593_v35 }
0x1874   :  { %9099 = vtanh.f32 %v10582_v28  ;;  %6153 = vmatprep.subr.bf16.mxu0 %v10597_v15 }
0x1877   :  { %6154 = vmatpush1.bf16.msra.mxu0 %v10600_v41 }
0x1878   :  { %6155 = vmatprep.subr.bf16.mxu0 %v10604_v34 }
0x187b   :  { %6156 = vmatpush1.bf16.msra.mxu0 %v10607_v22 }
0x187c   :  { %6157 = vmatprep.subr.bf16.mxu0 %v10611_v4 }
0x187e   :  { %v9100_v11 = vpop.eup %9099 }
0x187f   :  { %v5857_v44 = vmul.f32 %v9100_v11, %v5852_v33  ;;  %v10614_v33 = vld [vmem:[#allocation7 + $0xa8] ss:$12 sps:$4 sm:$0xff]   ;;  %v8917_v11 = vld [vmem:[#allocation7 + $0xb0] ss:$12 sps:$4 sm:$0xff]  }
0x1880   :  { %6158 = vmatpush1.bf16.msra.mxu0 %v10614_v33 }
0x1881   :  { %v5858_v12 = vpack.c.bf16 %v5857_v44, %v5857_v44  ;;  %6427 = vmatprep.subr.bf16.mxu0 %v10436_v37 }
0x1883   :  { %8296 = vmatmul.mubr.bf16.vlgmr.msra.gmra.mrb[80].mxu1 %v5858_v12 }
0x1884   :  { %8300 = vmatpush3.bf16.msra.mxu1 %v8889_v36  ;;  %8315 = vmatprep.mubr.msk.bf16.mxu1 %vm9252_vm1, %v10803_v52 }
0x1885   :  { %8301 = vmatprep.subr.bf16.mxu1 %v10803_v52 }
0x1888   :  { %8302 = vmatpush3.bf16.msra.mxu1 %v8893_v14 }
0x1889   :  { %8303 = vmatprep.subr.bf16.mxu1 %v10803_v52 }
0x188c   :  { %8304 = vmatpush3.bf16.msra.mxu1 %v8897_v9 }
0x188d   :  { %8305 = vmatprep.subr.bf16.mxu1 %v10803_v52 }
0x1890   :  { %8306 = vmatpush3.bf16.msra.mxu1 %v8901_v43 }
0x1891   :  { %8307 = vmatprep.subr.bf16.mxu1 %v10803_v52 }
0x1894   :  { %8308 = vmatpush3.bf16.msra.mxu1 %v8905_v56 }
0x1895   :  { %8309 = vmatprep.subr.bf16.mxu1 %v10803_v52 }
0x1898   :  { %8310 = vmatpush3.bf16.msra.mxu1 %v8909_v24 }
0x1899   :  { %8311 = vmatprep.subr.bf16.mxu1 %v10803_v52 }
0x189c   :  { %8312 = vmatpush3.bf16.msra.mxu1 %v8913_v62 }
0x189d   :  { %8313 = vmatprep.subr.bf16.mxu1 %v10803_v52 }
0x18a0   :  { %8314 = vmatpush3.bf16.msra.mxu1 %v8917_v11 }
0x18a1   :  { %6468 = vmatprep.subr.bf16.mxu1 %v10438_v60 }
0x1956   :  { %v5957_v44 = vpop.f32.mrb[80].mxu1 }
0x1957   :  { %v5963_v36 = vadd.f32 %v10350_v13, %v5957_v44  ;;  %v8297_v12 = vpop.f32.mrb[81].mxu1  ;;  %v5998_v13 = vld [vmem:[%s10769_s8] sm:$0x7] }
0x1958   :  { %v5960_v14 = vpop.f32.mrb[82].mxu1  ;;  %v6003_v37 = vrot.slane %v5998_v13, %v9390_v25  ;;  %v6011_v60 = vrot.slane %v5998_v13, %v9498_v18 }
0x1959   :  { %9101 = vtanh.f32 %v5963_v36  ;;  %v8298_v9 = vpop.f32.mrb[83].mxu1 }
0x1963   :  { %v9102_v43 = vpop.eup %9101 }
0x1964   :  { %v5965_v56 = vpack.c.bf16 %v9102_v43, %v9102_v43 }
0x1966   :  { %6176 = vmatmul.mubr.bf16.vlgmr.msra.gmra.mrb[92].mxu0 %v5965_v56  ;;  %8316 = vmatmul.mubr.bf16.vlgmr.msra.gmra.mrb[84].mxu1 %v5965_v56 }
0x1967   :  { %6428 = vmatpush1.bf16.msra.mxu0 %v10443_v63  ;;  %6469 = vmatpush1.bf16.msra.mxu1 %v10445_v1  ;;  %v10826_v63 = vld [vmem:[#allocation13_spill] sm:$0xff] }
0x1968   :  { %6429 = vmatprep.subr.bf16.mxu0 %v10447_v29  ;;  %6470 = vmatprep.subr.bf16.mxu1 %v10449_v3  ;;  %v6007_v1 = vrot.slane %v5998_v13, %v10826_v63 }
0x1969   :  { %6459 = vmatprep.mubr.bf16.mxu0 %v10799_v46  ;;  %6500 = vmatprep.mubr.bf16.mxu1 %v10799_v46 }
0x196b   :  { %6430 = vmatpush1.bf16.msra.mxu0 %v10453_v20  ;;  %6471 = vmatpush1.bf16.msra.mxu1 %v10455_v23 }
0x196c   :  { %6431 = vmatprep.subr.bf16.mxu0 %v10463_v49  ;;  %6472 = vmatprep.subr.bf16.mxu1 %v10465_v51 }
0x196f   :  { %6432 = vmatpush1.bf16.msra.mxu0 %v10467_v48  ;;  %6473 = vmatpush1.bf16.msra.mxu1 %v10469_v54 }
0x1970   :  { %6433 = vmatprep.subr.bf16.mxu0 %v10475_v47  ;;  %6474 = vmatprep.subr.bf16.mxu1 %v10477_v0 }
0x1973   :  { %6434 = vmatpush1.bf16.msra.mxu0 %v10479_v59  ;;  %6475 = vmatpush1.bf16.msra.mxu1 %v10481_v61 }
0x1974   :  { %6435 = vmatprep.subr.bf16.mxu0 %v10487_v55  ;;  %6476 = vmatprep.subr.bf16.mxu1 %v10489_v40 }
0x1977   :  { %6436 = vmatpush1.bf16.msra.mxu0 %v10491_v30  ;;  %6477 = vmatpush1.bf16.msra.mxu1 %v10493_v50 }
0x1978   :  { %6437 = vmatprep.subr.bf16.mxu0 %v10499_v39  ;;  %6478 = vmatprep.subr.bf16.mxu1 %v10501_v42 }
0x197b   :  { %6438 = vmatpush1.bf16.msra.mxu0 %v10503_v8  ;;  %6479 = vmatpush1.bf16.msra.mxu1 %v10505_v16 }
0x197c   :  { %6439 = vmatprep.subr.bf16.mxu0 %v10511_v21  ;;  %6480 = vmatprep.subr.bf16.mxu1 %v10513_v57  ;;  %v10827_v21 = vld [vmem:[#allocation15_spill] sm:$0xff]  ;;  %v10828_v57 = vld [vmem:[#allocation16_spill] sm:$0xff] }
0x197f   :  { %6440 = vmatpush1.bf16.msra.mxu0 %v10515_v38  ;;  %6481 = vmatpush1.bf16.msra.mxu1 %v10517_v45  ;;  %v10829_v38 = vld [vmem:[#allocation17_spill] sm:$0xff]  ;;  %v8919_v45 = vld [vmem:[#allocation5 + $0x8] sm:$0xff]  }
0x1980   :  { %6441 = vmatprep.subr.bf16.mxu0 %v10521_v10  ;;  %6482 = vmatprep.subr.bf16.mxu1 %v10529_v19  ;;  %v8920_v10 = vld [vmem:[#allocation5 + $0x10] sm:$0xff]   ;;  %v8923_v19 = vld [vmem:[#allocation5 + $0x28] sm:$0xff]  }
0x1983   :  { %6442 = vmatpush1.bf16.msra.mxu0 %v10525_v53  ;;  %6483 = vmatpush1.bf16.msra.mxu1 %v10527_v58  ;;  %v8921_v53 = vld [vmem:[#allocation5 + $0x18] sm:$0xff]   ;;  %v8922_v58 = vld [vmem:[#allocation5 + $0x20] sm:$0xff]  }
0x1984   :  { %8319 = vmatprep.subr.bf16.mxu0 %v10803_v52  ;;  %6813 = vmatprep.subr.bf16.mxu1 %v10555_v27  ;;  %v8925_v27 = vld [vmem:[#allocation5 + $0x38] sm:$0xff]  }
0x1a39   :  { %v6177_v29 = vpop.f32.mrb[92].mxu0  ;;  %v6218_v3 = vpop.f32.mrb[84].mxu1 }
0x1a3a   :  { %v6178_v20 = vadd.f32 %v6177_v29, %v6003_v37  ;;  %v6219_v23 = vadd.f32 %v6218_v3, %v6011_v60  ;;  %v6179_v49 = vpop.f32.mrb[93].mxu0  ;;  %v8317_v51 = vpop.f32.mrb[85].mxu1  ;;  %v8926_v3 = vld [vmem:[#allocation7 + $0x8] ss:$12 sps:$4 sm:$0xff]  }
0x1a3b   :  { %v6180_v48 = vadd.f32 %v6179_v49, %v6007_v1  ;;  %v6181_v54 = vpop.f32.mrb[94].mxu0  ;;  %v6221_v47 = vpop.f32.mrb[86].mxu1  ;;  %v8930_v49 = vld [vmem:[#allocation7 + $0x68] ss:$12 sps:$4 sm:$0xff]   ;;  %v8931_v51 = vld [vmem:[#allocation7 + $0x80] ss:$12 sps:$4 sm:$0xff]  }
0x1a3c   :  { %9103 = vtanh.f32 %v6178_v20  ;;  %v6182_v0 = vpop.f32.mrb[95].mxu0  ;;  %v8318_v59 = vpop.f32.mrb[87].mxu1  ;;  %v8927_v20 = vld [vmem:[#allocation7 + $0x20] ss:$12 sps:$4 sm:$0xff]   ;;  %v8933_v54 = vld [vmem:[#allocation7 + $0xb0] ss:$12 sps:$4 sm:$0xff]  }
0x1a3d   :  { %9105 = vtanh.f32 %v6219_v23  ;;  %v8929_v23 = vld [vmem:[#allocation7 + $0x50] ss:$12 sps:$4 sm:$0xff]   ;;  %v9145_v0 = vld [vmem:[%s10766_s5] ss:$0 sm:$0xff] }
0x1a3e   :  { %9107 = vtanh.f32 %v6180_v48  ;;  %v8932_v48 = vld [vmem:[#allocation7 + $0x98] ss:$12 sps:$4 sm:$0xff]  }
0x1a46   :  { %v9104_v61 = vpop.eup %9103 }
0x1a47   :  { %v9106_v55 = vpop.eup %9105 }
0x1a48   :  { %v9108_v40 = vpop.eup %9107  ;;  %v6227_v30 = vmul.f32 0.5, %v9106_v55 }
0x1a49   :  { %v6229_v50 = vsub.f32 %v9108_v40, %v9104_v61 }
0x1a4a   :  { %v6228_v39 = vadd.f32 0.5, %v6227_v30 }
0x1a4c   :  { %v6230_v42 = vmul.f32 %v6229_v50, %v6228_v39  ;;  %v8934_v50 = vld [vmem:[#allocation8] sm:$0xff]  }
0x1a4e   :  { %v6231_v8 = vadd.f32 %v9104_v61, %v6230_v42  ;;  %v8935_v42 = vld [vmem:[#allocation8 + $0x8] sm:$0xff]  }
0x1a50   :  { %v6232_v16 = vpack.c.bf16 %v6231_v8, %v6231_v8  ;;  %v8936_v8 = vld [vmem:[#allocation8 + $0x10] sm:$0xff]  }
0x1a52   :  { %6234 = vst [vmem:[#allocation2 + $0x20] sm:$0xf] %v6232_v16  ;;  %6460 = vmatmul.mubr.bf16.vlgmr.msra.gmra.mrb[96].mxu0 %v6232_v16  ;;  %6501 = vmatmul.mubr.bf16.vlgmr.msra.gmra.mrb[88].mxu1 %v6232_v16  ;;  %v8937_v16 = vld [vmem:[#allocation8 + $0x18] sm:$0xff]  }
0x1a53   :  { %8335 = vmatprep.mubr.msk.bf16.mxu0 %vm9252_vm1, %v10803_v52  ;;  %6814 = vmatpush1.bf16.msra.mxu1 %v10553_v17  ;;  %v8924_v17 = vld [vmem:[#allocation5 + $0x30] sm:$0xff]  }
0x1a54   :  { %6815 = vmatprep.subr.bf16.mxu1 %v10557_v2  ;;  %6845 = vmatprep.mubr.bf16.mxu1 %v10799_v46  ;;  %v8918_v46 = vld [vmem:[#allocation5] sm:$0xff]  }
0x1a55   :  { %8320 = vmatpush3.bf16.msra.mxu0 %v8918_v46  ;;  %v8941_v46 = vld [vmem:[#allocation8 + $0x38] sm:$0xff]  }
0x1a56   :  { %8321 = vmatprep.subr.bf16.mxu0 %v10803_v52 }
0x1a57   :  { %6816 = vmatpush1.bf16.msra.mxu1 %v10561_v26 }
0x1a58   :  { %6817 = vmatprep.subr.bf16.mxu1 %v10564_v32  ;;  %v10830_v32 = vld [vmem:[#allocation14_spill] sm:$0xff] }
0x1a59   :  { %8322 = vmatpush3.bf16.msra.mxu0 %v8919_v45  ;;  %v8942_v45 = vld [vmem:[#allocation2] sm:$0xff]  }
0x1a5a   :  { %8323 = vmatprep.subr.bf16.mxu0 %v10803_v52 }
0x1a5b   :  { %6818 = vmatpush1.bf16.msra.mxu1 %v10827_v21  ;;  %v8938_v21 = vld [vmem:[#allocation8 + $0x20] sm:$0xff]  }
0x1a5c   :  { %6819 = vmatprep.subr.bf16.mxu1 %v10828_v57  ;;  %v8939_v57 = vld [vmem:[#allocation8 + $0x28] sm:$0xff]  }
0x1a5d   :  { %8324 = vmatpush3.bf16.msra.mxu0 %v8920_v10  ;;  %v8943_v10 = vld [vmem:[#allocation2 + $0x8] sm:$0xff]  }
0x1a5e   :  { %8325 = vmatprep.subr.bf16.mxu0 %v10803_v52 }
0x1a5f   :  { %6820 = vmatpush1.bf16.msra.mxu1 %v10829_v38  ;;  %v8940_v38 = vld [vmem:[#allocation8 + $0x30] sm:$0xff]  }
0x1a60   :  { %6821 = vmatprep.subr.bf16.mxu1 %v10591_v6 }
0x1a61   :  { %8326 = vmatpush3.bf16.msra.mxu0 %v8921_v53  ;;  %v8944_v53 = vld [vmem:[#allocation2 + $0x10] sm:$0xff]  }
0x1a62   :  { %8327 = vmatprep.subr.bf16.mxu0 %v10803_v52 }
0x1a63   :  { %6822 = vmatpush1.bf16.msra.mxu1 %v10593_v35 }
0x1a64   :  { %6823 = vmatprep.subr.bf16.mxu1 %v10597_v15 }
0x1a65   :  { %8328 = vmatpush3.bf16.msra.mxu0 %v8922_v58  ;;  %v8945_v58 = vld [vmem:[#allocation2 + $0x18] sm:$0xff]  }
0x1a66   :  { %8329 = vmatprep.subr.bf16.mxu0 %v10803_v52 }
0x1a67   :  { %6824 = vmatpush1.bf16.msra.mxu1 %v10600_v41 }
0x1a68   :  { %6825 = vmatprep.subr.bf16.mxu1 %v10604_v34 }
0x1a69   :  { %8330 = vmatpush3.bf16.msra.mxu0 %v8923_v19  ;;  %v6668_v19 = vld [vmem:[%s10769_s8] sm:$0x7] }
0x1a6a   :  { %8331 = vmatprep.subr.bf16.mxu0 %v10803_v52 }
0x1a6b   :  { %6826 = vmatpush1.bf16.msra.mxu1 %v10607_v22 }
0x1a6c   :  { %6827 = vmatprep.subr.bf16.mxu1 %v10611_v4 }
0x1a6d   :  { %8332 = vmatpush3.bf16.msra.mxu0 %v8924_v17  ;;  %v6673_v17 = vrot.slane %v6668_v19, %v9390_v25 }
0x1a6e   :  { %8333 = vmatprep.subr.bf16.mxu0 %v10803_v52 }
0x1a6f   :  { %6828 = vmatpush1.bf16.msra.mxu1 %v10614_v33 }
0x1a70   :  { %8359 = vmatprep.subr.bf16.mxu1 %v10803_v52 }
0x1a71   :  { %8334 = vmatpush3.bf16.msra.mxu0 %v8925_v27  ;;  %v6681_v27 = vrot.slane %v6668_v19, %v9498_v18 }
0x1a72   :  { %8339 = vmatprep.subr.bf16.mxu0 %v10803_v52 }
0x1b25   :  { %v6461_v2 = vpop.f32.mrb[96].mxu0  ;;  %v6502_v26 = vpop.f32.mrb[88].mxu1 }
0x1b26   :  { %v6511_v6 = vadd.f32 %v6502_v26, %v10830_v32  ;;  %v6463_v35 = vpop.f32.mrb[97].mxu0  ;;  %v6504_v15 = vpop.f32.mrb[89].mxu1  ;;  %v6509_v4 = vadd.f32 %v6461_v2, %v9493_v7  ;;  %v6677_v2 = vrot.slane %v6668_v19, %v10826_v63 }
0x1b27   :  { %v6510_v41 = vadd.f32 %v6463_v35, %v9490_v5  ;;  %v6465_v24 = vpop.f32.mrb[98].mxu0  ;;  %v6506_v34 = vpop.f32.mrb[90].mxu1  ;;  %v6512_v33 = vadd.f32 %v6504_v15, %v9505_v31 }
0x1b28   :  { %v6466_v22 = vpop.f32.mrb[99].mxu0  ;;  %v6507_v62 = vpop.f32.mrb[91].mxu1  ;;  %9109 = vtanh.f32 %v6511_v6 }
0x1b29   :  { %9111 = vtanh.f32 %v6510_v41 }
0x1b2a   :  { %9113 = vtanh.f32 %v6509_v4 }
0x1b2b   :  { %9115 = vtanh.f32 %v6512_v33 }
0x1b32   :  { %v9110_v11 = vpop.eup %9109 }
0x1b33   :  { %v9112_v44 = vpop.eup %9111  ;;  %v6518_v36 = vmul.f32 0.5, %v9110_v11 }
0x1b34   :  { %v6515_v12 = vmul.f32 0.5, %v9112_v44  ;;  %v9114_v43 = vpop.eup %9113 }
0x1b35   :  { %v6519_v14 = vadd.f32 0.5, %v6518_v36  ;;  %v9116_v37 = vpop.eup %9115 }
0x1b36   :  { %v6516_v9 = vadd.f32 0.5, %v6515_v12  ;;  %v6521_v60 = vmul.f32 0.5, %v9116_v37 }
0x1b37   :  { %v6523_v5 = vmul.f32 %v6519_v14, %v10582_v28  ;;  %v8928_v28 = vld [vmem:[#allocation7 + $0x38] ss:$12 sps:$4 sm:$0xff]  }
0x1b38   :  { %v6524_v56 = vmul.f32 %v9114_v43, %v6516_v9  ;;  %v6522_v7 = vadd.f32 0.5, %v6521_v60  ;;  %v7752_v14 = vld [vmem:[%s10771_s10] ss:$0 sm:$0xff] }
0x1b3a   :  { %v6525_v13 = vadd.f32 %v6524_v56, %v6523_v5 }
0x1b3c   :  { %9117 = vtanh.f32 %v6525_v13 }
0x1b46   :  { %v9118_v1 = vpop.eup %9117 }
0x1b47   :  { %v6527_v29 = vmul.f32 %v9118_v1, %v6522_v7 }
0x1b49   :  { %v6528_v31 = vpack.c.bf16 %v6527_v29, %v6527_v29 }
0x1b4b   :  { %8336 = vmatmul.mubr.bf16.vlgmr.msra.gmra.mrb[100].mxu0 %v6528_v31 }
0x1b4c   :  { %8340 = vmatpush3.bf16.msra.mxu0 %v8926_v3  ;;  %8355 = vmatprep.mubr.msk.bf16.mxu0 %vm9252_vm1, %v10803_v52 }
0x1b4d   :  { %8341 = vmatprep.subr.bf16.mxu0 %v10803_v52 }
0x1b50   :  { %8342 = vmatpush3.bf16.msra.mxu0 %v8927_v20 }
0x1b51   :  { %8343 = vmatprep.subr.bf16.mxu0 %v10803_v52 }
0x1b54   :  { %8344 = vmatpush3.bf16.msra.mxu0 %v8928_v28 }
0x1b55   :  { %8345 = vmatprep.subr.bf16.mxu0 %v10803_v52 }
0x1b58   :  { %8346 = vmatpush3.bf16.msra.mxu0 %v8929_v23 }
0x1b59   :  { %8347 = vmatprep.subr.bf16.mxu0 %v10803_v52 }
0x1b5c   :  { %8348 = vmatpush3.bf16.msra.mxu0 %v8930_v49 }
0x1b5d   :  { %8349 = vmatprep.subr.bf16.mxu0 %v10803_v52 }
0x1b60   :  { %8350 = vmatpush3.bf16.msra.mxu0 %v8931_v51 }
0x1b61   :  { %8351 = vmatprep.subr.bf16.mxu0 %v10803_v52 }
0x1b64   :  { %8352 = vmatpush3.bf16.msra.mxu0 %v8932_v48 }
0x1b65   :  { %8353 = vmatprep.subr.bf16.mxu0 %v10803_v52 }
0x1b68   :  { %8354 = vmatpush3.bf16.msra.mxu0 %v8933_v54 }
0x1c1e   :  { %v6627_v47 = vpop.f32.mrb[100].mxu0 }
0x1c1f   :  { %v6633_v59 = vadd.f32 %v9145_v0, %v6627_v47  ;;  %v8337_v61 = vpop.f32.mrb[101].mxu0 }
0x1c20   :  { %v6630_v55 = vpop.f32.mrb[102].mxu0 }
0x1c21   :  { %9119 = vtanh.f32 %v6633_v59  ;;  %v8338_v40 = vpop.f32.mrb[103].mxu0 }
0x1c2b   :  { %v9120_v30 = vpop.eup %9119 }
0x1c2c   :  { %v6635_v39 = vpack.c.bf16 %v9120_v30, %v9120_v30 }
0x1c2e   :  { %6846 = vmatmul.mubr.bf16.vlgmr.msra.gmra.mrb[92].mxu1 %v6635_v39  ;;  %8356 = vmatmul.mubr.bf16.vlgmr.msra.gmra.mrb[104].mxu0 %v6635_v39 }
0x1c2f   :  { %8360 = vmatpush3.bf16.msra.mxu1 %v8934_v50  ;;  %8375 = vmatprep.mubr.msk.bf16.mxu1 %vm9252_vm1, %v10803_v52 }
0x1c30   :  { %8361 = vmatprep.subr.bf16.mxu1 %v10803_v52 }
0x1c33   :  { %8362 = vmatpush3.bf16.msra.mxu1 %v8935_v42 }
0x1c34   :  { %8363 = vmatprep.subr.bf16.mxu1 %v10803_v52 }
0x1c37   :  { %8364 = vmatpush3.bf16.msra.mxu1 %v8936_v8 }
0x1c38   :  { %8365 = vmatprep.subr.bf16.mxu1 %v10803_v52 }
0x1c3b   :  { %8366 = vmatpush3.bf16.msra.mxu1 %v8937_v16 }
0x1c3c   :  { %8367 = vmatprep.subr.bf16.mxu1 %v10803_v52 }
0x1c3f   :  { %8368 = vmatpush3.bf16.msra.mxu1 %v8938_v21 }
0x1c40   :  { %8369 = vmatprep.subr.bf16.mxu1 %v10803_v52 }
0x1c43   :  { %8370 = vmatpush3.bf16.msra.mxu1 %v8939_v57 }
0x1c44   :  { %8371 = vmatprep.subr.bf16.mxu1 %v10803_v52 }
0x1c47   :  { %8372 = vmatpush3.bf16.msra.mxu1 %v8940_v38 }
0x1c48   :  { %8373 = vmatprep.subr.bf16.mxu1 %v10803_v52 }
0x1c4b   :  { %8374 = vmatpush3.bf16.msra.mxu1 %v8941_v46 }
0x1c4e   :  { %8376 = vmatmul.mubr.bf16.vlgmr.msra.gmra.mrb[96].mxu1 %v8942_v45 }
0x1c4f   :  { %8379 = vmatprep.mubr.msk.bf16.mxu1 %vm9252_vm1, %v10803_v52 }
0x1c56   :  { %8380 = vmatmul.mubr.bf16.gmra.mrb[100].mxu1 %v8943_v10 }
0x1c57   :  { %8383 = vmatprep.mubr.msk.bf16.mxu1 %vm9252_vm1, %v10803_v52 }
0x1c5e   :  { %8384 = vmatmul.mubr.bf16.gmra.mrb[104].mxu1 %v8944_v53 }
0x1c5f   :  { %8387 = vmatprep.mubr.msk.bf16.mxu1 %vm9252_vm1, %v10803_v52 }
0x1c66   :  { %8388 = vmatmul.mubr.bf16.gmra.mrb[108].mxu1 %v8945_v58 }
0x1c67   :  { %8391 = vmatprep.mubr.msk.bf16.mxu1 %vm9252_vm1, %v10803_v52 }
0x1d01   :  { %v6847_v26 = vpop.f32.mrb[92].mxu1  ;;  %v6888_v32 = vpop.f32.mrb[104].mxu0 }
0x1d02   :  { %v6848_v6 = vadd.f32 %v6847_v26, %v6673_v17  ;;  %v6889_v35 = vadd.f32 %v6888_v32, %v6681_v27  ;;  %v6849_v15 = vpop.f32.mrb[93].mxu1  ;;  %v8357_v41 = vpop.f32.mrb[105].mxu0 }
0x1d03   :  { %v6850_v24 = vadd.f32 %v6849_v15, %v6677_v2  ;;  %v6851_v34 = vpop.f32.mrb[94].mxu1  ;;  %v6891_v22 = vpop.f32.mrb[106].mxu0 }
0x1d04   :  { %9121 = vtanh.f32 %v6848_v6  ;;  %v6852_v52 = vpop.f32.mrb[95].mxu1  ;;  %v8358_v62 = vpop.f32.mrb[107].mxu0 }
0x1d05   :  { %9123 = vtanh.f32 %v6889_v35 }
0x1d06   :  { %9125 = vtanh.f32 %v6850_v24 }
0x1d0e   :  { %v9122_v4 = vpop.eup %9121 }
0x1d0f   :  { %v9124_v25 = vpop.eup %9123 }
0x1d10   :  { %v9126_v33 = vpop.eup %9125  ;;  %v6897_v18 = vmul.f32 0.5, %v9124_v25 }
0x1d11   :  { %v6899_v11 = vsub.f32 %v9126_v33, %v9122_v4 }
0x1d12   :  { %v6898_v63 = vadd.f32 0.5, %v6897_v18 }
0x1d14   :  { %v6900_v44 = vmul.f32 %v6899_v11, %v6898_v63 }
0x1d16   :  { %v6901_v36 = vadd.f32 %v9122_v4, %v6900_v44 }
0x1d18   :  { %v6902_v12 = vpack.c.bf16 %v6901_v36, %v6901_v36 }
0x1d1a   :  { %6904 = vst [vmem:[#allocation2 + $0x24] sm:$0xf] %v6902_v12 }
0x1d21   :  { %v7050_v9 = vpop.f32.mrb[96].mxu1  ;;  %v8946_v43 = vld [vmem:[#allocation2 + $0x20] sm:$0xff]  }
0x1d22   :  { %v7051_v5 = vadd.f32 %v7752_v14, %v7050_v9  ;;  %v8377_v56 = vpop.f32.mrb[97].mxu1  ;;  %8392 = vmatmul.mubr.bf16.gmra.mrb[112].mxu1 %v8946_v43 }
0x1d23   :  { %v7053_v13 = vpop.f32.mrb[98].mxu1 }
0x1d24   :  { %7089 = vst [vmem:[%s10772_s11] sm:$0xff] %v7051_v5  ;;  %v7054_v37 = vadd.f32 %v7752_v14, %v7053_v13  ;;  %v8378_v60 = vpop.f32.mrb[99].mxu1 }
0x1d26   :  { %7090 = vst [vmem:[%s10772_s11 + $0x8] sm:$0xff] %v7054_v37 }
0x1d29   :  { %v7058_v7 = vpop.f32.mrb[100].mxu1 }
0x1d2a   :  { %v7059_v1 = vadd.f32 %v7752_v14, %v7058_v7  ;;  %v8381_v29 = vpop.f32.mrb[101].mxu1 }
0x1d2b   :  { %v7061_v3 = vpop.f32.mrb[102].mxu1 }
0x1d2c   :  { %7091 = vst [vmem:[%s10772_s11 + $0x10] sm:$0xff] %v7059_v1  ;;  %v7062_v31 = vadd.f32 %v7752_v14, %v7061_v3  ;;  %v8382_v20 = vpop.f32.mrb[103].mxu1 }
0x1d2e   :  { %7092 = vst [vmem:[%s10772_s11 + $0x18] sm:$0xff] %v7062_v31 }
0x1d31   :  { %v7066_v28 = vpop.f32.mrb[104].mxu1 }
0x1d32   :  { %v7067_v23 = vadd.f32 %v7752_v14, %v7066_v28  ;;  %v8385_v49 = vpop.f32.mrb[105].mxu1 }
0x1d33   :  { %v7069_v51 = vpop.f32.mrb[106].mxu1 }
0x1d34   :  { %7093 = vst [vmem:[%s10772_s11 + $0x20] sm:$0xff] %v7067_v23  ;;  %v7070_v48 = vadd.f32 %v7752_v14, %v7069_v51  ;;  %v8386_v54 = vpop.f32.mrb[107].mxu1 }
0x1d36   :  { %7094 = vst [vmem:[%s10772_s11 + $0x28] sm:$0xff] %v7070_v48 }
0x1d39   :  { %v7074_v47 = vpop.f32.mrb[108].mxu1 }
0x1d3a   :  { %v7075_v0 = vadd.f32 %v7752_v14, %v7074_v47  ;;  %v8389_v59 = vpop.f32.mrb[109].mxu1 }
0x1d3b   :  { %v7077_v61 = vpop.f32.mrb[110].mxu1 }
0x1d3c   :  { %7095 = vst [vmem:[%s10772_s11 + $0x30] sm:$0xff] %v7075_v0  ;;  %v7078_v55 = vadd.f32 %v7752_v14, %v7077_v61  ;;  %v8390_v40 = vpop.f32.mrb[111].mxu1 }
0x1d3e   :  { %7096 = vst [vmem:[%s10772_s11 + $0x38] sm:$0xff] %v7078_v55 }
0x1df5   :  { %v7082_v30 = vpop.f32.mrb[112].mxu1 }
0x1df6   :  { %v7083_v50 = vadd.f32 %v7752_v14, %v7082_v30  ;;  %v8393_v39 = vpop.f32.mrb[113].mxu1 }
0x1df7   :  { %v7085_v42 = vpop.f32.mrb[114].mxu1 }
0x1df8   :  { %7097 = vst [vmem:[%s10772_s11 + $0x40] sm:$0xff] %v7083_v50  ;;  %v7086_v8 = vadd.f32 %v7752_v14, %v7085_v42  ;;  %v8394_v16 = vpop.f32.mrb[115].mxu1 }
0x1dfa   :  { %7098 = vst [vmem:[%s10772_s11 + $0x48] sm:$0xff] %v7086_v8 }
0x1dfb   :  { %7103 = vsyncpa [#allocation4], 1 }
0x1dfc   :  { %7104 = vsyncpa [#allocation6], 1 }
0x1dfd   :  { %7105 = vsyncpa [#allocation9], 1 }

</bundles_post_ra>
